<compile_context>
chip_gen: v6e
topology: v6e:2x2x1
jax: 0.10.0
libtpu: 0.0.40
codegen_flags: <defaults>
</compile_context>

<pallas_src>
import functools

import jax
import jax.numpy as jnp
from jax.experimental import pallas as pl
from jax.experimental.pallas import tpu as pltpu


def _pick_tile_h(H, block_h):
    """Largest even divisor of H that is <= block_h (falls back to H)."""
    for th in range(min(block_h, H), 1, -1):
        if H % th == 0 and th % 2 == 0:
            return th
    return H


def _unet_block_nhwc(x, w1, b1, w2, b2, *, block_h=64,
                     compute_dtype=jnp.bfloat16):
    """Fused (conv3x3 + bias + ReLU) -> (conv3x3 + bias + ReLU) on NHWC input."""
    B, H, W, Cin = x.shape
    Cout = w1.shape[-1]
    assert w1.shape == (3, 3, Cin, Cout)
    assert w2.shape == (3, 3, Cout, Cout)

    TH = _pick_tile_h(H, block_h)      # output rows per tile
    nH = H // TH
    half = TH // 2                     # halo-block stride (TH even when nH > 1)
    n_halo_blocks = pl.cdiv(H, 2)      # 2-row blocking of H for the halo specs
    cdt = compute_dtype

    # Weights / biases resident in VMEM across the whole grid.
    w1c = w1.astype(cdt)                        # (3, 3, Cin,  Cout)
    w2c = w2.astype(cdt)                        # (3, 3, Cout, Cout)
    b1r = b1.reshape(1, Cout).astype(jnp.float32)
    b2r = b2.reshape(1, Cout).astype(jnp.float32)

    def conv3x3(src_ref, n_rows, c_in, w_ref, b_ref):
        # 3x3 "same" conv + bias + ReLU as 9 accumulated-tap MXU matmuls.
        # src_ref: VMEM ref (n_rows + 2, W, c_in) -- 1 halo row above/below,
        # already zeroed at image boundaries.  Returns (n_rows, W, Cout) f32.
        c_out = w_ref.shape[-1]
        m = n_rows * W
        acc = [None, None, None]                # per-dx partial sums (m, c_out)
        for dy in range(3):
            lhs = src_ref[dy:dy + n_rows, :, :].reshape(m, c_in)
            for dx in range(3):
                p = jnp.dot(lhs, w_ref[dy, dx],
                            preferred_element_type=jnp.float32)
                acc[dx] = p if acc[dx] is None else acc[dx] + p
        a0 = acc[0].reshape(n_rows, W, c_out)
        a1 = acc[1].reshape(n_rows, W, c_out)
        a2 = acc[2].reshape(n_rows, W, c_out)
        # "same" padding along W on the f32 partials: dx=0 reads column x-1,
        # dx=2 reads column x+1; out-of-range columns contribute zero.
        zcol = jnp.zeros((n_rows, 1, c_out), jnp.float32)
        out = a1
        out = out + jnp.concatenate([zcol, a0[:, :W - 1, :]], axis=1)
        out = out + jnp.concatenate([a2[:, 1:, :], zcol], axis=1)
        return jnp.maximum(out + b_ref[...].reshape(1, 1, c_out), 0.0)

    def kernel(top_ref, core_ref, bot_ref, w1_ref, b1_ref, w2_ref, b2_ref,
               o_ref, x_buf, mid_buf):
        t = pl.program_id(1)
        last = pl.num_programs(1) - 1

        # ---- assemble the (TH+4, W, Cin) input window in compute dtype ------
        x_buf[2:TH + 2, :, :] = core_ref[0].astype(cdt)

        @pl.when(t > 0)
        def _():
            x_buf[0:2, :, :] = top_ref[0].astype(cdt)

        @pl.when(t == 0)
        def _():
            x_buf[0:2, :, :] = jnp.zeros((2, W, Cin), cdt)

        @pl.when(t < last)
        def _():
            x_buf[TH + 2:TH + 4, :, :] = bot_ref[0].astype(cdt)

        @pl.when(t == last)
        def _():
            x_buf[TH + 2:TH + 4, :, :] = jnp.zeros((2, W, Cin), cdt)

        # ---- conv1 + ReLU over TH+2 rows (+1 halo row each side for conv2) --
        mid = conv3x3(x_buf, TH + 2, Cin, w1_ref, b1_ref)
        mid_buf[...] = mid.astype(cdt)

        # conv2's zero "same" padding along H: intermediate halo rows that fall
        # outside the image must be 0, not conv1(zero-padded input).
        @pl.when(t == 0)
        def _():
            mid_buf[0:1, :, :] = jnp.zeros((1, W, Cout), cdt)

        @pl.when(t == last)
        def _():
            mid_buf[TH + 1:TH + 2, :, :] = jnp.zeros((1, W, Cout), cdt)

        # ---- conv2 + ReLU over the TH output rows ---------------------------
        out = conv3x3(mid_buf, TH, Cout, w2_ref, b2_ref)
        o_ref[...] = out.reshape(1, TH, W, Cout).astype(o_ref.dtype)

    # VMEM budget from the actual tile footprint (double-buffered I/O blocks +
    # resident weights + scratch + f32 matmul partials), clamped so small
    # tiles don't over-reserve and large ones stay under v7x's 64 MiB.
    in_b = x.dtype.itemsize
    cdt_b = jnp.dtype(cdt).itemsize
    est = 2 * ((TH + 4) * W * Cin * in_b + TH * W * Cout * in_b)       # I/O blocks
    est += 2 * (9 * Cin * Cout + 9 * Cout * Cout + 2 * Cout) * 4       # weights/bias
    est += ((TH + 4) * W * Cin + (TH + 2) * W * Cout) * cdt_b          # scratch
    est += 6 * (TH + 2) * W * Cout * 4                                 # f32 partials
    vmem_limit = int(min(max(2 * est, 32 * 1024 * 1024), 100 * 1024 * 1024))

    grid_spec = pltpu.PrefetchScalarGridSpec(
        num_scalar_prefetch=0,
        grid=(B, nH),
        in_specs=[
            # 2-row top halo (index clamped; zero-substituted on the first tile).
            pl.BlockSpec((1, 2, W, Cin),
                         lambda b, t: (b, jnp.maximum(t * half - 1, 0), 0, 0)),
            # TH-row core tile.
            pl.BlockSpec((1, TH, W, Cin), lambda b, t: (b, t, 0, 0)),
            # 2-row bottom halo (index clamped; zero-substituted on the last tile).
            pl.BlockSpec((1, 2, W, Cin),
                         lambda b, t: (b, jnp.minimum(t * half + half,
                                                      n_halo_blocks - 1), 0, 0)),
            pl.BlockSpec((3, 3, Cin, Cout), lambda b, t: (0, 0, 0, 0)),
            pl.BlockSpec((1, Cout), lambda b, t: (0, 0)),
            pl.BlockSpec((3, 3, Cout, Cout), lambda b, t: (0, 0, 0, 0)),
            pl.BlockSpec((1, Cout), lambda b, t: (0, 0)),
        ],
        out_specs=pl.BlockSpec((1, TH, W, Cout), lambda b, t: (b, t, 0, 0)),
        scratch_shapes=[
            pltpu.VMEM((TH + 4, W, Cin), cdt),     # input tile + 2-row halos
            pltpu.VMEM((TH + 2, W, Cout), cdt),    # conv1 out + 1-row halos
        ],
    )

    return pl.pallas_call(
        kernel,
        out_shape=jax.ShapeDtypeStruct((B, H, W, Cout), x.dtype),
        grid_spec=grid_spec,
        compiler_params=pltpu.CompilerParams(
            dimension_semantics=("parallel", "parallel"),
            vmem_limit_bytes=vmem_limit,
        ),
    )(x, x, x, w1c, b1r, w2c, b2r)


def unet_block(x_nchw, params, *, block_h=64, compute_dtype=jnp.bfloat16):
    """Forward pass of UNetBlock: conv1 -> conv2 (each conv3x3 + bias + ReLU).

    x_nchw: (B, Cin, H, W) like the PyTorch module input.  Returns (B, Cout, H, W).
    """
    x = jnp.transpose(x_nchw, (0, 2, 3, 1))          # NCHW -> NHWC
    y = _unet_block_nhwc(x, params["w1"], params["b1"], params["w2"],
                         params["b2"], block_h=block_h,
                         compute_dtype=compute_dtype)
    return jnp.transpose(y, (0, 3, 1, 2))            # NHWC -> NCHW


def init_params(key, in_channels, out_channels):
    k1, k2, k3, k4 = jax.random.split(key, 4)
    scale1 = 1.0 / jnp.sqrt(in_channels * 9.0)
    scale2 = 1.0 / jnp.sqrt(out_channels * 9.0)
    return {
        "w1": jax.random.normal(k1, (3, 3, in_channels, out_channels), jnp.float32) * scale1,
        "b1": jax.random.normal(k2, (out_channels,), jnp.float32) * 0.1,
        "w2": jax.random.normal(k3, (3, 3, out_channels, out_channels), jnp.float32) * scale2,
        "b2": jax.random.normal(k4, (out_channels,), jnp.float32) * 0.1,
    }


def _reference(x_nchw, params):
    """Pure-JAX reference (NCHW conv) for correctness check."""
    def conv(x, w, b):
        y = jax.lax.conv_general_dilated(
            x, w, window_strides=(1, 1), padding="SAME",
            dimension_numbers=("NCHW", "HWIO", "NCHW"),
        )
        y = y + b.reshape(1, -1, 1, 1)
        return jnp.maximum(y, 0.0)

    x = conv(x_nchw, params["w1"], params["b1"])
    x = conv(x, params["w2"], params["b2"])
    return x


if __name__ == "__main__":
    key = jax.random.PRNGKey(0)
    k_x, k_p = jax.random.split(key)

    B, Cin, Cout, H, W = 2, 4, 8, 16, 16
    x = jax.random.normal(k_x, (B, Cin, H, W), jnp.float32)
    params = init_params(k_p, Cin, Cout)

    ref = _reference(x, params)

    # f32 compute path at several row tilings (exercises the single-tile path,
    # boundary tiles and interior tiles / halo logic).
    for bh in (16, 8, 4):
        run = jax.jit(functools.partial(unet_block, block_h=bh,
                                        compute_dtype=jnp.float32))
        out = jax.block_until_ready(run(x, params))
        assert out.shape == (B, Cout, H, W)
        assert jnp.allclose(out, ref, atol=1e-3, rtol=1e-3), (
            f"mismatch at block_h={bh}, max abs err "
            f"{jnp.max(jnp.abs(out - ref))}")

    # Default bf16 MXU path (looser numerical tolerance).
    run_bf16 = jax.jit(functools.partial(unet_block, block_h=8))
    out_bf16 = jax.block_until_ready(run_bf16(x, params))
    assert jnp.allclose(out_bf16, ref, atol=2e-1, rtol=2e-1)

    print("KERNEL_OK")
</pallas_src>

<mosaic_0001>
module attributes {stable_mosaic.version = 11 : i64} {
  func.func @kernel(%arg0: i32, %arg1: i32, %arg2: memref<1x2x16x4xf32, #tpu.memory_space<vmem>>, %arg3: memref<1x16x16x4xf32, #tpu.memory_space<vmem>>, %arg4: memref<1x2x16x4xf32, #tpu.memory_space<vmem>>, %arg5: memref<3x3x4x8xf32, #tpu.memory_space<vmem>>, %arg6: memref<1x8xf32, #tpu.memory_space<vmem>>, %arg7: memref<3x3x8x8xf32, #tpu.memory_space<vmem>>, %arg8: memref<1x8xf32, #tpu.memory_space<vmem>>, %arg9: memref<1x16x16x8xf32, #tpu.memory_space<vmem>>, %arg10: memref<20x16x4xf32, #tpu.memory_space<vmem>>, %arg11: memref<18x16x8xf32, #tpu.memory_space<vmem>>) attributes {dimension_semantics = [#tpu.dimension_semantics<parallel>, #tpu.dimension_semantics<parallel>], iteration_bounds = array<i64: 2, 1>, scalar_prefetch = 0 : i64, scratch_operands = 2 : i64, tpu.core_type = #tpu.core_type<tc>, window_params = [{transform_indices = @transform_0, window_bounds = array<i64: 1, 2, 16, 4>}, {transform_indices = @transform_1, window_bounds = array<i64: 1, 16, 16, 4>}, {transform_indices = @transform_2, window_bounds = array<i64: 1, 2, 16, 4>}, {pipeline_mode = #tpu.pipeline_mode<synchronous>, transform_indices = @transform_3, window_bounds = array<i64: 3, 3, 4, 8>}, {pipeline_mode = #tpu.pipeline_mode<synchronous>, transform_indices = @transform_4, window_bounds = array<i64: 1, 8>}, {pipeline_mode = #tpu.pipeline_mode<synchronous>, transform_indices = @transform_5, window_bounds = array<i64: 3, 3, 8, 8>}, {pipeline_mode = #tpu.pipeline_mode<synchronous>, transform_indices = @transform_6, window_bounds = array<i64: 1, 8>}, {transform_indices = @transform_7, window_bounds = array<i64: 1, 16, 16, 8>}]} {
    %c0 = arith.constant 0 : index
    %c0_0 = arith.constant 0 : index
    %c0_1 = arith.constant 0 : index
    %c0_2 = arith.constant 0 : index
    %0 = vector.load %arg3[%c0, %c0_0, %c0_1, %c0_2] : memref<1x16x16x4xf32, #tpu.memory_space<vmem>>, vector<1x16x16x4xf32>
    %1 = vector.shape_cast %0 : vector<1x16x16x4xf32> to vector<16x16x4xf32>
    %c2 = arith.constant 2 : index
    %c0_3 = arith.constant 0 : index
    %c0_4 = arith.constant 0 : index
    %2 = vector.load %arg10[%c2, %c0_3, %c0_4] : memref<20x16x4xf32, #tpu.memory_space<vmem>>, vector<16x16x4xf32>
    tpu.vector_store %arg10[%c2, %c0_3, %c0_4], %1 {strides = array<i32>} : memref<20x16x4xf32, #tpu.memory_space<vmem>>, vector<16x16x4xf32>,
    %c0_i32 = arith.constant 0 : i32
    %3 = arith.cmpi sgt, %arg1, %c0_i32 : i32
    %4 = arith.extui %3 : i1 to i32
    %c0_i32_5 = arith.constant 0 : i32
    %5 = arith.cmpi ne, %4, %c0_i32_5 : i32
    scf.if %5 {
      %c0_137 = arith.constant 0 : index
      %c0_138 = arith.constant 0 : index
      %c0_139 = arith.constant 0 : index
      %c0_140 = arith.constant 0 : index
      %134 = vector.load %arg2[%c0_137, %c0_138, %c0_139, %c0_140] : memref<1x2x16x4xf32, #tpu.memory_space<vmem>>, vector<1x2x16x4xf32>
      %135 = vector.shape_cast %134 : vector<1x2x16x4xf32> to vector<2x16x4xf32>
      %c0_141 = arith.constant 0 : index
      %c0_142 = arith.constant 0 : index
      %c0_143 = arith.constant 0 : index
      %136 = vector.load %arg10[%c0_141, %c0_142, %c0_143] : memref<20x16x4xf32, #tpu.memory_space<vmem>>, vector<2x16x4xf32>
      tpu.vector_store %arg10[%c0_141, %c0_142, %c0_143], %135 {strides = array<i32>} : memref<20x16x4xf32, #tpu.memory_space<vmem>>, vector<2x16x4xf32>,
    } else {
    }
    %c0_i32_6 = arith.constant 0 : i32
    %6 = arith.cmpi eq, %arg1, %c0_i32_6 : i32
    %7 = arith.extui %6 : i1 to i32
    %c0_i32_7 = arith.constant 0 : i32
    %8 = arith.cmpi ne, %7, %c0_i32_7 : i32
    scf.if %8 {
      %cst_137 = arith.constant 0.000000e+00 : f32
      %134 = vector.broadcast %cst_137 : f32 to vector<2x16x4xf32>
      %c0_138 = arith.constant 0 : index
      %c0_139 = arith.constant 0 : index
      %c0_140 = arith.constant 0 : index
      %135 = vector.load %arg10[%c0_138, %c0_139, %c0_140] : memref<20x16x4xf32, #tpu.memory_space<vmem>>, vector<2x16x4xf32>
      tpu.vector_store %arg10[%c0_138, %c0_139, %c0_140], %134 {strides = array<i32>} : memref<20x16x4xf32, #tpu.memory_space<vmem>>, vector<2x16x4xf32>,
    } else {
    }
    %c0_i32_8 = arith.constant 0 : i32
    %9 = arith.cmpi slt, %arg1, %c0_i32_8 : i32
    %10 = arith.extui %9 : i1 to i32
    %c0_i32_9 = arith.constant 0 : i32
    %11 = arith.cmpi ne, %10, %c0_i32_9 : i32
    scf.if %11 {
      %c0_137 = arith.constant 0 : index
      %c0_138 = arith.constant 0 : index
      %c0_139 = arith.constant 0 : index
      %c0_140 = arith.constant 0 : index
      %134 = vector.load %arg4[%c0_137, %c0_138, %c0_139, %c0_140] : memref<1x2x16x4xf32, #tpu.memory_space<vmem>>, vector<1x2x16x4xf32>
      %135 = vector.shape_cast %134 : vector<1x2x16x4xf32> to vector<2x16x4xf32>
      %c18 = arith.constant 18 : index
      %c0_141 = arith.constant 0 : index
      %c0_142 = arith.constant 0 : index
      %136 = vector.load %arg10[%c18, %c0_141, %c0_142] : memref<20x16x4xf32, #tpu.memory_space<vmem>>, vector<2x16x4xf32>
      tpu.vector_store %arg10[%c18, %c0_141, %c0_142], %135 {strides = array<i32>} : memref<20x16x4xf32, #tpu.memory_space<vmem>>, vector<2x16x4xf32>,
    } else {
    }
    %c0_i32_10 = arith.constant 0 : i32
    %12 = arith.cmpi eq, %arg1, %c0_i32_10 : i32
    %13 = arith.extui %12 : i1 to i32
    %c0_i32_11 = arith.constant 0 : i32
    %14 = arith.cmpi ne, %13, %c0_i32_11 : i32
    scf.if %14 {
      %cst_137 = arith.constant 0.000000e+00 : f32
      %134 = vector.broadcast %cst_137 : f32 to vector<2x16x4xf32>
      %c18 = arith.constant 18 : index
      %c0_138 = arith.constant 0 : index
      %c0_139 = arith.constant 0 : index
      %135 = vector.load %arg10[%c18, %c0_138, %c0_139] : memref<20x16x4xf32, #tpu.memory_space<vmem>>, vector<2x16x4xf32>
      tpu.vector_store %arg10[%c18, %c0_138, %c0_139], %134 {strides = array<i32>} : memref<20x16x4xf32, #tpu.memory_space<vmem>>, vector<2x16x4xf32>,
    } else {
    }
    %c0_12 = arith.constant 0 : index
    %c0_13 = arith.constant 0 : index
    %c0_14 = arith.constant 0 : index
    %15 = vector.load %arg10[%c0_12, %c0_13, %c0_14] : memref<20x16x4xf32, #tpu.memory_space<vmem>>, vector<18x16x4xf32>
    %16 = vector.shape_cast %15 : vector<18x16x4xf32> to vector<288x4xf32>
    %c0_15 = arith.constant 0 : index
    %c0_16 = arith.constant 0 : index
    %c0_17 = arith.constant 0 : index
    %c0_18 = arith.constant 0 : index
    %17 = vector.load %arg5[%c0_15, %c0_16, %c0_17, %c0_18] : memref<3x3x4x8xf32, #tpu.memory_space<vmem>>, vector<1x1x4x8xf32>
    %18 = vector.shape_cast %17 : vector<1x1x4x8xf32> to vector<4x8xf32>
    %cst = arith.constant dense<0.000000e+00> : vector<288x8xf32>
    %19 = tpu.matmul %16, %18, %cst {dimension_numbers = #tpu.dot_dimension_numbers<[1], [0], [0], [1], [0, 0, 1, 1], [], []>} : vector<288x4xf32>, vector<4x8xf32>, vector<288x8xf32> -> vector<288x8xf32>
    %c0_19 = arith.constant 0 : index
    %c1 = arith.constant 1 : index
    %c0_20 = arith.constant 0 : index
    %c0_21 = arith.constant 0 : index
    %20 = vector.load %arg5[%c0_19, %c1, %c0_20, %c0_21] : memref<3x3x4x8xf32, #tpu.memory_space<vmem>>, vector<1x1x4x8xf32>
    %21 = vector.shape_cast %20 : vector<1x1x4x8xf32> to vector<4x8xf32>
    %cst_22 = arith.constant dense<0.000000e+00> : vector<288x8xf32>
    %22 = tpu.matmul %16, %21, %cst_22 {dimension_numbers = #tpu.dot_dimension_numbers<[1], [0], [0], [1], [0, 0, 1, 1], [], []>} : vector<288x4xf32>, vector<4x8xf32>, vector<288x8xf32> -> vector<288x8xf32>
    %c0_23 = arith.constant 0 : index
    %c2_24 = arith.constant 2 : index
    %c0_25 = arith.constant 0 : index
    %c0_26 = arith.constant 0 : index
    %23 = vector.load %arg5[%c0_23, %c2_24, %c0_25, %c0_26] : memref<3x3x4x8xf32, #tpu.memory_space<vmem>>, vector<1x1x4x8xf32>
    %24 = vector.shape_cast %23 : vector<1x1x4x8xf32> to vector<4x8xf32>
    %cst_27 = arith.constant dense<0.000000e+00> : vector<288x8xf32>
    %25 = tpu.matmul %16, %24, %cst_27 {dimension_numbers = #tpu.dot_dimension_numbers<[1], [0], [0], [1], [0, 0, 1, 1], [], []>} : vector<288x4xf32>, vector<4x8xf32>, vector<288x8xf32> -> vector<288x8xf32>
    %c1_28 = arith.constant 1 : index
    %c0_29 = arith.constant 0 : index
    %c0_30 = arith.constant 0 : index
    %26 = vector.load %arg10[%c1_28, %c0_29, %c0_30] : memref<20x16x4xf32, #tpu.memory_space<vmem>>, vector<18x16x4xf32>
    %27 = vector.shape_cast %26 : vector<18x16x4xf32> to vector<288x4xf32>
    %c1_31 = arith.constant 1 : index
    %c0_32 = arith.constant 0 : index
    %c0_33 = arith.constant 0 : index
    %c0_34 = arith.constant 0 : index
    %28 = vector.load %arg5[%c1_31, %c0_32, %c0_33, %c0_34] : memref<3x3x4x8xf32, #tpu.memory_space<vmem>>, vector<1x1x4x8xf32>
    %29 = vector.shape_cast %28 : vector<1x1x4x8xf32> to vector<4x8xf32>
    %cst_35 = arith.constant dense<0.000000e+00> : vector<288x8xf32>
    %30 = tpu.matmul %27, %29, %cst_35 {dimension_numbers = #tpu.dot_dimension_numbers<[1], [0], [0], [1], [0, 0, 1, 1], [], []>} : vector<288x4xf32>, vector<4x8xf32>, vector<288x8xf32> -> vector<288x8xf32>
    %31 = arith.addf %19, %30 : vector<288x8xf32>
    %c1_36 = arith.constant 1 : index
    %c1_37 = arith.constant 1 : index
    %c0_38 = arith.constant 0 : index
    %c0_39 = arith.constant 0 : index
    %32 = vector.load %arg5[%c1_36, %c1_37, %c0_38, %c0_39] : memref<3x3x4x8xf32, #tpu.memory_space<vmem>>, vector<1x1x4x8xf32>
    %33 = vector.shape_cast %32 : vector<1x1x4x8xf32> to vector<4x8xf32>
    %cst_40 = arith.constant dense<0.000000e+00> : vector<288x8xf32>
    %34 = tpu.matmul %27, %33, %cst_40 {dimension_numbers = #tpu.dot_dimension_numbers<[1], [0], [0], [1], [0, 0, 1, 1], [], []>} : vector<288x4xf32>, vector<4x8xf32>, vector<288x8xf32> -> vector<288x8xf32>
    %35 = arith.addf %22, %34 : vector<288x8xf32>
    %c1_41 = arith.constant 1 : index
    %c2_42 = arith.constant 2 : index
    %c0_43 = arith.constant 0 : index
    %c0_44 = arith.constant 0 : index
    %36 = vector.load %arg5[%c1_41, %c2_42, %c0_43, %c0_44] : memref<3x3x4x8xf32, #tpu.memory_space<vmem>>, vector<1x1x4x8xf32>
    %37 = vector.shape_cast %36 : vector<1x1x4x8xf32> to vector<4x8xf32>
    %cst_45 = arith.constant dense<0.000000e+00> : vector<288x8xf32>
    %38 = tpu.matmul %27, %37, %cst_45 {dimension_numbers = #tpu.dot_dimension_numbers<[1], [0], [0], [1], [0, 0, 1, 1], [], []>} : vector<288x4xf32>, vector<4x8xf32>, vector<288x8xf32> -> vector<288x8xf32>
    %39 = arith.addf %25, %38 : vector<288x8xf32>
    %c2_46 = arith.constant 2 : index
    %c0_47 = arith.constant 0 : index
    %c0_48 = arith.constant 0 : index
    %40 = vector.load %arg10[%c2_46, %c0_47, %c0_48] : memref<20x16x4xf32, #tpu.memory_space<vmem>>, vector<18x16x4xf32>
    %41 = vector.shape_cast %40 : vector<18x16x4xf32> to vector<288x4xf32>
    %c2_49 = arith.constant 2 : index
    %c0_50 = arith.constant 0 : index
    %c0_51 = arith.constant 0 : index
    %c0_52 = arith.constant 0 : index
    %42 = vector.load %arg5[%c2_49, %c0_50, %c0_51, %c0_52] : memref<3x3x4x8xf32, #tpu.memory_space<vmem>>, vector<1x1x4x8xf32>
    %43 = vector.shape_cast %42 : vector<1x1x4x8xf32> to vector<4x8xf32>
    %cst_53 = arith.constant dense<0.000000e+00> : vector<288x8xf32>
    %44 = tpu.matmul %41, %43, %cst_53 {dimension_numbers = #tpu.dot_dimension_numbers<[1], [0], [0], [1], [0, 0, 1, 1], [], []>} : vector<288x4xf32>, vector<4x8xf32>, vector<288x8xf32> -> vector<288x8xf32>
    %45 = arith.addf %31, %44 : vector<288x8xf32>
    %c2_54 = arith.constant 2 : index
    %c1_55 = arith.constant 1 : index
    %c0_56 = arith.constant 0 : index
    %c0_57 = arith.constant 0 : index
    %46 = vector.load %arg5[%c2_54, %c1_55, %c0_56, %c0_57] : memref<3x3x4x8xf32, #tpu.memory_space<vmem>>, vector<1x1x4x8xf32>
    %47 = vector.shape_cast %46 : vector<1x1x4x8xf32> to vector<4x8xf32>
    %cst_58 = arith.constant dense<0.000000e+00> : vector<288x8xf32>
    %48 = tpu.matmul %41, %47, %cst_58 {dimension_numbers = #tpu.dot_dimension_numbers<[1], [0], [0], [1], [0, 0, 1, 1], [], []>} : vector<288x4xf32>, vector<4x8xf32>, vector<288x8xf32> -> vector<288x8xf32>
    %49 = arith.addf %35, %48 : vector<288x8xf32>
    %c2_59 = arith.constant 2 : index
    %c2_60 = arith.constant 2 : index
    %c0_61 = arith.constant 0 : index
    %c0_62 = arith.constant 0 : index
    %50 = vector.load %arg5[%c2_59, %c2_60, %c0_61, %c0_62] : memref<3x3x4x8xf32, #tpu.memory_space<vmem>>, vector<1x1x4x8xf32>
    %51 = vector.shape_cast %50 : vector<1x1x4x8xf32> to vector<4x8xf32>
    %cst_63 = arith.constant dense<0.000000e+00> : vector<288x8xf32>
    %52 = tpu.matmul %41, %51, %cst_63 {dimension_numbers = #tpu.dot_dimension_numbers<[1], [0], [0], [1], [0, 0, 1, 1], [], []>} : vector<288x4xf32>, vector<4x8xf32>, vector<288x8xf32> -> vector<288x8xf32>
    %53 = arith.addf %39, %52 : vector<288x8xf32>
    %54 = vector.shape_cast %45 : vector<288x8xf32> to vector<18x16x8xf32>
    %55 = vector.shape_cast %49 : vector<288x8xf32> to vector<18x16x8xf32>
    %56 = vector.shape_cast %53 : vector<288x8xf32> to vector<18x16x8xf32>
    %cst_64 = arith.constant 0.000000e+00 : f32
    %57 = vector.broadcast %cst_64 : f32 to vector<18x1x8xf32>
    %58 = vector.extract_strided_slice %54 {offsets = [0, 0, 0], sizes = [18, 15, 8], strides = [1, 1, 1]} : vector<18x16x8xf32> to vector<18x15x8xf32>
    %59 = tpu.concatenate %57, %58 in 1 : vector<18x1x8xf32>, vector<18x15x8xf32> -> vector<18x16x8xf32>
    %60 = arith.addf %55, %59 : vector<18x16x8xf32>
    %61 = vector.extract_strided_slice %56 {offsets = [0, 1, 0], sizes = [18, 15, 8], strides = [1, 1, 1]} : vector<18x16x8xf32> to vector<18x15x8xf32>
    %62 = tpu.concatenate %61, %57 in 1 : vector<18x15x8xf32>, vector<18x1x8xf32> -> vector<18x16x8xf32>
    %63 = arith.addf %60, %62 : vector<18x16x8xf32>
    %c0_65 = arith.constant 0 : index
    %c0_66 = arith.constant 0 : index
    %64 = vector.load %arg6[%c0_65, %c0_66] : memref<1x8xf32, #tpu.memory_space<vmem>>, vector<1x8xf32>
    %65 = vector.shape_cast %64 : vector<1x8xf32> to vector<1x1x8xf32>
    %66 = vector.broadcast %65 : vector<1x1x8xf32> to vector<18x16x8xf32>
    %67 = arith.addf %63, %66 : vector<18x16x8xf32>
    %cst_67 = arith.constant 0.000000e+00 : f32
    %68 = vector.broadcast %cst_67 : f32 to vector<18x16x8xf32>
    %69 = arith.maximumf %67, %68 : vector<18x16x8xf32>
    %c0_68 = arith.constant 0 : index
    %c0_69 = arith.constant 0 : index
    %c0_70 = arith.constant 0 : index
    %70 = vector.load %arg11[%c0_68, %c0_69, %c0_70] : memref<18x16x8xf32, #tpu.memory_space<vmem>>, vector<18x16x8xf32>
    tpu.vector_store %arg11[%c0_68, %c0_69, %c0_70], %69 {strides = array<i32>} : memref<18x16x8xf32, #tpu.memory_space<vmem>>, vector<18x16x8xf32>,
    %c0_i32_71 = arith.constant 0 : i32
    %71 = arith.cmpi eq, %arg1, %c0_i32_71 : i32
    %72 = arith.extui %71 : i1 to i32
    %c0_i32_72 = arith.constant 0 : i32
    %73 = arith.cmpi ne, %72, %c0_i32_72 : i32
    scf.if %73 {
      %cst_137 = arith.constant 0.000000e+00 : f32
      %134 = vector.broadcast %cst_137 : f32 to vector<1x16x8xf32>
      %c0_138 = arith.constant 0 : index
      %c0_139 = arith.constant 0 : index
      %c0_140 = arith.constant 0 : index
      %135 = vector.load %arg11[%c0_138, %c0_139, %c0_140] : memref<18x16x8xf32, #tpu.memory_space<vmem>>, vector<1x16x8xf32>
      tpu.vector_store %arg11[%c0_138, %c0_139, %c0_140], %134 {strides = array<i32>} : memref<18x16x8xf32, #tpu.memory_space<vmem>>, vector<1x16x8xf32>,
    } else {
    }
    %c0_i32_73 = arith.constant 0 : i32
    %74 = arith.cmpi eq, %arg1, %c0_i32_73 : i32
    %75 = arith.extui %74 : i1 to i32
    %c0_i32_74 = arith.constant 0 : i32
    %76 = arith.cmpi ne, %75, %c0_i32_74 : i32
    scf.if %76 {
      %cst_137 = arith.constant 0.000000e+00 : f32
      %134 = vector.broadcast %cst_137 : f32 to vector<1x16x8xf32>
      %c17 = arith.constant 17 : index
      %c0_138 = arith.constant 0 : index
      %c0_139 = arith.constant 0 : index
      %135 = vector.load %arg11[%c17, %c0_138, %c0_139] : memref<18x16x8xf32, #tpu.memory_space<vmem>>, vector<1x16x8xf32>
      tpu.vector_store %arg11[%c17, %c0_138, %c0_139], %134 {strides = array<i32>} : memref<18x16x8xf32, #tpu.memory_space<vmem>>, vector<1x16x8xf32>,
    } else {
    }
    %c0_75 = arith.constant 0 : index
    %c0_76 = arith.constant 0 : index
    %c0_77 = arith.constant 0 : index
    %77 = vector.load %arg11[%c0_75, %c0_76, %c0_77] : memref<18x16x8xf32, #tpu.memory_space<vmem>>, vector<16x16x8xf32>
    %78 = vector.shape_cast %77 : vector<16x16x8xf32> to vector<256x8xf32>
    %c0_78 = arith.constant 0 : index
    %c0_79 = arith.constant 0 : index
    %c0_80 = arith.constant 0 : index
    %c0_81 = arith.constant 0 : index
    %79 = vector.load %arg7[%c0_78, %c0_79, %c0_80, %c0_81] : memref<3x3x8x8xf32, #tpu.memory_space<vmem>>, vector<1x1x8x8xf32>
    %80 = vector.shape_cast %79 : vector<1x1x8x8xf32> to vector<8x8xf32>
    %cst_82 = arith.constant dense<0.000000e+00> : vector<256x8xf32>
    %81 = tpu.matmul %78, %80, %cst_82 {dimension_numbers = #tpu.dot_dimension_numbers<[1], [0], [0], [1], [0, 0, 1, 1], [], []>} : vector<256x8xf32>, vector<8x8xf32>, vector<256x8xf32> -> vector<256x8xf32>
    %c0_83 = arith.constant 0 : index
    %c1_84 = arith.constant 1 : index
    %c0_85 = arith.constant 0 : index
    %c0_86 = arith.constant 0 : index
    %82 = vector.load %arg7[%c0_83, %c1_84, %c0_85, %c0_86] : memref<3x3x8x8xf32, #tpu.memory_space<vmem>>, vector<1x1x8x8xf32>
    %83 = vector.shape_cast %82 : vector<1x1x8x8xf32> to vector<8x8xf32>
    %cst_87 = arith.constant dense<0.000000e+00> : vector<256x8xf32>
    %84 = tpu.matmul %78, %83, %cst_87 {dimension_numbers = #tpu.dot_dimension_numbers<[1], [0], [0], [1], [0, 0, 1, 1], [], []>} : vector<256x8xf32>, vector<8x8xf32>, vector<256x8xf32> -> vector<256x8xf32>
    %c0_88 = arith.constant 0 : index
    %c2_89 = arith.constant 2 : index
    %c0_90 = arith.constant 0 : index
    %c0_91 = arith.constant 0 : index
    %85 = vector.load %arg7[%c0_88, %c2_89, %c0_90, %c0_91] : memref<3x3x8x8xf32, #tpu.memory_space<vmem>>, vector<1x1x8x8xf32>
    %86 = vector.shape_cast %85 : vector<1x1x8x8xf32> to vector<8x8xf32>
    %cst_92 = arith.constant dense<0.000000e+00> : vector<256x8xf32>
    %87 = tpu.matmul %78, %86, %cst_92 {dimension_numbers = #tpu.dot_dimension_numbers<[1], [0], [0], [1], [0, 0, 1, 1], [], []>} : vector<256x8xf32>, vector<8x8xf32>, vector<256x8xf32> -> vector<256x8xf32>
    %c1_93 = arith.constant 1 : index
    %c0_94 = arith.constant 0 : index
    %c0_95 = arith.constant 0 : index
    %88 = vector.load %arg11[%c1_93, %c0_94, %c0_95] : memref<18x16x8xf32, #tpu.memory_space<vmem>>, vector<16x16x8xf32>
    %89 = vector.shape_cast %88 : vector<16x16x8xf32> to vector<256x8xf32>
    %c1_96 = arith.constant 1 : index
    %c0_97 = arith.constant 0 : index
    %c0_98 = arith.constant 0 : index
    %c0_99 = arith.constant 0 : index
    %90 = vector.load %arg7[%c1_96, %c0_97, %c0_98, %c0_99] : memref<3x3x8x8xf32, #tpu.memory_space<vmem>>, vector<1x1x8x8xf32>
    %91 = vector.shape_cast %90 : vector<1x1x8x8xf32> to vector<8x8xf32>
    %cst_100 = arith.constant dense<0.000000e+00> : vector<256x8xf32>
    %92 = tpu.matmul %89, %91, %cst_100 {dimension_numbers = #tpu.dot_dimension_numbers<[1], [0], [0], [1], [0, 0, 1, 1], [], []>} : vector<256x8xf32>, vector<8x8xf32>, vector<256x8xf32> -> vector<256x8xf32>
    %93 = arith.addf %81, %92 : vector<256x8xf32>
    %c1_101 = arith.constant 1 : index
    %c1_102 = arith.constant 1 : index
    %c0_103 = arith.constant 0 : index
    %c0_104 = arith.constant 0 : index
    %94 = vector.load %arg7[%c1_101, %c1_102, %c0_103, %c0_104] : memref<3x3x8x8xf32, #tpu.memory_space<vmem>>, vector<1x1x8x8xf32>
    %95 = vector.shape_cast %94 : vector<1x1x8x8xf32> to vector<8x8xf32>
    %cst_105 = arith.constant dense<0.000000e+00> : vector<256x8xf32>
    %96 = tpu.matmul %89, %95, %cst_105 {dimension_numbers = #tpu.dot_dimension_numbers<[1], [0], [0], [1], [0, 0, 1, 1], [], []>} : vector<256x8xf32>, vector<8x8xf32>, vector<256x8xf32> -> vector<256x8xf32>
    %97 = arith.addf %84, %96 : vector<256x8xf32>
    %c1_106 = arith.constant 1 : index
    %c2_107 = arith.constant 2 : index
    %c0_108 = arith.constant 0 : index
    %c0_109 = arith.constant 0 : index
    %98 = vector.load %arg7[%c1_106, %c2_107, %c0_108, %c0_109] : memref<3x3x8x8xf32, #tpu.memory_space<vmem>>, vector<1x1x8x8xf32>
    %99 = vector.shape_cast %98 : vector<1x1x8x8xf32> to vector<8x8xf32>
    %cst_110 = arith.constant dense<0.000000e+00> : vector<256x8xf32>
    %100 = tpu.matmul %89, %99, %cst_110 {dimension_numbers = #tpu.dot_dimension_numbers<[1], [0], [0], [1], [0, 0, 1, 1], [], []>} : vector<256x8xf32>, vector<8x8xf32>, vector<256x8xf32> -> vector<256x8xf32>
    %101 = arith.addf %87, %100 : vector<256x8xf32>
    %c2_111 = arith.constant 2 : index
    %c0_112 = arith.constant 0 : index
    %c0_113 = arith.constant 0 : index
    %102 = vector.load %arg11[%c2_111, %c0_112, %c0_113] : memref<18x16x8xf32, #tpu.memory_space<vmem>>, vector<16x16x8xf32>
    %103 = vector.shape_cast %102 : vector<16x16x8xf32> to vector<256x8xf32>
    %c2_114 = arith.constant 2 : index
    %c0_115 = arith.constant 0 : index
    %c0_116 = arith.constant 0 : index
    %c0_117 = arith.constant 0 : index
    %104 = vector.load %arg7[%c2_114, %c0_115, %c0_116, %c0_117] : memref<3x3x8x8xf32, #tpu.memory_space<vmem>>, vector<1x1x8x8xf32>
    %105 = vector.shape_cast %104 : vector<1x1x8x8xf32> to vector<8x8xf32>
    %cst_118 = arith.constant dense<0.000000e+00> : vector<256x8xf32>
    %106 = tpu.matmul %103, %105, %cst_118 {dimension_numbers = #tpu.dot_dimension_numbers<[1], [0], [0], [1], [0, 0, 1, 1], [], []>} : vector<256x8xf32>, vector<8x8xf32>, vector<256x8xf32> -> vector<256x8xf32>
    %107 = arith.addf %93, %106 : vector<256x8xf32>
    %c2_119 = arith.constant 2 : index
    %c1_120 = arith.constant 1 : index
    %c0_121 = arith.constant 0 : index
    %c0_122 = arith.constant 0 : index
    %108 = vector.load %arg7[%c2_119, %c1_120, %c0_121, %c0_122] : memref<3x3x8x8xf32, #tpu.memory_space<vmem>>, vector<1x1x8x8xf32>
    %109 = vector.shape_cast %108 : vector<1x1x8x8xf32> to vector<8x8xf32>
    %cst_123 = arith.constant dense<0.000000e+00> : vector<256x8xf32>
    %110 = tpu.matmul %103, %109, %cst_123 {dimension_numbers = #tpu.dot_dimension_numbers<[1], [0], [0], [1], [0, 0, 1, 1], [], []>} : vector<256x8xf32>, vector<8x8xf32>, vector<256x8xf32> -> vector<256x8xf32>
    %111 = arith.addf %97, %110 : vector<256x8xf32>
    %c2_124 = arith.constant 2 : index
    %c2_125 = arith.constant 2 : index
    %c0_126 = arith.constant 0 : index
    %c0_127 = arith.constant 0 : index
    %112 = vector.load %arg7[%c2_124, %c2_125, %c0_126, %c0_127] : memref<3x3x8x8xf32, #tpu.memory_space<vmem>>, vector<1x1x8x8xf32>
    %113 = vector.shape_cast %112 : vector<1x1x8x8xf32> to vector<8x8xf32>
    %cst_128 = arith.constant dense<0.000000e+00> : vector<256x8xf32>
    %114 = tpu.matmul %103, %113, %cst_128 {dimension_numbers = #tpu.dot_dimension_numbers<[1], [0], [0], [1], [0, 0, 1, 1], [], []>} : vector<256x8xf32>, vector<8x8xf32>, vector<256x8xf32> -> vector<256x8xf32>
    %115 = arith.addf %101, %114 : vector<256x8xf32>
    %116 = vector.shape_cast %107 : vector<256x8xf32> to vector<16x16x8xf32>
    %117 = vector.shape_cast %111 : vector<256x8xf32> to vector<16x16x8xf32>
    %118 = vector.shape_cast %115 : vector<256x8xf32> to vector<16x16x8xf32>
    %cst_129 = arith.constant 0.000000e+00 : f32
    %119 = vector.broadcast %cst_129 : f32 to vector<16x1x8xf32>
    %120 = vector.extract_strided_slice %116 {offsets = [0, 0, 0], sizes = [16, 15, 8], strides = [1, 1, 1]} : vector<16x16x8xf32> to vector<16x15x8xf32>
    %121 = tpu.concatenate %119, %120 in 1 : vector<16x1x8xf32>, vector<16x15x8xf32> -> vector<16x16x8xf32>
    %122 = arith.addf %117, %121 : vector<16x16x8xf32>
    %123 = vector.extract_strided_slice %118 {offsets = [0, 1, 0], sizes = [16, 15, 8], strides = [1, 1, 1]} : vector<16x16x8xf32> to vector<16x15x8xf32>
    %124 = tpu.concatenate %123, %119 in 1 : vector<16x15x8xf32>, vector<16x1x8xf32> -> vector<16x16x8xf32>
    %125 = arith.addf %122, %124 : vector<16x16x8xf32>
    %c0_130 = arith.constant 0 : index
    %c0_131 = arith.constant 0 : index
    %126 = vector.load %arg8[%c0_130, %c0_131] : memref<1x8xf32, #tpu.memory_space<vmem>>, vector<1x8xf32>
    %127 = vector.shape_cast %126 : vector<1x8xf32> to vector<1x1x8xf32>
    %128 = vector.broadcast %127 : vector<1x1x8xf32> to vector<16x16x8xf32>
    %129 = arith.addf %125, %128 : vector<16x16x8xf32>
    %cst_132 = arith.constant 0.000000e+00 : f32
    %130 = vector.broadcast %cst_132 : f32 to vector<16x16x8xf32>
    %131 = arith.maximumf %129, %130 : vector<16x16x8xf32>
    %132 = vector.shape_cast %131 : vector<16x16x8xf32> to vector<1x16x16x8xf32>
    %c0_133 = arith.constant 0 : index
    %c0_134 = arith.constant 0 : index
    %c0_135 = arith.constant 0 : index
    %c0_136 = arith.constant 0 : index
    %133 = vector.load %arg9[%c0_133, %c0_134, %c0_135, %c0_136] : memref<1x16x16x8xf32, #tpu.memory_space<vmem>>, vector<1x16x16x8xf32>
    tpu.vector_store %arg9[%c0_133, %c0_134, %c0_135, %c0_136], %132 {strides = array<i32>} : memref<1x16x16x8xf32, #tpu.memory_space<vmem>>, vector<1x16x16x8xf32>,
    return
  }
  func.func @transform_0(%arg0: i32, %arg1: i32) -> (i32, i32, i32, i32) {
    %c8_i32 = arith.constant 8 : i32
    %0 = arith.muli %arg1, %c8_i32 : i32
    %c1_i32 = arith.constant 1 : i32
    %1 = arith.subi %0, %c1_i32 : i32
    %c0_i32 = arith.constant 0 : i32
    %2 = arith.maxsi %1, %c0_i32 : i32
    %c0_i32_0 = arith.constant 0 : i32
    %c0_i32_1 = arith.constant 0 : i32
    %c0_i32_2 = arith.constant 0 : i32
    return %arg0, %2, %c0_i32_0, %c0_i32_1 : i32, i32, i32, i32
  }
  func.func @transform_1(%arg0: i32, %arg1: i32) -> (i32, i32, i32, i32) {
    %c0_i32 = arith.constant 0 : i32
    %c0_i32_0 = arith.constant 0 : i32
    %c0_i32_1 = arith.constant 0 : i32
    return %arg0, %arg1, %c0_i32, %c0_i32_0 : i32, i32, i32, i32
  }
  func.func @transform_2(%arg0: i32, %arg1: i32) -> (i32, i32, i32, i32) {
    %c8_i32 = arith.constant 8 : i32
    %0 = arith.muli %arg1, %c8_i32 : i32
    %c8_i32_0 = arith.constant 8 : i32
    %1 = arith.addi %0, %c8_i32_0 : i32
    %c7_i32 = arith.constant 7 : i32
    %2 = arith.minsi %1, %c7_i32 : i32
    %c0_i32 = arith.constant 0 : i32
    %c0_i32_1 = arith.constant 0 : i32
    %c0_i32_2 = arith.constant 0 : i32
    return %arg0, %2, %c0_i32, %c0_i32_1 : i32, i32, i32, i32
  }
  func.func @transform_3(%arg0: i32, %arg1: i32) -> (i32, i32, i32, i32) {
    %c0_i32 = arith.constant 0 : i32
    %c0_i32_0 = arith.constant 0 : i32
    %c0_i32_1 = arith.constant 0 : i32
    %c0_i32_2 = arith.constant 0 : i32
    %c0_i32_3 = arith.constant 0 : i32
    return %c0_i32, %c0_i32_0, %c0_i32_1, %c0_i32_2 : i32, i32, i32, i32
  }
  func.func @transform_4(%arg0: i32, %arg1: i32) -> (i32, i32) {
    %c0_i32 = arith.constant 0 : i32
    %c0_i32_0 = arith.constant 0 : i32
    %c0_i32_1 = arith.constant 0 : i32
    return %c0_i32, %c0_i32_0 : i32, i32
  }
  func.func @transform_5(%arg0: i32, %arg1: i32) -> (i32, i32, i32, i32) {
    %c0_i32 = arith.constant 0 : i32
    %c0_i32_0 = arith.constant 0 : i32
    %c0_i32_1 = arith.constant 0 : i32
    %c0_i32_2 = arith.constant 0 : i32
    %c0_i32_3 = arith.constant 0 : i32
    return %c0_i32, %c0_i32_0, %c0_i32_1, %c0_i32_2 : i32, i32, i32, i32
  }
  func.func @transform_6(%arg0: i32, %arg1: i32) -> (i32, i32) {
    %c0_i32 = arith.constant 0 : i32
    %c0_i32_0 = arith.constant 0 : i32
    %c0_i32_1 = arith.constant 0 : i32
    return %c0_i32, %c0_i32_0 : i32, i32
  }
  func.func @transform_7(%arg0: i32, %arg1: i32) -> (i32, i32, i32, i32) {
    %c0_i32 = arith.constant 0 : i32
    %c0_i32_0 = arith.constant 0 : i32
    %c0_i32_1 = arith.constant 0 : i32
    return %arg0, %arg1, %c0_i32, %c0_i32_0 : i32, i32, i32, i32
  }
}

</mosaic_0001>

<bundles_post_ra>
// kernel: unet_block.1
= control target key start
LH: loop header
LB: loop body
LE: loop exit
PB: predicated region body
PF: predicated region fallthrough
CT: control target
= control target key end

     0   :  { %s9269_s23 = smov 0   ;;  %s9271_s24 = smov 0   ;;  %s12755_s0 = inlined_call_operand.vmem [shape: f32[2,16,16,4], index: 0, kind: input, shape index: {}, may-alias: {0,1,2}]   ;;  %s12756_s1 = inlined_call_operand.vmem [shape: f32[2,16,16,4], index: 1, kind: input, shape index: {}, may-alias: {0,1,2}]   ;;  %s12757_s2 = inlined_call_operand.vmem [shape: f32[2,16,16,4], index: 2, kind: input, shape index: {}, may-alias: {0,1,2}]   ;;  %s12758_s3 = inlined_call_operand.vmem [shape: f32[3,3,4,8], index: 3, kind: input, shape index: {}]   ;;  %s12759_s4 = inlined_call_operand.vmem [shape: f32[1,8], index: 4, kind: input, shape index: {}]   ;;  %s12760_s5 = inlined_call_operand.vmem [shape: f32[3,3,8,8], index: 5, kind: input, shape index: {}]   ;;  %s12761_s6 = inlined_call_operand.vmem [shape: f32[1,8], index: 6, kind: input, shape index: {}]   ;;  %s12762_s7 = inlined_call_operand.vmem [shape: f32[2,16,16,8], index: 7, kind: output, shape index: {}]  }
   0x1   :  { %s9273_s2 = smov 0  }
   0x2 LB: > { %s29_s25 = sadd.s32 1, %s9222_s24  ;;  %p6930_p0 = scmp.ge.s32.totalorder %s9226_s2, 1  ;;  %s9226_s2 = sphi %s9273_s2, %s17_s2   ;;  %s9222_s24 = sphi %s9271_s24, %s13281_s24   ;;  %s9218_s23 = sphi %s9269_s23, %s13280_s23  }
   0x3   : > { %p31_p1 = scmp.ge.s32.totalorder %s29_s25, 2  ;;  %p327_p2 = scmp.lt.s32.totalorder %s9226_s2, 3 }
   0x5   : > { %s13283_s25 = smov (%p31_p1, %s29_s25), 0  ;;  %p328_p3 = pnand %p6930_p0, %p327_p2 }
   0x7   : > { %331 = sbr.rel (%p328_p3) target bundleno = 1053 (0x41d), region = 48 }
   0xc   : > { %v6941_v0 = vld [vmem:[%s12758_s3 + $0xc] sm:$0xf]  ;;  %vm752_vm0 = vcmask 1043456   ;;  %vm490_vm1 = vcmask 31744   ;;  %p417_p4 = scmp.lt.s32.totalorder %s9218_s23, 1  ;;  %v12763_v1 = vmov 0.0  }
   0xd   : > { %8215 = vmatprep.subr.msk.mxu0 %vm752_vm0, %v6941_v0  ;;  %9169 = vmatprep.subr.msk.mxu1 %vm752_vm0, %v6941_v0  ;;  %541 = vst.msk [vmem:[#allocation2 + $0x10] sm:$0xff] %vm490_vm1, %v12763_v1  ;;  %539 = vst.msk [vmem:[#allocation2] sm:$0xff] %vm490_vm1, %v12763_v1  ;;  %v7016_v2 = vld [vmem:[%s12758_s3 + $0x10] sm:$0xf]  ;;  %v600_v3 = vld [vmem:[%s12758_s3] sm:$0xf] }
   0xe   : > { %540 = vst.msk [vmem:[#allocation2 + $0x8] sm:$0xff] %vm490_vm1, %v12763_v1  ;;  %542 = vst.msk [vmem:[#allocation2 + $0x18] sm:$0xff] %vm490_vm1, %v12763_v1  ;;  %8216 = vmatpush3.msk.msra.mxu0 %vm752_vm0, %v6941_v0  ;;  %9170 = vmatpush3.msk.msra.mxu1 %vm752_vm0, %v6941_v0  ;;  %s13285_s23 = smov (!%p417_p4, %s9218_s23), 1  ;;  %v9341_v10 = vld [vmem:[%s12758_s3 + $0x14] sm:$0xf]  ;;  %vm3391_vm2 = vcmask 1040384  }
   0xf   : > { %560 = vst.msk [vmem:[#allocation2 + $0x120] sm:$0xff] %vm490_vm1, %v12763_v1  ;;  %561 = vst.msk [vmem:[#allocation2 + $0x128] sm:$0xff] %vm490_vm1, %v12763_v1  ;;  %8327 = vmatprep.subr.msk.mxu0 %vm752_vm0, %v7016_v2  ;;  %8271 = vmatprep.subr.msk.mxu1 %vm752_vm0, %v600_v3  ;;  %s7581_s9 = sshll.u32 %s13285_s23, 8  ;;  %v6939_v14 = vld [vmem:[%s12758_s3 + $0x4] sm:$0xf]  ;;  %vm3572_vm3 = vcmask 1046528  }
  0x10   : > { %562 = vst.msk [vmem:[#allocation2 + $0x130] sm:$0xff] %vm490_vm1, %v12763_v1  ;;  %563 = vst.msk [vmem:[#allocation2 + $0x138] sm:$0xff] %vm490_vm1, %v12763_v1  ;;  %s9327_s12 = scalar_lea.vmem %s12756_s1, %s7581_s9  ;;  %v9480_v53 = vld [vmem:[%s12758_s3 + $0x8] sm:$0xf]  ;;  %vm3796_vm4 = vcmask 64512   ;;  %s12476_s8 = scalar_lea.vmem %s12762_s7, %s7581_s9 }
  0x11   : > { %v457_v4 = vld [vmem:[%s9327_s12] sm:$0xff]  ;;  %v458_v5 = vld [vmem:[%s9327_s12 + $0x8] sm:$0xff]  ;;  %v459_v6 = vld [vmem:[%s9327_s12 + $0x10] sm:$0xff] }
  0x12   : > { %491 = vst.msk [vmem:[#allocation2 + $0x20] sm:$0xff] %vm490_vm1, %v457_v4  ;;  %492 = vst.msk [vmem:[#allocation2 + $0x28] sm:$0xff] %vm490_vm1, %v458_v5  ;;  %v460_v7 = vld [vmem:[%s9327_s12 + $0x18] sm:$0xff]  ;;  %v461_v8 = vld [vmem:[%s9327_s12 + $0x20] sm:$0xff] }
  0x13   : > { %493 = vst.msk [vmem:[#allocation2 + $0x30] sm:$0xff] %vm490_vm1, %v459_v6  ;;  %v462_v9 = vld [vmem:[%s9327_s12 + $0x28] sm:$0xff]  ;;  %494 = vst.msk [vmem:[#allocation2 + $0x38] sm:$0xff] %vm490_vm1, %v460_v7  ;;  %v463_v18 = vld [vmem:[%s9327_s12 + $0x30] sm:$0xff] }
  0x14   : > { %v9343_v11 = vld [vmem:[#allocation2 + $0x10] sm:$0xff]  ;;  %495 = vst.msk [vmem:[#allocation2 + $0x40] sm:$0xff] %vm490_vm1, %v461_v8  ;;  %496 = vst.msk [vmem:[#allocation2 + $0x48] sm:$0xff] %vm490_vm1, %v462_v9  ;;  %v9361_v16 = vld [vmem:[#allocation2] sm:$0xff] }
  0x15   : > { %v9347_v13 = vld [vmem:[#allocation2 + $0x18] sm:$0xff]  ;;  %8217 = vmatprep.mubr.msk.f32.mxu0 %vm490_vm1, %v9343_v11  ;;  %v9363_v17 = vld [vmem:[#allocation2 + $0x8] sm:$0xff]  ;;  %v465_v20 = vld [vmem:[%s9327_s12 + $0x40] sm:$0xff]  ;;  %497 = vst.msk [vmem:[#allocation2 + $0x50] sm:$0xff] %vm490_vm1, %v463_v18 }
  0x16   : > { %v9345_v12 = vld [vmem:[#allocation2 + $0x120] sm:$0xff]  ;;  %v9359_v15 = vld [vmem:[#allocation2 + $0x128] sm:$0xff]  ;;  %8218 = vmatmul.mubr.msk.f32.vlgmr.msra.gmra.mxu0 %vm490_vm1, %v9347_v13  ;;  %v464_v19 = vld [vmem:[%s9327_s12 + $0x38] sm:$0xff]  ;;  %499 = vst.msk [vmem:[#allocation2 + $0x60] sm:$0xff] %vm490_vm1, %v465_v20 }
  0x17   : > { %8268 = vmatprep.mubr.msk.f32.mxu1 %vm490_vm1, %v9345_v12  ;;  %8328 = vmatpush3.msk.msra.mxu0 %vm752_vm0, %v7016_v2  ;;  %498 = vst.msk [vmem:[#allocation2 + $0x58] sm:$0xff] %vm490_vm1, %v464_v19  ;;  %v466_v21 = vld [vmem:[%s9327_s12 + $0x48] sm:$0xff]  ;;  %v467_v22 = vld [vmem:[%s9327_s12 + $0x50] sm:$0xff]  ;;  %v468_v23 = vld [vmem:[%s9327_s12 + $0x58] sm:$0xff] }
  0x18   : > { %8269 = vmatmul.mubr.msk.f32.vlgmr.msra.gmra.mxu1 %vm490_vm1, %v9359_v15  ;;  %500 = vst.msk [vmem:[#allocation2 + $0x68] sm:$0xff] %vm490_vm1, %v466_v21  ;;  %501 = vst.msk [vmem:[#allocation2 + $0x70] sm:$0xff] %vm490_vm1, %v467_v22  ;;  %v469_v24 = vld [vmem:[%s9327_s12 + $0x60] sm:$0xff]  ;;  %v470_v25 = vld [vmem:[%s9327_s12 + $0x68] sm:$0xff]  ;;  %8439 = vmatprep.subr.msk.mxu0 %vm752_vm0, %v9341_v10 }
  0x19   : > { %8272 = vmatpush3.msk.msra.mxu1 %vm752_vm0, %v600_v3  ;;  %8273 = vmatprep.mubr.msk.f32.mxu1 %vm490_vm1, %v9361_v16  ;;  %502 = vst.msk [vmem:[#allocation2 + $0x78] sm:$0xff] %vm490_vm1, %v468_v23  ;;  %v471_v26 = vld [vmem:[%s9327_s12 + $0x70] sm:$0xff]  ;;  %503 = vst.msk [vmem:[#allocation2 + $0x80] sm:$0xff] %vm490_vm1, %v469_v24  ;;  %v472_v27 = vld [vmem:[%s9327_s12 + $0x78] sm:$0xff] }
  0x1a   : > { %504 = vst.msk [vmem:[#allocation2 + $0x88] sm:$0xff] %vm490_vm1, %v470_v25  ;;  %505 = vst.msk [vmem:[#allocation2 + $0x90] sm:$0xff] %vm490_vm1, %v471_v26  ;;  %v473_v28 = vld [vmem:[%s9327_s12 + $0x80] sm:$0xff]  ;;  %v474_v29 = vld [vmem:[%s9327_s12 + $0x88] sm:$0xff]  ;;  %8383 = vmatprep.subr.msk.mxu1 %vm752_vm0, %v6939_v14 }
  0x1b   : > { %v9399_v30 = vld [vmem:[#allocation2 + $0x20] sm:$0xff]  ;;  %v9401_v31 = vld [vmem:[#allocation2 + $0x28] sm:$0xff]  ;;  %v9403_v32 = vld [vmem:[#allocation2 + $0x30] sm:$0xff]  ;;  %506 = vst.msk [vmem:[#allocation2 + $0x98] sm:$0xff] %vm490_vm1, %v472_v27 }
  0x1c   : > { %8274 = vmatmul.mubr.msk.f32.vlgmr.msra.gmra.mxu1 %vm490_vm1, %v9363_v17  ;;  %507 = vst.msk [vmem:[#allocation2 + $0xa0] sm:$0xff] %vm490_vm1, %v473_v28  ;;  %508 = vst.msk [vmem:[#allocation2 + $0xa8] sm:$0xff] %vm490_vm1, %v474_v29  ;;  %8220 = vmatprep.mubr.msk.f32.mxu0 %vm490_vm1, %v9399_v30  ;;  %v9412_v33 = vld [vmem:[#allocation2 + $0x38] sm:$0xff]  ;;  %v475_v34 = vld [vmem:[%s9327_s12 + $0x90] sm:$0xff] }
  0x1d   : > { %8276 = vmatprep.mubr.msk.f32.mxu1 %vm490_vm1, %v9343_v11  ;;  %8221 = vmatmul.mubr.msk.f32.gmra.mxu0 %vm490_vm1, %v9401_v31  ;;  %v476_v35 = vld [vmem:[%s9327_s12 + $0x98] sm:$0xff]  ;;  %v477_v36 = vld [vmem:[%s9327_s12 + $0xa0] sm:$0xff]  ;;  %509 = vst.msk [vmem:[#allocation2 + $0xb0] sm:$0xff] %vm490_vm1, %v475_v34  ;;  %v478_v37 = vld [vmem:[%s9327_s12 + $0xa8] sm:$0xff] }
  0x1e   : > { %8384 = vmatpush3.msk.msra.mxu1 %vm752_vm0, %v6939_v14  ;;  %8223 = vmatprep.mubr.msk.f32.mxu0 %vm490_vm1, %v9403_v32  ;;  %510 = vst.msk [vmem:[#allocation2 + $0xb8] sm:$0xff] %vm490_vm1, %v476_v35  ;;  %511 = vst.msk [vmem:[#allocation2 + $0xc0] sm:$0xff] %vm490_vm1, %v477_v36  ;;  %v479_v38 = vld [vmem:[%s9327_s12 + $0xb0] sm:$0xff]  ;;  %v480_v39 = vld [vmem:[%s9327_s12 + $0xb8] sm:$0xff] }
  0x1f   : > { %v9430_v40 = vld [vmem:[#allocation2 + $0x40] sm:$0xff]  ;;  %512 = vst.msk [vmem:[#allocation2 + $0xc8] sm:$0xff] %vm490_vm1, %v478_v37  ;;  %513 = vst.msk [vmem:[#allocation2 + $0xd0] sm:$0xff] %vm490_vm1, %v479_v38  ;;  %v9441_v41 = vld [vmem:[#allocation2 + $0x48] sm:$0xff]  ;;  %8495 = vmatprep.subr.msk.mxu1 %vm752_vm0, %v9480_v53 }
  0x20   : > { %8277 = vmatmul.mubr.msk.f32.gmra.mxu1 %vm490_vm1, %v9347_v13  ;;  %514 = vst.msk [vmem:[#allocation2 + $0xd8] sm:$0xff] %vm490_vm1, %v480_v39  ;;  %v9443_v42 = vld [vmem:[#allocation2 + $0x50] sm:$0xff]  ;;  %v481_v43 = vld [vmem:[%s9327_s12 + $0xc0] sm:$0xff]  ;;  %v482_v44 = vld [vmem:[%s9327_s12 + $0xc8] sm:$0xff] }
  0x21   : > { %8279 = vmatprep.mubr.msk.f32.mxu1 %vm490_vm1, %v9399_v30  ;;  %8224 = vmatmul.mubr.msk.f32.gmra.mxu0 %vm490_vm1, %v9412_v33  ;;  %v483_v45 = vld [vmem:[%s9327_s12 + $0xd0] sm:$0xff]  ;;  %515 = vst.msk [vmem:[#allocation2 + $0xe0] sm:$0xff] %vm490_vm1, %v481_v43  ;;  %516 = vst.msk [vmem:[#allocation2 + $0xe8] sm:$0xff] %vm490_vm1, %v482_v44  ;;  %v484_v46 = vld [vmem:[%s9327_s12 + $0xd8] sm:$0xff] }
  0x22   : > { %8226 = vmatprep.mubr.msk.f32.mxu0 %vm490_vm1, %v9430_v40  ;;  %517 = vst.msk [vmem:[#allocation2 + $0xf0] sm:$0xff] %vm490_vm1, %v483_v45  ;;  %v485_v47 = vld [vmem:[%s9327_s12 + $0xe0] sm:$0xff]  ;;  %v486_v48 = vld [vmem:[%s9327_s12 + $0xe8] sm:$0xff]  ;;  %518 = vst.msk [vmem:[#allocation2 + $0xf8] sm:$0xff] %vm490_vm1, %v484_v46 }
  0x23   : > { %519 = vst.msk [vmem:[#allocation2 + $0x100] sm:$0xff] %vm490_vm1, %v485_v47  ;;  %520 = vst.msk [vmem:[#allocation2 + $0x108] sm:$0xff] %vm490_vm1, %v486_v48  ;;  %v9465_v49 = vld [vmem:[#allocation2 + $0x58] sm:$0xff]  ;;  %v9469_v50 = vld [vmem:[#allocation2 + $0x60] sm:$0xff] }
  0x24   : > { %8280 = vmatmul.mubr.msk.f32.gmra.mxu1 %vm490_vm1, %v9401_v31  ;;  %v487_v51 = vld [vmem:[%s9327_s12 + $0xf0] sm:$0xff]  ;;  %v488_v52 = vld [vmem:[%s9327_s12 + $0xf8] sm:$0xff]  ;;  %v9488_v54 = vld [vmem:[#allocation2 + $0x68] sm:$0xff] }
  0x25   : > { %8282 = vmatprep.mubr.msk.f32.mxu1 %vm490_vm1, %v9403_v32  ;;  %8227 = vmatmul.mubr.msk.f32.gmra.mxu0 %vm490_vm1, %v9441_v41  ;;  %521 = vst.msk [vmem:[#allocation2 + $0x110] sm:$0xff] %vm490_vm1, %v487_v51  ;;  %522 = vst.msk [vmem:[#allocation2 + $0x118] sm:$0xff] %vm490_vm1, %v488_v52  ;;  %v9492_v55 = vld [vmem:[#allocation2 + $0x70] sm:$0xff]  ;;  %v9500_v56 = vld [vmem:[#allocation2 + $0x78] sm:$0xff] }
  0x26   : > { %8229 = vmatprep.mubr.msk.f32.mxu0 %vm490_vm1, %v9443_v42  ;;  %v9504_v57 = vld [vmem:[#allocation2 + $0x80] sm:$0xff]  ;;  %v9512_v58 = vld [vmem:[#allocation2 + $0x88] sm:$0xff]  ;;  %v9516_v59 = vld [vmem:[#allocation2 + $0x90] sm:$0xff] }
  0x27   : > { %v9524_v60 = vld [vmem:[#allocation2 + $0x98] sm:$0xff]  ;;  %v9528_v61 = vld [vmem:[#allocation2 + $0xa0] sm:$0xff]  ;;  %v9536_v62 = vld [vmem:[#allocation2 + $0xa8] sm:$0xff] }
  0x28   : > { %8283 = vmatmul.mubr.msk.f32.gmra.mxu1 %vm490_vm1, %v9412_v33  ;;  %v9540_v63 = vld [vmem:[#allocation2 + $0xb0] sm:$0xff]  ;;  %v9548_v0 = vld [vmem:[#allocation2 + $0xb8] sm:$0xff]  ;;  %v9552_v2 = vld [vmem:[#allocation2 + $0xc0] sm:$0xff] }
  0x29   : > { %8285 = vmatprep.mubr.msk.f32.mxu1 %vm490_vm1, %v9430_v40  ;;  %8230 = vmatmul.mubr.msk.f32.gmra.mxu0 %vm490_vm1, %v9465_v49  ;;  %v9560_v3 = vld [vmem:[#allocation2 + $0xc8] sm:$0xff]  ;;  %v9564_v4 = vld [vmem:[#allocation2 + $0xd0] sm:$0xff]  ;;  %v9572_v5 = vld [vmem:[#allocation2 + $0xd8] sm:$0xff] }
  0x2a   : > { %8232 = vmatprep.mubr.msk.f32.mxu0 %vm490_vm1, %v9469_v50  ;;  %v9576_v6 = vld [vmem:[#allocation2 + $0xe0] sm:$0xff]  ;;  %v9584_v7 = vld [vmem:[#allocation2 + $0xe8] sm:$0xff]  ;;  %v9588_v8 = vld [vmem:[#allocation2 + $0xf0] sm:$0xff] }
  0x2b   : > { %v9596_v9 = vld [vmem:[#allocation2 + $0xf8] sm:$0xff]  ;;  %v9600_v14 = vld [vmem:[#allocation2 + $0x100] sm:$0xff]  ;;  %v9608_v18 = vld [vmem:[#allocation2 + $0x108] sm:$0xff] }
  0x2c   : > { %8286 = vmatmul.mubr.msk.f32.gmra.mxu1 %vm490_vm1, %v9441_v41  ;;  %v9612_v19 = vld [vmem:[#allocation2 + $0x110] sm:$0xff]  ;;  %v9620_v20 = vld [vmem:[#allocation2 + $0x118] sm:$0xff]  ;;  %v9799_v22 = vld [vmem:[%s12758_s3 + $0x20] sm:$0xf] }
  0x2d   : > { %8288 = vmatprep.mubr.msk.f32.mxu1 %vm490_vm1, %v9443_v42  ;;  %8233 = vmatmul.mubr.msk.f32.gmra.mxu0 %vm490_vm1, %v9488_v54  ;;  %v9637_v21 = vld [vmem:[%s12758_s3 + $0x18] sm:$0xf] }
  0x2e   : > { %8235 = vmatprep.mubr.msk.f32.mxu0 %vm490_vm1, %v9492_v55 }
  0x30   : > { %8289 = vmatmul.mubr.msk.f32.gmra.mxu1 %vm490_vm1, %v9465_v49 }
  0x31   : > { %8291 = vmatprep.mubr.msk.f32.mxu1 %vm490_vm1, %v9469_v50  ;;  %8236 = vmatmul.mubr.msk.f32.gmra.mxu0 %vm490_vm1, %v9500_v56 }
  0x32   : > { %8238 = vmatprep.mubr.msk.f32.mxu0 %vm490_vm1, %v9504_v57 }
  0x34   : > { %8292 = vmatmul.mubr.msk.f32.gmra.mxu1 %vm490_vm1, %v9488_v54 }
  0x35   : > { %8294 = vmatprep.mubr.msk.f32.mxu1 %vm490_vm1, %v9492_v55  ;;  %8239 = vmatmul.mubr.msk.f32.gmra.mxu0 %vm490_vm1, %v9512_v58 }
  0x36   : > { %8241 = vmatprep.mubr.msk.f32.mxu0 %vm490_vm1, %v9516_v59 }
  0x38   : > { %8295 = vmatmul.mubr.msk.f32.gmra.mxu1 %vm490_vm1, %v9500_v56 }
  0x39   : > { %8297 = vmatprep.mubr.msk.f32.mxu1 %vm490_vm1, %v9504_v57  ;;  %8242 = vmatmul.mubr.msk.f32.gmra.mxu0 %vm490_vm1, %v9524_v60 }
  0x3a   : > { %8244 = vmatprep.mubr.msk.f32.mxu0 %vm490_vm1, %v9528_v61 }
  0x3c   : > { %8298 = vmatmul.mubr.msk.f32.gmra.mxu1 %vm490_vm1, %v9512_v58 }
  0x3d   : > { %8300 = vmatprep.mubr.msk.f32.mxu1 %vm490_vm1, %v9516_v59  ;;  %8245 = vmatmul.mubr.msk.f32.gmra.mxu0 %vm490_vm1, %v9536_v62 }
  0x3e   : > { %8247 = vmatprep.mubr.msk.f32.mxu0 %vm490_vm1, %v9540_v63 }
  0x40   : > { %8301 = vmatmul.mubr.msk.f32.gmra.mxu1 %vm490_vm1, %v9524_v60 }
  0x41   : > { %8303 = vmatprep.mubr.msk.f32.mxu1 %vm490_vm1, %v9528_v61  ;;  %8248 = vmatmul.mubr.msk.f32.gmra.mxu0 %vm490_vm1, %v9548_v0 }
  0x42   : > { %8250 = vmatprep.mubr.msk.f32.mxu0 %vm490_vm1, %v9552_v2 }
  0x44   : > { %8304 = vmatmul.mubr.msk.f32.gmra.mxu1 %vm490_vm1, %v9536_v62 }
  0x45   : > { %8306 = vmatprep.mubr.msk.f32.mxu1 %vm490_vm1, %v9540_v63  ;;  %8251 = vmatmul.mubr.msk.f32.gmra.mxu0 %vm490_vm1, %v9560_v3 }
  0x46   : > { %8253 = vmatprep.mubr.msk.f32.mxu0 %vm490_vm1, %v9564_v4 }
  0x48   : > { %8307 = vmatmul.mubr.msk.f32.gmra.mxu1 %vm490_vm1, %v9548_v0 }
  0x49   : > { %8309 = vmatprep.mubr.msk.f32.mxu1 %vm490_vm1, %v9552_v2  ;;  %8254 = vmatmul.mubr.msk.f32.gmra.mxu0 %vm490_vm1, %v9572_v5 }
  0x4a   : > { %8256 = vmatprep.mubr.msk.f32.mxu0 %vm490_vm1, %v9576_v6 }
  0x4c   : > { %8310 = vmatmul.mubr.msk.f32.gmra.mxu1 %vm490_vm1, %v9560_v3 }
  0x4d   : > { %8312 = vmatprep.mubr.msk.f32.mxu1 %vm490_vm1, %v9564_v4  ;;  %8257 = vmatmul.mubr.msk.f32.gmra.mxu0 %vm490_vm1, %v9584_v7 }
  0x4e   : > { %8259 = vmatprep.mubr.msk.f32.mxu0 %vm490_vm1, %v9588_v8 }
  0x50   : > { %8313 = vmatmul.mubr.msk.f32.gmra.mxu1 %vm490_vm1, %v9572_v5 }
  0x51   : > { %8315 = vmatprep.mubr.msk.f32.mxu1 %vm490_vm1, %v9576_v6  ;;  %8260 = vmatmul.mubr.msk.f32.gmra.mxu0 %vm490_vm1, %v9596_v9 }
  0x52   : > { %8262 = vmatprep.mubr.msk.f32.mxu0 %vm490_vm1, %v9600_v14 }
  0x54   : > { %8316 = vmatmul.mubr.msk.f32.gmra.mxu1 %vm490_vm1, %v9584_v7 }
  0x55   : > { %8318 = vmatprep.mubr.msk.f32.mxu1 %vm490_vm1, %v9588_v8  ;;  %8263 = vmatmul.mubr.msk.f32.gmra.mxu0 %vm490_vm1, %v9608_v18 }
  0x56   : > { %8265 = vmatprep.mubr.msk.f32.mxu0 %vm490_vm1, %v9612_v19 }
  0x58   : > { %8319 = vmatmul.mubr.msk.f32.gmra.mxu1 %vm490_vm1, %v9596_v9 }
  0x59   : > { %8321 = vmatprep.mubr.msk.f32.mxu1 %vm490_vm1, %v9600_v14  ;;  %8266 = vmatmul.mubr.msk.f32.gmra.mxu0 %vm490_vm1, %v9620_v20 }
  0x5a   : > { %8329 = vmatprep.mubr.msk.f32.mxu0 %vm490_vm1, %v9343_v11 }
  0x5c   : > { %8322 = vmatmul.mubr.msk.f32.gmra.mxu1 %vm490_vm1, %v9608_v18 }
  0x5d   : > { %8324 = vmatprep.mubr.msk.f32.mxu1 %vm490_vm1, %v9612_v19  ;;  %8330 = vmatmul.mubr.msk.f32.vlgmr.msra.gmra.mxu0 %vm490_vm1, %v9347_v13 }
  0x5e   : > { %8440 = vmatpush3.msk.msra.mxu0 %vm752_vm0, %v9341_v10  ;;  %8332 = vmatprep.mubr.msk.f32.mxu0 %vm490_vm1, %v9399_v30  ;;  %v9684_v10 = vld [vmem:[%s12758_s3 + $0x1c] sm:$0xf] }
  0x5f   : > { %8551 = vmatprep.subr.msk.mxu0 %vm752_vm0, %v9637_v21 }
  0x60   : > { %8325 = vmatmul.mubr.msk.f32.gmra.mxu1 %vm490_vm1, %v9620_v20 }
  0x61   : > { %8385 = vmatprep.mubr.msk.f32.mxu1 %vm490_vm1, %v9361_v16  ;;  %8333 = vmatmul.mubr.msk.f32.gmra.mxu0 %vm490_vm1, %v9401_v31 }
  0x62   : > { %8335 = vmatprep.mubr.msk.f32.mxu0 %vm490_vm1, %v9403_v32 }
  0x64   : > { %8386 = vmatmul.mubr.msk.f32.vlgmr.msra.gmra.mxu1 %vm490_vm1, %v9363_v17 }
  0x65   : > { %8388 = vmatprep.mubr.msk.f32.mxu1 %vm490_vm1, %v9343_v11  ;;  %8496 = vmatpush3.msk.msra.mxu1 %vm752_vm0, %v9480_v53 }
  0x66   : > { %8336 = vmatmul.mubr.msk.f32.gmra.mxu0 %vm490_vm1, %v9412_v33  ;;  %8607 = vmatprep.subr.msk.mxu1 %vm752_vm0, %v9684_v10 }
  0x67   : > { %8338 = vmatprep.mubr.msk.f32.mxu0 %vm490_vm1, %v9430_v40 }
  0x68   : > { %8389 = vmatmul.mubr.msk.f32.gmra.mxu1 %vm490_vm1, %v9347_v13 }
  0x69   : > { %8391 = vmatprep.mubr.msk.f32.mxu1 %vm490_vm1, %v9399_v30 }
  0x6a   : > { %8339 = vmatmul.mubr.msk.f32.gmra.mxu0 %vm490_vm1, %v9441_v41 }
  0x6b   : > { %8341 = vmatprep.mubr.msk.f32.mxu0 %vm490_vm1, %v9443_v42 }
  0x6c   : > { %8392 = vmatmul.mubr.msk.f32.gmra.mxu1 %vm490_vm1, %v9401_v31 }
  0x6d   : > { %8394 = vmatprep.mubr.msk.f32.mxu1 %vm490_vm1, %v9403_v32 }
  0x6e   : > { %8342 = vmatmul.mubr.msk.f32.gmra.mxu0 %vm490_vm1, %v9465_v49 }
  0x6f   : > { %8344 = vmatprep.mubr.msk.f32.mxu0 %vm490_vm1, %v9469_v50 }
  0x70   : > { %8395 = vmatmul.mubr.msk.f32.gmra.mxu1 %vm490_vm1, %v9412_v33 }
  0x71   : > { %8397 = vmatprep.mubr.msk.f32.mxu1 %vm490_vm1, %v9430_v40 }
  0x72   : > { %8345 = vmatmul.mubr.msk.f32.gmra.mxu0 %vm490_vm1, %v9488_v54 }
  0x73   : > { %8347 = vmatprep.mubr.msk.f32.mxu0 %vm490_vm1, %v9492_v55 }
  0x74   : > { %8398 = vmatmul.mubr.msk.f32.gmra.mxu1 %vm490_vm1, %v9441_v41 }
  0x75   : > { %8400 = vmatprep.mubr.msk.f32.mxu1 %vm490_vm1, %v9443_v42 }
  0x76   : > { %8348 = vmatmul.mubr.msk.f32.gmra.mxu0 %vm490_vm1, %v9500_v56 }
  0x77   : > { %8350 = vmatprep.mubr.msk.f32.mxu0 %vm490_vm1, %v9504_v57 }
  0x78   : > { %8401 = vmatmul.mubr.msk.f32.gmra.mxu1 %vm490_vm1, %v9465_v49 }
  0x79   : > { %8403 = vmatprep.mubr.msk.f32.mxu1 %vm490_vm1, %v9469_v50 }
  0x7a   : > { %8351 = vmatmul.mubr.msk.f32.gmra.mxu0 %vm490_vm1, %v9512_v58 }
  0x7b   : > { %8353 = vmatprep.mubr.msk.f32.mxu0 %vm490_vm1, %v9516_v59 }
  0x7c   : > { %8404 = vmatmul.mubr.msk.f32.gmra.mxu1 %vm490_vm1, %v9488_v54 }
  0x7d   : > { %8406 = vmatprep.mubr.msk.f32.mxu1 %vm490_vm1, %v9492_v55 }
  0x7e   : > { %8354 = vmatmul.mubr.msk.f32.gmra.mxu0 %vm490_vm1, %v9524_v60 }
  0x7f   : > { %8356 = vmatprep.mubr.msk.f32.mxu0 %vm490_vm1, %v9528_v61 }
  0x80   : > { %8407 = vmatmul.mubr.msk.f32.gmra.mxu1 %vm490_vm1, %v9500_v56 }
  0x81   : > { %8409 = vmatprep.mubr.msk.f32.mxu1 %vm490_vm1, %v9504_v57 }
  0x82   : > { %8357 = vmatmul.mubr.msk.f32.gmra.mxu0 %vm490_vm1, %v9536_v62 }
  0x83   : > { %8359 = vmatprep.mubr.msk.f32.mxu0 %vm490_vm1, %v9540_v63 }
  0x84   : > { %8410 = vmatmul.mubr.msk.f32.gmra.mxu1 %vm490_vm1, %v9512_v58 }
  0x85   : > { %8412 = vmatprep.mubr.msk.f32.mxu1 %vm490_vm1, %v9516_v59 }
  0x86   : > { %8360 = vmatmul.mubr.msk.f32.gmra.mxu0 %vm490_vm1, %v9548_v0 }
  0x87   : > { %8362 = vmatprep.mubr.msk.f32.mxu0 %vm490_vm1, %v9552_v2 }
  0x88   : > { %8413 = vmatmul.mubr.msk.f32.gmra.mxu1 %vm490_vm1, %v9524_v60 }
  0x89   : > { %8415 = vmatprep.mubr.msk.f32.mxu1 %vm490_vm1, %v9528_v61 }
  0x8a   : > { %8363 = vmatmul.mubr.msk.f32.gmra.mxu0 %vm490_vm1, %v9560_v3 }
  0x8b   : > { %8365 = vmatprep.mubr.msk.f32.mxu0 %vm490_vm1, %v9564_v4 }
  0x8c   : > { %8416 = vmatmul.mubr.msk.f32.gmra.mxu1 %vm490_vm1, %v9536_v62 }
  0x8d   : > { %8418 = vmatprep.mubr.msk.f32.mxu1 %vm490_vm1, %v9540_v63 }
  0x8e   : > { %8366 = vmatmul.mubr.msk.f32.gmra.mxu0 %vm490_vm1, %v9572_v5 }
  0x8f   : > { %8368 = vmatprep.mubr.msk.f32.mxu0 %vm490_vm1, %v9576_v6 }
  0x90   : > { %8419 = vmatmul.mubr.msk.f32.gmra.mxu1 %vm490_vm1, %v9548_v0 }
  0x91   : > { %8421 = vmatprep.mubr.msk.f32.mxu1 %vm490_vm1, %v9552_v2 }
  0x92   : > { %8369 = vmatmul.mubr.msk.f32.gmra.mxu0 %vm490_vm1, %v9584_v7 }
  0x93   : > { %8371 = vmatprep.mubr.msk.f32.mxu0 %vm490_vm1, %v9588_v8 }
  0x94   : > { %8422 = vmatmul.mubr.msk.f32.gmra.mxu1 %vm490_vm1, %v9560_v3 }
  0x95   : > { %8424 = vmatprep.mubr.msk.f32.mxu1 %vm490_vm1, %v9564_v4 }
  0x96   : > { %8372 = vmatmul.mubr.msk.f32.gmra.mxu0 %vm490_vm1, %v9596_v9 }
  0x97   : > { %8374 = vmatprep.mubr.msk.f32.mxu0 %vm490_vm1, %v9600_v14 }
  0x98   : > { %8425 = vmatmul.mubr.msk.f32.gmra.mxu1 %vm490_vm1, %v9572_v5 }
  0x99   : > { %8427 = vmatprep.mubr.msk.f32.mxu1 %vm490_vm1, %v9576_v6 }
  0x9a   : > { %8375 = vmatmul.mubr.msk.f32.gmra.mxu0 %vm490_vm1, %v9608_v18 }
  0x9b   : > { %8377 = vmatprep.mubr.msk.f32.mxu0 %vm490_vm1, %v9612_v19 }
  0x9c   : > { %8428 = vmatmul.mubr.msk.f32.gmra.mxu1 %vm490_vm1, %v9584_v7 }
  0x9d   : > { %8430 = vmatprep.mubr.msk.f32.mxu1 %vm490_vm1, %v9588_v8 }
  0x9e   : > { %8378 = vmatmul.mubr.msk.f32.gmra.mxu0 %vm490_vm1, %v9620_v20 }
  0x9f   : > { %8380 = vmatprep.mubr.msk.f32.mxu0 %vm490_vm1, %v9345_v12 }
  0xa0   : > { %8431 = vmatmul.mubr.msk.f32.gmra.mxu1 %vm490_vm1, %v9596_v9 }
  0xa1   : > { %8433 = vmatprep.mubr.msk.f32.mxu1 %vm490_vm1, %v9600_v14 }
  0xa2   : > { %8381 = vmatmul.mubr.msk.f32.gmra.mxu0 %vm490_vm1, %v9359_v15 }
  0xa3   : > { %8441 = vmatprep.mubr.msk.f32.mxu0 %vm490_vm1, %v9343_v11 }
  0xa4   : > { %8434 = vmatmul.mubr.msk.f32.gmra.mxu1 %vm490_vm1, %v9608_v18 }
  0xa5   : > { %8436 = vmatprep.mubr.msk.f32.mxu1 %vm490_vm1, %v9612_v19 }
  0xa6   : > { %8442 = vmatmul.mubr.msk.f32.vlgmr.msra.gmra.mxu0 %vm490_vm1, %v9347_v13 }
  0xa7   : > { %8552 = vmatpush3.msk.msra.mxu0 %vm752_vm0, %v9637_v21  ;;  %8444 = vmatprep.mubr.msk.f32.mxu0 %vm490_vm1, %v9399_v30 }
  0xa8   : > { %8437 = vmatmul.mubr.msk.f32.gmra.mxu1 %vm490_vm1, %v9620_v20  ;;  %8663 = vmatprep.subr.msk.mxu0 %vm752_vm0, %v9799_v22 }
  0xa9   : > { %8497 = vmatprep.mubr.msk.f32.mxu1 %vm490_vm1, %v9361_v16 }
  0xaa   : > { %8445 = vmatmul.mubr.msk.f32.gmra.mxu0 %vm490_vm1, %v9401_v31 }
  0xab   : > { %8447 = vmatprep.mubr.msk.f32.mxu0 %vm490_vm1, %v9403_v32 }
  0xac   : > { %8498 = vmatmul.mubr.msk.f32.vlgmr.msra.gmra.mxu1 %vm490_vm1, %v9363_v17 }
  0xad   : > { %8500 = vmatprep.mubr.msk.f32.mxu1 %vm490_vm1, %v9343_v11  ;;  %8608 = vmatpush3.msk.msra.mxu1 %vm752_vm0, %v9684_v10 }
  0xae   : > { %8448 = vmatmul.mubr.msk.f32.gmra.mxu0 %vm490_vm1, %v9412_v33 }
  0xaf   : > { %8450 = vmatprep.mubr.msk.f32.mxu0 %vm490_vm1, %v9430_v40 }
  0xb0   : > { %8501 = vmatmul.mubr.msk.f32.gmra.mxu1 %vm490_vm1, %v9347_v13 }
  0xb1   : > { %8503 = vmatprep.mubr.msk.f32.mxu1 %vm490_vm1, %v9399_v30 }
  0xb2   : > { %8451 = vmatmul.mubr.msk.f32.gmra.mxu0 %vm490_vm1, %v9441_v41 }
  0xb3   : > { %8453 = vmatprep.mubr.msk.f32.mxu0 %vm490_vm1, %v9443_v42 }
  0xb4   : > { %8504 = vmatmul.mubr.msk.f32.gmra.mxu1 %vm490_vm1, %v9401_v31 }
  0xb5   : > { %8506 = vmatprep.mubr.msk.f32.mxu1 %vm490_vm1, %v9403_v32 }
  0xb6   : > { %8454 = vmatmul.mubr.msk.f32.gmra.mxu0 %vm490_vm1, %v9465_v49 }
  0xb7   : > { %8456 = vmatprep.mubr.msk.f32.mxu0 %vm490_vm1, %v9469_v50 }
  0xb8   : > { %8507 = vmatmul.mubr.msk.f32.gmra.mxu1 %vm490_vm1, %v9412_v33 }
  0xb9   : > { %8509 = vmatprep.mubr.msk.f32.mxu1 %vm490_vm1, %v9430_v40 }
  0xba   : > { %8457 = vmatmul.mubr.msk.f32.gmra.mxu0 %vm490_vm1, %v9488_v54 }
  0xbb   : > { %8459 = vmatprep.mubr.msk.f32.mxu0 %vm490_vm1, %v9492_v55 }
  0xbc   : > { %8510 = vmatmul.mubr.msk.f32.gmra.mxu1 %vm490_vm1, %v9441_v41 }
  0xbd   : > { %8512 = vmatprep.mubr.msk.f32.mxu1 %vm490_vm1, %v9443_v42 }
  0xbe   : > { %8460 = vmatmul.mubr.msk.f32.gmra.mxu0 %vm490_vm1, %v9500_v56 }
  0xbf   : > { %8462 = vmatprep.mubr.msk.f32.mxu0 %vm490_vm1, %v9504_v57 }
  0xc0   : > { %8513 = vmatmul.mubr.msk.f32.gmra.mxu1 %vm490_vm1, %v9465_v49 }
  0xc1   : > { %8515 = vmatprep.mubr.msk.f32.mxu1 %vm490_vm1, %v9469_v50 }
  0xc2   : > { %8463 = vmatmul.mubr.msk.f32.gmra.mxu0 %vm490_vm1, %v9512_v58 }
  0xc3   : > { %8465 = vmatprep.mubr.msk.f32.mxu0 %vm490_vm1, %v9516_v59 }
  0xc4   : > { %8516 = vmatmul.mubr.msk.f32.gmra.mxu1 %vm490_vm1, %v9488_v54 }
  0xc5   : > { %8518 = vmatprep.mubr.msk.f32.mxu1 %vm490_vm1, %v9492_v55 }
  0xc6   : > { %8466 = vmatmul.mubr.msk.f32.gmra.mxu0 %vm490_vm1, %v9524_v60 }
  0xc7   : > { %8468 = vmatprep.mubr.msk.f32.mxu0 %vm490_vm1, %v9528_v61 }
  0xc8   : > { %8519 = vmatmul.mubr.msk.f32.gmra.mxu1 %vm490_vm1, %v9500_v56 }
  0xc9   : > { %8521 = vmatprep.mubr.msk.f32.mxu1 %vm490_vm1, %v9504_v57 }
  0xca   : > { %8469 = vmatmul.mubr.msk.f32.gmra.mxu0 %vm490_vm1, %v9536_v62 }
  0xcb   : > { %8471 = vmatprep.mubr.msk.f32.mxu0 %vm490_vm1, %v9540_v63 }
  0xcc   : > { %8522 = vmatmul.mubr.msk.f32.gmra.mxu1 %vm490_vm1, %v9512_v58 }
  0xcd   : > { %8524 = vmatprep.mubr.msk.f32.mxu1 %vm490_vm1, %v9516_v59 }
  0xce   : > { %8472 = vmatmul.mubr.msk.f32.gmra.mxu0 %vm490_vm1, %v9548_v0 }
  0xcf   : > { %8474 = vmatprep.mubr.msk.f32.mxu0 %vm490_vm1, %v9552_v2 }
  0xd0   : > { %8525 = vmatmul.mubr.msk.f32.gmra.mxu1 %vm490_vm1, %v9524_v60 }
  0xd1   : > { %8527 = vmatprep.mubr.msk.f32.mxu1 %vm490_vm1, %v9528_v61 }
  0xd2   : > { %8475 = vmatmul.mubr.msk.f32.gmra.mxu0 %vm490_vm1, %v9560_v3 }
  0xd3   : > { %8477 = vmatprep.mubr.msk.f32.mxu0 %vm490_vm1, %v9564_v4 }
  0xd4   : > { %8528 = vmatmul.mubr.msk.f32.gmra.mxu1 %vm490_vm1, %v9536_v62 }
  0xd5   : > { %8530 = vmatprep.mubr.msk.f32.mxu1 %vm490_vm1, %v9540_v63 }
  0xd6   : > { %8478 = vmatmul.mubr.msk.f32.gmra.mxu0 %vm490_vm1, %v9572_v5  ;;  %v8219_v11 = vpop.f32.mrf.mxu0 }
  0xd7   : > { %8480 = vmatprep.mubr.msk.f32.mxu0 %vm490_vm1, %v9576_v6 }
  0xd8   : > { %v9907_v13 = vpop.f32.mrf.mxu1  ;;  %8531 = vmatmul.mubr.msk.f32.gmra.mxu1 %vm490_vm1, %v9548_v0  ;;  %v822_v17 = vpop.f32.mrf.mxu0 }
  0xd9   : > { %12787 = vst [vmem:[#allocation4_spill] sm:$0xff] %v9907_v13  ;;  %8533 = vmatprep.mubr.msk.f32.mxu1 %vm490_vm1, %v9552_v2 }
  0xda   : > { %v9913_v16 = vpop.f32.mrf.mxu1  ;;  %8481 = vmatmul.mubr.msk.f32.gmra.mxu0 %vm490_vm1, %v9584_v7 }
  0xdb   : > { %12788 = vst [vmem:[#allocation5_spill] sm:$0xff] %v9913_v16  ;;  %8483 = vmatprep.mubr.msk.f32.mxu0 %vm490_vm1, %v9588_v8 }
  0xdc   : > { %v8275_v23 = vpop.f32.mrf.mxu1  ;;  %8534 = vmatmul.mubr.msk.f32.gmra.mxu1 %vm490_vm1, %v9560_v3 }
  0xdd   : > { %v9921_v24 = vadd.f32 %v8275_v23, %v8219_v11  ;;  %8536 = vmatprep.mubr.msk.f32.mxu1 %vm490_vm1, %v9564_v4  ;;  %v8222_v25 = vpop.f32.mrf.mxu0 }
  0xde   : > { %v1178_v26 = vpop.f32.mrf.mxu1  ;;  %8484 = vmatmul.mubr.msk.f32.gmra.mxu0 %vm490_vm1, %v9596_v9 }
  0xdf   : > { %v9927_v27 = vadd.f32 %v1178_v26, %v822_v17  ;;  %8486 = vmatprep.mubr.msk.f32.mxu0 %vm490_vm1, %v9600_v14  ;;  %v832_v28 = vpop.f32.mrf.mxu0 }
  0xe0   : > { %v8278_v29 = vpop.f32.mrf.mxu1  ;;  %8537 = vmatmul.mubr.msk.f32.gmra.mxu1 %vm490_vm1, %v9572_v5 }
  0xe1   : > { %v9933_v34 = vadd.f32 %v8278_v29, %v8222_v25  ;;  %8539 = vmatprep.mubr.msk.f32.mxu1 %vm490_vm1, %v9576_v6  ;;  %v8225_v35 = vpop.f32.mrf.mxu0 }
  0xe2   : > { %v1188_v36 = vpop.f32.mrf.mxu1  ;;  %8487 = vmatmul.mubr.msk.f32.gmra.mxu0 %vm490_vm1, %v9608_v18 }
  0xe3   : > { %v9939_v37 = vadd.f32 %v1188_v36, %v832_v28  ;;  %8489 = vmatprep.mubr.msk.f32.mxu0 %vm490_vm1, %v9612_v19  ;;  %v842_v38 = vpop.f32.mrf.mxu0 }
  0xe4   : > { %v8281_v39 = vpop.f32.mrf.mxu1  ;;  %8540 = vmatmul.mubr.msk.f32.gmra.mxu1 %vm490_vm1, %v9584_v7 }
  0xe5   : > { %v9945_v43 = vadd.f32 %v8281_v39, %v8225_v35  ;;  %8542 = vmatprep.mubr.msk.f32.mxu1 %vm490_vm1, %v9588_v8  ;;  %v8228_v44 = vpop.f32.mrf.mxu0 }
  0xe6   : > { %v1198_v45 = vpop.f32.mrf.mxu1  ;;  %8490 = vmatmul.mubr.msk.f32.gmra.mxu0 %vm490_vm1, %v9620_v20 }
  0xe7   : > { %v9951_v46 = vadd.f32 %v1198_v45, %v842_v38  ;;  %8492 = vmatprep.mubr.msk.f32.mxu0 %vm490_vm1, %v9345_v12  ;;  %v852_v47 = vpop.f32.mrf.mxu0 }
  0xe8   : > { %v8284_v48 = vpop.f32.mrf.mxu1  ;;  %8543 = vmatmul.mubr.msk.f32.gmra.mxu1 %vm490_vm1, %v9596_v9 }
  0xe9   : > { %v9957_v51 = vadd.f32 %v8284_v48, %v8228_v44  ;;  %8545 = vmatprep.mubr.msk.f32.mxu1 %vm490_vm1, %v9600_v14  ;;  %v8231_v52 = vpop.f32.mrf.mxu0 }
  0xea   : > { %v1208_v53 = vpop.f32.mrf.mxu1  ;;  %8493 = vmatmul.mubr.msk.f32.gmra.mxu0 %vm490_vm1, %v9359_v15 }
  0xeb   : > { %v9963_v21 = vadd.f32 %v1208_v53, %v852_v47  ;;  %8553 = vmatprep.mubr.msk.f32.mxu0 %vm490_vm1, %v9399_v30  ;;  %v862_v12 = vpop.f32.mrf.mxu0 }
  0xec   : > { %v8287_v10 = vpop.f32.mrf.mxu1  ;;  %8546 = vmatmul.mubr.msk.f32.gmra.mxu1 %vm490_vm1, %v9608_v18 }
  0xed   : > { %v9969_v11 = vadd.f32 %v8287_v10, %v8231_v52  ;;  %8548 = vmatprep.mubr.msk.f32.mxu1 %vm490_vm1, %v9612_v19  ;;  %v8234_v17 = vpop.f32.mrf.mxu0 }
  0xee   : > { %v1218_v23 = vpop.f32.mrf.mxu1  ;;  %8554 = vmatmul.mubr.msk.f32.vlgmr.msra.gmra.mxu0 %vm490_vm1, %v9401_v31 }
  0xef   : > { %v9975_v15 = vadd.f32 %v1218_v23, %v862_v12  ;;  %8664 = vmatpush3.msk.msra.mxu0 %vm752_vm0, %v9799_v22  ;;  %8556 = vmatprep.mubr.msk.f32.mxu0 %vm490_vm1, %v9403_v32  ;;  %v872_v25 = vpop.f32.mrf.mxu0 }
  0xf0   : > { %v8290_v26 = vpop.f32.mrf.mxu1  ;;  %8549 = vmatmul.mubr.msk.f32.gmra.mxu1 %vm490_vm1, %v9620_v20 }
  0xf1   : > { %12789 = vst [vmem:[#allocation6_spill] sm:$0xff] %v9975_v15  ;;  %v9983_v28 = vadd.f32 %v8290_v26, %v8234_v17  ;;  %8609 = vmatprep.mubr.msk.f32.mxu1 %vm490_vm1, %v9399_v30  ;;  %v8237_v29 = vpop.f32.mrf.mxu0 }
  0xf2   : > { %v1228_v35 = vpop.f32.mrf.mxu1  ;;  %8557 = vmatmul.mubr.msk.f32.gmra.mxu0 %vm490_vm1, %v9412_v33 }
  0xf3   : > { %12790 = vst [vmem:[#allocation7_spill] sm:$0xff] %v9983_v28  ;;  %v9989_v36 = vadd.f32 %v1228_v35, %v872_v25  ;;  %8559 = vmatprep.mubr.msk.f32.mxu0 %vm490_vm1, %v9430_v40  ;;  %v882_v22 = vpop.f32.mrf.mxu0 }
  0xf4   : > { %v8293_v38 = vpop.f32.mrf.mxu1  ;;  %8610 = vmatmul.mubr.msk.f32.vlgmr.msra.gmra.mxu1 %vm490_vm1, %v9401_v31 }
  0xf5   : > { %12791 = vst [vmem:[#allocation8_spill] sm:$0xff] %v9989_v36  ;;  %v9995_v39 = vadd.f32 %v8293_v38, %v8237_v29  ;;  %8612 = vmatprep.mubr.msk.f32.mxu1 %vm490_vm1, %v9403_v32  ;;  %v8240_v44 = vpop.f32.mrf.mxu0 }
  0xf6   : > { %v1238_v45 = vpop.f32.mrf.mxu1  ;;  %8560 = vmatmul.mubr.msk.f32.gmra.mxu0 %vm490_vm1, %v9441_v41 }
  0xf7   : > { %12792 = vst [vmem:[#allocation9_spill] sm:$0xff] %v9995_v39  ;;  %v10001_v47 = vadd.f32 %v1238_v45, %v882_v22  ;;  %8562 = vmatprep.mubr.msk.f32.mxu0 %vm490_vm1, %v9443_v42  ;;  %v892_v48 = vpop.f32.mrf.mxu0 }
  0xf8   : > { %v8296_v52 = vpop.f32.mrf.mxu1  ;;  %8613 = vmatmul.mubr.msk.f32.gmra.mxu1 %vm490_vm1, %v9412_v33 }
  0xf9   : > { %12793 = vst [vmem:[#allocation10_spill] sm:$0xff] %v10001_v47  ;;  %v10007_v53 = vadd.f32 %v8296_v52, %v8240_v44  ;;  %8615 = vmatprep.mubr.msk.f32.mxu1 %vm490_vm1, %v9430_v40  ;;  %v8243_v12 = vpop.f32.mrf.mxu0 }
  0xfa   : > { %v1248_v10 = vpop.f32.mrf.mxu1  ;;  %8563 = vmatmul.mubr.msk.f32.gmra.mxu0 %vm490_vm1, %v9465_v49 }
  0xfb   : > { %12794 = vst [vmem:[#allocation11_spill] sm:$0xff] %v10007_v53  ;;  %v10013_v17 = vadd.f32 %v1248_v10, %v892_v48  ;;  %8565 = vmatprep.mubr.msk.f32.mxu0 %vm490_vm1, %v9469_v50  ;;  %v902_v23 = vpop.f32.mrf.mxu0  ;;  %v10189_v53 = vld [vmem:[#allocation2 + $0x138] sm:$0xff] }
  0xfc   : > { %v8299_v25 = vpop.f32.mrf.mxu1  ;;  %8616 = vmatmul.mubr.msk.f32.gmra.mxu1 %vm490_vm1, %v9441_v41 }
  0xfd   : > { %12795 = vst [vmem:[#allocation12_spill] sm:$0xff] %v10013_v17  ;;  %v10019_v26 = vadd.f32 %v8299_v25, %v8243_v12  ;;  %8618 = vmatprep.mubr.msk.f32.mxu1 %vm490_vm1, %v9443_v42  ;;  %v8246_v29 = vpop.f32.mrf.mxu0 }
  0xfe   : > { %v1258_v35 = vpop.f32.mrf.mxu1  ;;  %8566 = vmatmul.mubr.msk.f32.gmra.mxu0 %vm490_vm1, %v9488_v54 }
  0xff   : > { %12796 = vst [vmem:[#allocation13_spill] sm:$0xff] %v10019_v26  ;;  %v10025_v22 = vadd.f32 %v1258_v35, %v902_v23  ;;  %8568 = vmatprep.mubr.msk.f32.mxu0 %vm490_vm1, %v9492_v55  ;;  %v912_v38 = vpop.f32.mrf.mxu0 }
 0x100   : > { %v8302_v44 = vpop.f32.mrf.mxu1  ;;  %8619 = vmatmul.mubr.msk.f32.gmra.mxu1 %vm490_vm1, %v9465_v49 }
 0x101   : > { %12797 = vst [vmem:[#allocation14_spill] sm:$0xff] %v10025_v22  ;;  %v10031_v45 = vadd.f32 %v8302_v44, %v8246_v29  ;;  %8621 = vmatprep.mubr.msk.f32.mxu1 %vm490_vm1, %v9469_v50  ;;  %v8249_v48 = vpop.f32.mrf.mxu0 }
 0x102   : > { %v1268_v52 = vpop.f32.mrf.mxu1  ;;  %8569 = vmatmul.mubr.msk.f32.gmra.mxu0 %vm490_vm1, %v9500_v56 }
 0x103   : > { %12798 = vst [vmem:[#allocation15_spill] sm:$0xff] %v10031_v45  ;;  %v10037_v12 = vadd.f32 %v1268_v52, %v912_v38  ;;  %8571 = vmatprep.mubr.msk.f32.mxu0 %vm490_vm1, %v9504_v57  ;;  %v922_v10 = vpop.f32.mrf.mxu0 }
 0x104   : > { %v8305_v23 = vpop.f32.mrf.mxu1  ;;  %8622 = vmatmul.mubr.msk.f32.gmra.mxu1 %vm490_vm1, %v9488_v54 }
 0x105   : > { %12799 = vst [vmem:[#allocation16_spill] sm:$0xff] %v10037_v12  ;;  %v10043_v25 = vadd.f32 %v8305_v23, %v8249_v48  ;;  %8624 = vmatprep.mubr.msk.f32.mxu1 %vm490_vm1, %v9492_v55  ;;  %v8252_v29 = vpop.f32.mrf.mxu0  ;;  %v10171_v12 = vld [vmem:[#allocation2 + $0x128] sm:$0xff] }
 0x106   : > { %v1278_v35 = vpop.f32.mrf.mxu1  ;;  %8572 = vmatmul.mubr.msk.f32.gmra.mxu0 %vm490_vm1, %v9512_v58 }
 0x107   : > { %12800 = vst [vmem:[#allocation17_spill] sm:$0xff] %v10043_v25  ;;  %v10049_v38 = vadd.f32 %v1278_v35, %v922_v10  ;;  %8574 = vmatprep.mubr.msk.f32.mxu0 %vm490_vm1, %v9516_v59  ;;  %v932_v44 = vpop.f32.mrf.mxu0 }
 0x108   : > { %v8308_v52 = vpop.f32.mrf.mxu1  ;;  %8625 = vmatmul.mubr.msk.f32.gmra.mxu1 %vm490_vm1, %v9500_v56 }
 0x109   : > { %12801 = vst [vmem:[#allocation18_spill] sm:$0xff] %v10049_v38  ;;  %v10055_v48 = vadd.f32 %v8308_v52, %v8252_v29  ;;  %8627 = vmatprep.mubr.msk.f32.mxu1 %vm490_vm1, %v9504_v57  ;;  %v8255_v23 = vpop.f32.mrf.mxu0 }
 0x10a   : > { %v1288_v1 = vpop.f32.mrf.mxu1  ;;  %8575 = vmatmul.mubr.msk.f32.gmra.mxu0 %vm490_vm1, %v9524_v60 }
 0x10b   : > { %12802 = vst [vmem:[#allocation19_spill] sm:$0xff] %v10055_v48  ;;  %v10061_v10 = vadd.f32 %v1288_v1, %v932_v44  ;;  %8577 = vmatprep.mubr.msk.f32.mxu0 %vm490_vm1, %v9528_v61  ;;  %v942_v35 = vpop.f32.mrf.mxu0 }
 0x10c   : > { %v8311_v16 = vpop.f32.mrf.mxu1  ;;  %8628 = vmatmul.mubr.msk.f32.gmra.mxu1 %vm490_vm1, %v9512_v58 }
 0x10d   : > { %12803 = vst [vmem:[#allocation20_spill] sm:$0xff] %v10061_v10  ;;  %v10067_v29 = vadd.f32 %v8311_v16, %v8255_v23  ;;  %8630 = vmatprep.mubr.msk.f32.mxu1 %vm490_vm1, %v9516_v59  ;;  %v8258_v52 = vpop.f32.mrf.mxu0 }
 0x10e   : > { %v1298_v13 = vpop.f32.mrf.mxu1  ;;  %8578 = vmatmul.mubr.msk.f32.gmra.mxu0 %vm490_vm1, %v9536_v62 }
 0x10f   : > { %12804 = vst [vmem:[#allocation21_spill] sm:$0xff] %v10067_v29  ;;  %v10073_v1 = vadd.f32 %v1298_v13, %v942_v35  ;;  %8580 = vmatprep.mubr.msk.f32.mxu0 %vm490_vm1, %v9540_v63  ;;  %v952_v44 = vpop.f32.mrf.mxu0 }
 0x110   : > { %v8314_v10 = vpop.f32.mrf.mxu1  ;;  %8631 = vmatmul.mubr.msk.f32.gmra.mxu1 %vm490_vm1, %v9524_v60 }
 0x111   : > { %12805 = vst [vmem:[#allocation22_spill] sm:$0xff] %v10073_v1  ;;  %v10079_v16 = vadd.f32 %v8314_v10, %v8258_v52  ;;  %8633 = vmatprep.mubr.msk.f32.mxu1 %vm490_vm1, %v9528_v61  ;;  %v8261_v23 = vpop.f32.mrf.mxu0 }
 0x112   : > { %v1308_v29 = vpop.f32.mrf.mxu1  ;;  %8581 = vmatmul.mubr.msk.f32.gmra.mxu0 %vm490_vm1, %v9548_v0 }
 0x113   : > { %12806 = vst [vmem:[#allocation23_spill] sm:$0xff] %v10079_v16  ;;  %v10085_v13 = vadd.f32 %v1308_v29, %v952_v44  ;;  %8583 = vmatprep.mubr.msk.f32.mxu0 %vm490_vm1, %v9552_v2  ;;  %v962_v35 = vpop.f32.mrf.mxu0 }
 0x114   : > { %v8317_v1 = vpop.f32.mrf.mxu1  ;;  %8634 = vmatmul.mubr.msk.f32.gmra.mxu1 %vm490_vm1, %v9536_v62 }
 0x115   : > { %12807 = vst [vmem:[#allocation24_spill] sm:$0xff] %v10085_v13  ;;  %v10091_v10 = vadd.f32 %v8317_v1, %v8261_v23  ;;  %8636 = vmatprep.mubr.msk.f32.mxu1 %vm490_vm1, %v9540_v63  ;;  %v8264_v52 = vpop.f32.mrf.mxu0 }
 0x116   : > { %v1318_v16 = vpop.f32.mrf.mxu1  ;;  %8584 = vmatmul.mubr.msk.f32.gmra.mxu0 %vm490_vm1, %v9560_v3 }
 0x117   : > { %12808 = vst [vmem:[#allocation25_spill] sm:$0xff] %v10091_v10  ;;  %v10097_v29 = vadd.f32 %v1318_v16, %v962_v35  ;;  %8586 = vmatprep.mubr.msk.f32.mxu0 %vm490_vm1, %v9564_v4  ;;  %v972_v44 = vpop.f32.mrf.mxu0 }
 0x118   : > { %v8320_v13 = vpop.f32.mrf.mxu1  ;;  %8637 = vmatmul.mubr.msk.f32.gmra.mxu1 %vm490_vm1, %v9548_v0 }
 0x119   : > { %12809 = vst [vmem:[#allocation26_spill] sm:$0xff] %v10097_v29  ;;  %v10103_v1 = vadd.f32 %v8320_v13, %v8264_v52  ;;  %8639 = vmatprep.mubr.msk.f32.mxu1 %vm490_vm1, %v9552_v2  ;;  %v8267_v23 = vpop.f32.mrf.mxu0 }
 0x11a   : > { %v1328_v10 = vpop.f32.mrf.mxu1  ;;  %8587 = vmatmul.mubr.msk.f32.gmra.mxu0 %vm490_vm1, %v9572_v5 }
 0x11b   : > { %12810 = vst [vmem:[#allocation27_spill] sm:$0xff] %v10103_v1  ;;  %v10109_v16 = vadd.f32 %v1328_v10, %v972_v44  ;;  %8589 = vmatprep.mubr.msk.f32.mxu0 %vm490_vm1, %v9576_v6  ;;  %v10113_v35 = vpop.f32.mrf.mxu0 }
 0x11c   : > { %12812 = vst [vmem:[#allocation29_spill] sm:$0xff] %v10113_v35  ;;  %v8323_v29 = vpop.f32.mrf.mxu1  ;;  %8640 = vmatmul.mubr.msk.f32.gmra.mxu1 %vm490_vm1, %v9560_v3 }
 0x11d   : > { %12811 = vst [vmem:[#allocation28_spill] sm:$0xff] %v10109_v16  ;;  %v10117_v13 = vadd.f32 %v8323_v29, %v8267_v23  ;;  %8642 = vmatprep.mubr.msk.f32.mxu1 %vm490_vm1, %v9564_v4  ;;  %v8331_v1 = vpop.f32.mrf.mxu0 }
 0x11e   : > { %v10121_v52 = vpop.f32.mrf.mxu1  ;;  %8590 = vmatmul.mubr.msk.f32.gmra.mxu0 %vm490_vm1, %v9584_v7 }
 0x11f   : > { %12813 = vst [vmem:[#allocation30_spill] sm:$0xff] %v10117_v13  ;;  %12814 = vst [vmem:[#allocation31_spill] sm:$0xff] %v10121_v52  ;;  %8592 = vmatprep.mubr.msk.f32.mxu0 %vm490_vm1, %v9588_v8  ;;  %v10129_v44 = vpop.f32.mrf.mxu0 }
 0x120   : > { %v10127_v10 = vpop.f32.mrf.mxu1  ;;  %8643 = vmatmul.mubr.msk.f32.gmra.mxu1 %vm490_vm1, %v9572_v5 }
 0x121   : > { %12815 = vst [vmem:[#allocation32_spill] sm:$0xff] %v10127_v10  ;;  %8645 = vmatprep.mubr.msk.f32.mxu1 %vm490_vm1, %v9576_v6  ;;  %v8334_v23 = vpop.f32.mrf.mxu0 }
 0x122   : > { %v10135_v29 = vpop.f32.mrf.mxu1  ;;  %8593 = vmatmul.mubr.msk.f32.gmra.mxu0 %vm490_vm1, %v9596_v9 }
 0x123   : > { %12816 = vst [vmem:[#allocation33_spill] sm:$0xff] %v10135_v29  ;;  %8595 = vmatprep.mubr.msk.f32.mxu0 %vm490_vm1, %v9600_v14  ;;  %v10141_v13 = vpop.f32.mrf.mxu0 }
 0x124   : > { %v8387_v10 = vpop.f32.mrf.mxu1  ;;  %8646 = vmatmul.mubr.msk.f32.gmra.mxu1 %vm490_vm1, %v9584_v7 }
 0x125   : > { %v10145_v52 = vadd.f32 %v8387_v10, %v8331_v1  ;;  %8648 = vmatprep.mubr.msk.f32.mxu1 %vm490_vm1, %v9588_v8  ;;  %v10159_v1 = vld [vmem:[#allocation2 + $0x120] sm:$0xff] }
 0x126   : > { %v8337_v35 = vpop.f32.mrf.mxu0  ;;  %v10149_v29 = vpop.f32.mrf.mxu1  ;;  %8596 = vmatmul.mubr.msk.f32.gmra.mxu0 %vm490_vm1, %v9608_v18 }
 0x127   : > { %8598 = vmatprep.mubr.msk.f32.mxu0 %vm490_vm1, %v9612_v19 }
 0x128   : > { %v10155_v16 = vpop.f32.mrf.mxu0  ;;  %v8390_v48 = vpop.f32.mrf.mxu1  ;;  %8649 = vmatmul.mubr.msk.f32.gmra.mxu1 %vm490_vm1, %v9596_v9 }
 0x129   : > { %v10161_v10 = vadd.f32 %v8390_v48, %v8334_v23  ;;  %8651 = vmatprep.mubr.msk.f32.mxu1 %vm490_vm1, %v9600_v14  ;;  %v10177_v48 = vld [vmem:[#allocation2 + $0x130] sm:$0xff] }
 0x12a   : > { %v8340_v38 = vpop.f32.mrf.mxu0  ;;  %v10165_v25 = vpop.f32.mrf.mxu1  ;;  %8599 = vmatmul.mubr.msk.f32.gmra.mxu0 %vm490_vm1, %v9620_v20 }
 0x12b   : > { %8601 = vmatprep.mubr.msk.f32.mxu0 %vm490_vm1, %v10159_v1 }
 0x12c   : > { %v10173_v45 = vpop.f32.mrf.mxu0  ;;  %v8393_v22 = vpop.f32.mrf.mxu1  ;;  %8652 = vmatmul.mubr.msk.f32.gmra.mxu1 %vm490_vm1, %v9608_v18 }
 0x12d   : > { %v10179_v23 = vadd.f32 %v8393_v22, %v8337_v35  ;;  %8654 = vmatprep.mubr.msk.f32.mxu1 %vm490_vm1, %v9612_v19 }
 0x12e   : > { %v8343_v26 = vpop.f32.mrf.mxu0  ;;  %v10183_v17 = vpop.f32.mrf.mxu1  ;;  %8602 = vmatmul.mubr.msk.f32.gmra.mxu0 %vm490_vm1, %v10171_v12 }
 0x12f   : > { %8604 = vmatprep.mubr.msk.f32.mxu0 %vm490_vm1, %v10177_v48 }
 0x130   : > { %v10191_v47 = vpop.f32.mrf.mxu0  ;;  %v8396_v39 = vpop.f32.mrf.mxu1  ;;  %8655 = vmatmul.mubr.msk.f32.gmra.mxu1 %vm490_vm1, %v9620_v20 }
 0x131   : > { %12817 = vst [vmem:[#allocation34_spill] sm:$0xff] %v10191_v47  ;;  %v10195_v22 = vadd.f32 %v8396_v39, %v8340_v38  ;;  %8657 = vmatprep.mubr.msk.f32.mxu1 %vm490_vm1, %v10159_v1 }
 0x132   : > { %v8346_v35 = vpop.f32.mrf.mxu0  ;;  %v10199_v36 = vpop.f32.mrf.mxu1  ;;  %8605 = vmatmul.mubr.msk.f32.gmra.mxu0 %vm490_vm1, %v10189_v53 }
 0x133   : > { %12818 = vst [vmem:[#allocation35_spill] sm:$0xff] %v10195_v22  ;;  %8665 = vmatprep.mubr.msk.f32.mxu0 %vm490_vm1, %v9399_v30 }
 0x134   : > { %v10205_v28 = vpop.f32.mrf.mxu0  ;;  %v8399_v47 = vpop.f32.mrf.mxu1  ;;  %8658 = vmatmul.mubr.msk.f32.gmra.mxu1 %vm490_vm1, %v10171_v12 }
 0x135   : > { %12819 = vst [vmem:[#allocation36_spill] sm:$0xff] %v10205_v28  ;;  %v10209_v39 = vadd.f32 %v8399_v47, %v8343_v26  ;;  %8660 = vmatprep.mubr.msk.f32.mxu1 %vm490_vm1, %v10177_v48 }
 0x136   : > { %v8349_v38 = vpop.f32.mrf.mxu0  ;;  %v10213_v22 = vpop.f32.mrf.mxu1  ;;  %8666 = vmatmul.mubr.msk.f32.vlgmr.msra.gmra.mxu0 %vm490_vm1, %v9401_v31 }
 0x137   : > { %12820 = vst [vmem:[#allocation37_spill] sm:$0xff] %v10209_v39  ;;  %12821 = vst [vmem:[#allocation38_spill] sm:$0xff] %v10213_v22  ;;  %8668 = vmatprep.mubr.msk.f32.mxu0 %vm490_vm1, %v9403_v32 }
 0x138   : > { %v10219_v30 = vpop.f32.mrf.mxu0  ;;  %v8402_v28 = vpop.f32.mrf.mxu1  ;;  %8661 = vmatmul.mubr.msk.f32.gmra.mxu1 %vm490_vm1, %v10189_v53 }
 0x139   : > { %12822 = vst [vmem:[#allocation39_spill] sm:$0xff] %v10219_v30  ;;  %v10223_v47 = vadd.f32 %v8402_v28, %v8346_v35 }
 0x13a   : > { %v8352_v26 = vpop.f32.mrf.mxu0  ;;  %v10225_v39 = vpop.f32.mrf.mxu1  ;;  %8669 = vmatmul.mubr.msk.f32.gmra.mxu0 %vm490_vm1, %v9412_v33 }
 0x13b   : > { %12823 = vst [vmem:[#allocation40_spill] sm:$0xff] %v10223_v47  ;;  %8671 = vmatprep.mubr.msk.f32.mxu0 %vm490_vm1, %v9430_v40 }
 0x13c   : > { %v10231_v31 = vpop.f32.mrf.mxu0  ;;  %v8405_v32 = vpop.f32.mrf.mxu1 }
 0x13d   : > { %12824 = vst [vmem:[#allocation41_spill] sm:$0xff] %v10231_v31  ;;  %v10233_v22 = vadd.f32 %v8405_v32, %v8349_v38 }
 0x13e   : > { %v8355_v30 = vpop.f32.mrf.mxu0  ;;  %v10235_v15 = vpop.f32.mrf.mxu1  ;;  %8672 = vmatmul.mubr.msk.f32.gmra.mxu0 %vm490_vm1, %v9441_v41 }
 0x13f   : > { %8674 = vmatprep.mubr.msk.f32.mxu0 %vm490_vm1, %v9443_v42 }
 0x140   : > { %v10241_v28 = vpop.f32.mrf.mxu0  ;;  %v8408_v33 = vpop.f32.mrf.mxu1 }
 0x141   : > { %12825 = vst [vmem:[#allocation42_spill] sm:$0xff] %v10241_v28  ;;  %v10243_v35 = vadd.f32 %v8408_v33, %v8352_v26 }
 0x142   : > { %v8358_v40 = vpop.f32.mrf.mxu0  ;;  %v10245_v47 = vpop.f32.mrf.mxu1  ;;  %8675 = vmatmul.mubr.msk.f32.gmra.mxu0 %vm490_vm1, %v9465_v49 }
 0x143   : > { %8677 = vmatprep.mubr.msk.f32.mxu0 %vm490_vm1, %v9469_v50 }
 0x144   : > { %v10251_v38 = vpop.f32.mrf.mxu0  ;;  %v8411_v41 = vpop.f32.mrf.mxu1 }
 0x145   : > { %v10253_v32 = vadd.f32 %v8411_v41, %v8355_v30 }
 0x146   : > { %v8361_v42 = vpop.f32.mrf.mxu0  ;;  %v10255_v31 = vpop.f32.mrf.mxu1  ;;  %8678 = vmatmul.mubr.msk.f32.gmra.mxu0 %vm490_vm1, %v9488_v54 }
 0x147   : > { %8680 = vmatprep.mubr.msk.f32.mxu0 %vm490_vm1, %v9492_v55  ;;  %v7283_v55 = vld [vmem:[%s12760_s5 + $0x18] sm:$0xff] }
 0x148   : > { %v10261_v26 = vpop.f32.mrf.mxu0  ;;  %v8414_v49 = vpop.f32.mrf.mxu1  ;;  %8719 = vmatprep.subr.mxu1 %v7283_v55 }
 0x149   : > { %v10263_v33 = vadd.f32 %v8414_v49, %v8358_v40  ;;  %8720 = vmatpush3.msra.mxu1 %v7283_v55 }
 0x14a   : > { %v8364_v50 = vpop.f32.mrf.mxu0  ;;  %v10265_v28 = vpop.f32.mrf.mxu1  ;;  %8681 = vmatmul.mubr.msk.f32.gmra.mxu0 %vm490_vm1, %v9500_v56 }
 0x14b   : > { %8683 = vmatprep.mubr.msk.f32.mxu0 %vm490_vm1, %v9504_v57 }
 0x14c   : > { %v10271_v30 = vpop.f32.mrf.mxu0  ;;  %v8417_v54 = vpop.f32.mrf.mxu1 }
 0x14d   : > { %12826 = vst [vmem:[#allocation43_spill] sm:$0xff] %v10271_v30  ;;  %v10273_v41 = vadd.f32 %v8417_v54, %v8361_v42 }
 0x14e   : > { %v8367_v40 = vpop.f32.mrf.mxu0  ;;  %v10278_v49 = vpop.f32.mrf.mxu1  ;;  %8684 = vmatmul.mubr.msk.f32.gmra.mxu0 %vm490_vm1, %v9512_v58 }
 0x14f   : > { %12827 = vst [vmem:[#allocation44_spill] sm:$0xff] %v10273_v41  ;;  %12828 = vst [vmem:[#allocation45_spill] sm:$0xff] %v10278_v49  ;;  %8686 = vmatprep.mubr.msk.f32.mxu0 %vm490_vm1, %v9516_v59 }
 0x150   : > { %v10284_v56 = vpop.f32.mrf.mxu0  ;;  %v8420_v57 = vpop.f32.mrf.mxu1 }
 0x151   : > { %12829 = vst [vmem:[#allocation46_spill] sm:$0xff] %v10284_v56  ;;  %v10286_v42 = vadd.f32 %v8420_v57, %v8364_v50 }
 0x152   : > { %v8370_v54 = vpop.f32.mrf.mxu0  ;;  %v10288_v30 = vpop.f32.mrf.mxu1  ;;  %8687 = vmatmul.mubr.msk.f32.gmra.mxu0 %vm490_vm1, %v9524_v60 }
 0x153   : > { %8689 = vmatprep.mubr.msk.f32.mxu0 %vm490_vm1, %v9528_v61 }
 0x154   : > { %v10294_v58 = vpop.f32.mrf.mxu0  ;;  %v8423_v41 = vpop.f32.mrf.mxu1 }
 0x155   : > { %12830 = vst [vmem:[#allocation47_spill] sm:$0xff] %v10294_v58  ;;  %v10296_v49 = vadd.f32 %v8423_v41, %v8367_v40 }
 0x156   : > { %v8373_v59 = vpop.f32.mrf.mxu0  ;;  %v10298_v55 = vpop.f32.mrf.mxu1  ;;  %8690 = vmatmul.mubr.msk.f32.gmra.mxu0 %vm490_vm1, %v9536_v62 }
 0x157   : > { %8692 = vmatprep.mubr.msk.f32.mxu0 %vm490_vm1, %v9540_v63 }
 0x158   : > { %v10304_v50 = vpop.f32.mrf.mxu0  ;;  %v8426_v60 = vpop.f32.mrf.mxu1 }
 0x159   : > { %12831 = vst [vmem:[#allocation48_spill] sm:$0xff] %v10304_v50  ;;  %v10306_v57 = vadd.f32 %v8426_v60, %v8370_v54 }
 0x15a   : > { %v8376_v61 = vpop.f32.mrf.mxu0  ;;  %v10308_v56 = vpop.f32.mrf.mxu1  ;;  %8693 = vmatmul.mubr.msk.f32.gmra.mxu0 %vm490_vm1, %v9548_v0 }
 0x15b   : > { %8695 = vmatprep.mubr.msk.f32.mxu0 %vm490_vm1, %v9552_v2 }
 0x15c   : > { %v10314_v41 = vpop.f32.mrf.mxu0  ;;  %v8429_v62 = vpop.f32.mrf.mxu1 }
 0x15d   : > { %v10316_v40 = vadd.f32 %v8429_v62, %v8373_v59 }
 0x15e   : > { %v8379_v63 = vpop.f32.mrf.mxu0  ;;  %v10318_v58 = vpop.f32.mrf.mxu1  ;;  %8696 = vmatmul.mubr.msk.f32.gmra.mxu0 %vm490_vm1, %v9560_v3 }
 0x15f   : > { %8698 = vmatprep.mubr.msk.f32.mxu0 %vm490_vm1, %v9564_v4 }
 0x160   : > { %v10324_v54 = vpop.f32.mrf.mxu0  ;;  %v8432_v0 = vpop.f32.mrf.mxu1 }
 0x161   : > { %12832 = vst [vmem:[#allocation49_spill] sm:$0xff] %v10324_v54  ;;  %v10326_v60 = vadd.f32 %v8432_v0, %v8376_v61 }
 0x162   : > { %v8382_v2 = vpop.f32.mrf.mxu0  ;;  %v10328_v50 = vpop.f32.mrf.mxu1  ;;  %8699 = vmatmul.mubr.msk.f32.gmra.mxu0 %vm490_vm1, %v9572_v5 }
 0x163   : > { %8701 = vmatprep.mubr.msk.f32.mxu0 %vm490_vm1, %v9576_v6 }
 0x164   : > { %v10334_v59 = vpop.f32.mrf.mxu0  ;;  %v8435_v3 = vpop.f32.mrf.mxu1 }
 0x165   : > { %12833 = vst [vmem:[#allocation50_spill] sm:$0xff] %v10334_v59  ;;  %v10336_v62 = vadd.f32 %v8435_v3, %v8379_v63 }
 0x166   : > { %v10338_v4 = vpop.f32.mrf.mxu1  ;;  %v8443_v54 = vpop.f32.mrf.mxu0  ;;  %8702 = vmatmul.mubr.msk.f32.gmra.mxu0 %vm490_vm1, %v9584_v7 }
 0x167   : > { %12834 = vst [vmem:[#allocation51_spill] sm:$0xff] %v10338_v4  ;;  %8704 = vmatprep.mubr.msk.f32.mxu0 %vm490_vm1, %v9588_v8 }
 0x168   : > { %v8438_v61 = vpop.f32.mrf.mxu1  ;;  %v10344_v0 = vpop.f32.mrf.mxu0 }
 0x169   : > { %v10346_v5 = vadd.f32 %v8438_v61, %v8382_v2 }
 0x16a   : > { %v10348_v6 = vpop.f32.mrf.mxu1  ;;  %v8446_v59 = vpop.f32.mrf.mxu0  ;;  %8705 = vmatmul.mubr.msk.f32.gmra.mxu0 %vm490_vm1, %v9596_v9 }
 0x16b   : > { %12835 = vst [vmem:[#allocation52_spill] sm:$0xff] %v10348_v6  ;;  %8707 = vmatprep.mubr.msk.f32.mxu0 %vm490_vm1, %v9600_v14 }
 0x16c   : > { %v10354_v63 = vpop.f32.mrf.mxu0  ;;  %v8499_v7 = vpop.f32.mrf.mxu1 }
 0x16d   : > { %12836 = vst [vmem:[#allocation53_spill] sm:$0xff] %v10354_v63  ;;  %v10356_v3 = vadd.f32 %v8499_v7, %v8443_v54 }
 0x16e   : > { %v8449_v8 = vpop.f32.mrf.mxu0  ;;  %v10358_v4 = vpop.f32.mrf.mxu1  ;;  %8708 = vmatmul.mubr.msk.f32.gmra.mxu0 %vm490_vm1, %v9608_v18 }
 0x16f   : > { %8710 = vmatprep.mubr.msk.f32.mxu0 %vm490_vm1, %v9612_v19 }
 0x170   : > { %v10364_v2 = vpop.f32.mrf.mxu0  ;;  %v8502_v9 = vpop.f32.mrf.mxu1 }
 0x171   : > { %12837 = vst [vmem:[#allocation54_spill] sm:$0xff] %v10364_v2  ;;  %v10366_v61 = vadd.f32 %v8502_v9, %v8446_v59 }
 0x172   : > { %v8452_v14 = vpop.f32.mrf.mxu0  ;;  %v10368_v6 = vpop.f32.mrf.mxu1  ;;  %8711 = vmatmul.mubr.msk.f32.gmra.mxu0 %vm490_vm1, %v9620_v20 }
 0x173   : > { %12838 = vst [vmem:[#allocation55_spill] sm:$0xff] %v10366_v61  ;;  %8713 = vmatprep.mubr.msk.f32.mxu0 %vm490_vm1, %v10159_v1 }
 0x174   : > { %v10374_v54 = vpop.f32.mrf.mxu0  ;;  %v8505_v18 = vpop.f32.mrf.mxu1 }
 0x175   : > { %12839 = vst [vmem:[#allocation56_spill] sm:$0xff] %v10374_v54  ;;  %v10376_v7 = vadd.f32 %v8505_v18, %v8449_v8 }
 0x176   : > { %v8455_v19 = vpop.f32.mrf.mxu0  ;;  %v10378_v63 = vpop.f32.mrf.mxu1  ;;  %8714 = vmatmul.mubr.msk.f32.gmra.mxu0 %vm490_vm1, %v10171_v12 }
 0x177   : > { %12840 = vst [vmem:[#allocation57_spill] sm:$0xff] %v10376_v7  ;;  %12841 = vst [vmem:[#allocation58_spill] sm:$0xff] %v10378_v63  ;;  %8716 = vmatprep.mubr.msk.f32.mxu0 %vm490_vm1, %v10177_v48 }
 0x178   : > { %v10384_v59 = vpop.f32.mrf.mxu0  ;;  %v8508_v20 = vpop.f32.mrf.mxu1 }
 0x179   : > { %12842 = vst [vmem:[#allocation59_spill] sm:$0xff] %v10384_v59  ;;  %v10386_v9 = vadd.f32 %v8508_v20, %v8452_v14 }
 0x17a   : > { %v8458_v1 = vpop.f32.mrf.mxu0  ;;  %v10388_v2 = vpop.f32.mrf.mxu1  ;;  %8717 = vmatmul.mubr.msk.f32.gmra.mxu0 %vm490_vm1, %v10189_v53 }
 0x17b   : > { %12843 = vst [vmem:[#allocation60_spill] sm:$0xff] %v10386_v9  ;;  %12844 = vst [vmem:[#allocation61_spill] sm:$0xff] %v10388_v2 }
 0x17c   : > { %v10392_v8 = vpop.f32.mrf.mxu0  ;;  %v8511_v18 = vpop.f32.mrf.mxu1 }
 0x17d   : > { %12845 = vst [vmem:[#allocation62_spill] sm:$0xff] %v10392_v8  ;;  %v10394_v54 = vadd.f32 %v8511_v18, %v8455_v19 }
 0x17e   : > { %v8461_v12 = vpop.f32.mrf.mxu0  ;;  %v10396_v7 = vpop.f32.mrf.mxu1 }
 0x17f   : > { %12846 = vst [vmem:[#allocation63_spill] sm:$0xff] %v10394_v54  ;;  %12847 = vst [vmem:[#allocation64_spill] sm:$0xff] %v10396_v7 }
 0x180   : > { %v10398_v48 = vpop.f32.mrf.mxu0  ;;  %v8514_v59 = vpop.f32.mrf.mxu1 }
 0x181   : > { %12848 = vst [vmem:[#allocation65_spill] sm:$0xff] %v10398_v48  ;;  %v10400_v63 = vadd.f32 %v8514_v59, %v8458_v1 }
 0x182   : > { %v8464_v14 = vpop.f32.mrf.mxu0  ;;  %v10402_v20 = vpop.f32.mrf.mxu1 }
 0x183   : > { %12849 = vst [vmem:[#allocation66_spill] sm:$0xff] %v10400_v63  ;;  %12850 = vst [vmem:[#allocation67_spill] sm:$0xff] %v10402_v20 }
 0x184   : > { %v10404_v9 = vpop.f32.mrf.mxu0  ;;  %v8517_v2 = vpop.f32.mrf.mxu1 }
 0x185   : > { %12851 = vst [vmem:[#allocation68_spill] sm:$0xff] %v10404_v9  ;;  %v10406_v53 = vadd.f32 %v8517_v2, %v8461_v12  ;;  %v7348_v2 = vld [vmem:[%s12760_s5 + $0x20] sm:$0xff] }
 0x186   : > { %v8467_v8 = vpop.f32.mrf.mxu0  ;;  %v10408_v61 = vpop.f32.mrf.mxu1  ;;  %8819 = vmatprep.subr.mxu0 %v7348_v2 }
 0x187   : > { %12852 = vst [vmem:[#allocation69_spill] sm:$0xff] %v10406_v53  ;;  %12853 = vst [vmem:[#allocation70_spill] sm:$0xff] %v10408_v61  ;;  %8820 = vmatpush3.msra.mxu0 %v7348_v2 }
 0x188   : > { %v10410_v19 = vpop.f32.mrf.mxu0  ;;  %v8520_v18 = vpop.f32.mrf.mxu1 }
 0x189   : > { %12854 = vst [vmem:[#allocation71_spill] sm:$0xff] %v10410_v19  ;;  %v10412_v54 = vadd.f32 %v8520_v18, %v8464_v14 }
 0x18a   : > { %v8470_v48 = vpop.f32.mrf.mxu0  ;;  %v10414_v7 = vpop.f32.mrf.mxu1 }
 0x18b   : > { %12855 = vst [vmem:[#allocation72_spill] sm:$0xff] %v10412_v54  ;;  %12856 = vst [vmem:[#allocation73_spill] sm:$0xff] %v10414_v7 }
 0x18c   : > { %v10416_v59 = vpop.f32.mrf.mxu0  ;;  %v8523_v1 = vpop.f32.mrf.mxu1 }
 0x18d   : > { %12857 = vst [vmem:[#allocation74_spill] sm:$0xff] %v10416_v59  ;;  %v10418_v63 = vadd.f32 %v8523_v1, %v8467_v8 }
 0x18e   : > { %v8473_v9 = vpop.f32.mrf.mxu0  ;;  %v10420_v20 = vpop.f32.mrf.mxu1 }
 0x18f   : > { %12858 = vst [vmem:[#allocation75_spill] sm:$0xff] %v10418_v63  ;;  %12859 = vst [vmem:[#allocation76_spill] sm:$0xff] %v10420_v20 }
 0x190   : > { %v10425_v12 = vpop.f32.mrf.mxu0  ;;  %v8526_v19 = vpop.f32.mrf.mxu1 }
 0x191   : > { %12860 = vst [vmem:[#allocation77_spill] sm:$0xff] %v10425_v12  ;;  %v10427_v14 = vadd.f32 %v8526_v19, %v8470_v48 }
 0x192   : > { %v8476_v18 = vpop.f32.mrf.mxu0  ;;  %v10429_v54 = vpop.f32.mrf.mxu1 }
 0x193   : > { %12861 = vst [vmem:[#allocation78_spill] sm:$0xff] %v10427_v14  ;;  %12862 = vst [vmem:[#allocation79_spill] sm:$0xff] %v10429_v54 }
 0x194   : > { %v10431_v59 = vpop.f32.mrf.mxu0  ;;  %v8529_v8 = vpop.f32.mrf.mxu1 }
 0x195   : > { %12863 = vst [vmem:[#allocation80_spill] sm:$0xff] %v10431_v59  ;;  %v10433_v1 = vadd.f32 %v8529_v8, %v8473_v9  ;;  %v10448_v59 = vld [vmem:[%s12760_s5] sm:$0xff] }
 0x196   : > { %v8479_v63 = vpop.f32.mrf.mxu0  ;;  %v10435_v20 = vpop.f32.mrf.mxu1  ;;  %12870 = vst [vmem:[#allocation87_spill] sm:$0xff] %v10448_v59  ;;  %8769 = vmatprep.subr.mxu1 %v10448_v59 }
 0x197   : > { %12864 = vst [vmem:[#allocation81_spill] sm:$0xff] %v10433_v1  ;;  %12865 = vst [vmem:[#allocation82_spill] sm:$0xff] %v10435_v20 }
 0x198   : > { %v10437_v7 = vpop.f32.mrf.mxu0  ;;  %v8532_v53 = vpop.f32.mrf.mxu1 }
 0x199   : > { %12866 = vst [vmem:[#allocation83_spill] sm:$0xff] %v10437_v7  ;;  %v10439_v12 = vadd.f32 %v8532_v53, %v8476_v18 }
 0x19a   : > { %v8482_v61 = vpop.f32.mrf.mxu0  ;;  %v10441_v48 = vpop.f32.mrf.mxu1 }
 0x19b   : > { %12867 = vst [vmem:[#allocation84_spill] sm:$0xff] %v10439_v12  ;;  %12868 = vst [vmem:[#allocation85_spill] sm:$0xff] %v10441_v48 }
 0x19c   : > { %v10443_v19 = vpop.f32.mrf.mxu0  ;;  %v8535_v2 = vpop.f32.mrf.mxu1 }
 0x19d   : > { %12869 = vst [vmem:[#allocation86_spill] sm:$0xff] %v10443_v19  ;;  %v10450_v9 = vadd.f32 %v8535_v2, %v8479_v63 }
 0x19e   : > { %v8485_v8 = vpop.f32.mrf.mxu0  ;;  %v10453_v7 = vpop.f32.mrf.mxu1 }
 0x19f   : > { %12871 = vst [vmem:[#allocation88_spill] sm:$0xff] %v10450_v9  ;;  %12872 = vst [vmem:[#allocation89_spill] sm:$0xff] %v10453_v7 }
 0x1a0   : > { %v10455_v53 = vpop.f32.mrf.mxu0  ;;  %v8538_v18 = vpop.f32.mrf.mxu1 }
 0x1a1   : > { %12873 = vst [vmem:[#allocation90_spill] sm:$0xff] %v10455_v53  ;;  %v10457_v12 = vadd.f32 %v8538_v18, %v8482_v61 }
 0x1a2   : > { %v8488_v48 = vpop.f32.mrf.mxu0  ;;  %v10459_v19 = vpop.f32.mrf.mxu1 }
 0x1a3   : > { %12874 = vst [vmem:[#allocation91_spill] sm:$0xff] %v10457_v12  ;;  %12875 = vst [vmem:[#allocation92_spill] sm:$0xff] %v10459_v19 }
 0x1a4   : > { %v10461_v1 = vpop.f32.mrf.mxu0  ;;  %v8541_v20 = vpop.f32.mrf.mxu1 }
 0x1a5   : > { %12876 = vst [vmem:[#allocation93_spill] sm:$0xff] %v10461_v1  ;;  %v10463_v14 = vadd.f32 %v8541_v20, %v8485_v8 }
 0x1a6   : > { %v8491_v63 = vpop.f32.mrf.mxu0  ;;  %v10465_v2 = vpop.f32.mrf.mxu1 }
 0x1a7   : > { %12877 = vst [vmem:[#allocation94_spill] sm:$0xff] %v10463_v14  ;;  %12878 = vst [vmem:[#allocation95_spill] sm:$0xff] %v10465_v2 }
 0x1a8   : > { %v10467_v9 = vpop.f32.mrf.mxu0  ;;  %v8544_v54 = vpop.f32.mrf.mxu1 }
 0x1a9   : > { %12879 = vst [vmem:[#allocation96_spill] sm:$0xff] %v10467_v9  ;;  %v10469_v7 = vadd.f32 %v8544_v54, %v8488_v48 }
 0x1aa   : > { %v8494_v53 = vpop.f32.mrf.mxu0  ;;  %v10471_v59 = vpop.f32.mrf.mxu1 }
 0x1ab   : > { %12880 = vst [vmem:[#allocation97_spill] sm:$0xff] %v10469_v7  ;;  %12881 = vst [vmem:[#allocation98_spill] sm:$0xff] %v10471_v59 }
 0x1ac   : > { %v10473_v61 = vpop.f32.mrf.mxu0  ;;  %v8547_v18 = vpop.f32.mrf.mxu1 }
 0x1ad   : > { %12882 = vst [vmem:[#allocation99_spill] sm:$0xff] %v10473_v61  ;;  %v10475_v12 = vadd.f32 %v8547_v18, %v8491_v63 }
 0x1ae   : > { %v10477_v1 = vpop.f32.mrf.mxu1  ;;  %v8555_v20 = vpop.f32.mrf.mxu0 }
 0x1af   : > { %12883 = vst [vmem:[#allocation100_spill] sm:$0xff] %v10475_v12  ;;  %12884 = vst [vmem:[#allocation101_spill] sm:$0xff] %v10477_v1  ;;  %v2748_v8 = vadd.f32 %v8555_v20, %v9921_v24  ;;  %v1677_v1 = vadd.f32 %v10149_v29, %v10129_v44 }
 0x1b0   : > { %v8550_v14 = vpop.f32.mrf.mxu1  ;;  %v2568_v2 = vpop.f32.mrf.mxu0 }
 0x1b1   : > { %v10480_v19 = vadd.f32 %v8550_v14, %v8494_v53  ;;  %v2747_v54 = vadd.f32 %v2568_v2, %v9927_v27  ;;  %v3393_v63 = vrot.slane %v2748_v8, 7 }
 0x1b2   : > { %v10483_v48 = vpop.f32.mrf.mxu1  ;;  %v8558_v9 = vpop.f32.mrf.mxu0 }
 0x1b3   : > { %12885 = vst [vmem:[#allocation102_spill] sm:$0xff] %v10480_v19  ;;  %12886 = vst [vmem:[#allocation103_spill] sm:$0xff] %v10483_v48  ;;  %v3392_v7 = vrot.slane %v2747_v54, 7  ;;  %v2750_v61 = vadd.f32 %v8558_v9, %v9933_v34 }
 0x1b4   : > { %v2578_v18 = vpop.f32.mrf.mxu0  ;;  %v8611_v12 = vpop.f32.mrf.mxu1 }
 0x1b5   : > { %v2749_v24 = vadd.f32 %v2578_v18, %v9939_v37  ;;  %v3034_v14 = vadd.f32 %v8611_v12, %v10145_v52  ;;  %v3394_v53 = vsel %vm3391_vm2, %v3392_v7, %v3393_v63  ;;  %v3482_v9 = vsel %vm3391_vm2, 0.0, %v3392_v7 }
 0x1b6   : > { %v8561_v27 = vpop.f32.mrf.mxu0  ;;  %v2854_v2 = vpop.f32.mrf.mxu1  ;;  %v3396_v8 = vrot.slane %v2750_v61, 7  ;;  %v1687_v37 = vadd.f32 %v10165_v25, %v10141_v13 }
 0x1b7   : > { %v3395_v20 = vrot.slane %v2749_v24, 7  ;;  %v10491_v19 = vadd.f32 %v3394_v53, %v3034_v14  ;;  %v2752_v54 = vadd.f32 %v8561_v27, %v9945_v43  ;;  %v3033_v34 = vadd.f32 %v2854_v2, %v1677_v1 }
 0x1b8   : > { %v2588_v48 = vpop.f32.mrf.mxu0  ;;  %v8614_v59 = vpop.f32.mrf.mxu1 }
 0x1b9   : > { %v10497_v44 = vadd.f32 %v3482_v9, %v3033_v34  ;;  %v2751_v52 = vadd.f32 %v2588_v48, %v9951_v46  ;;  %v3036_v29 = vadd.f32 %v8614_v59, %v10161_v10  ;;  %v3397_v12 = vsel %vm3391_vm2, %v3395_v20, %v3396_v8 }
 0x1ba   : > { %v8564_v63 = vpop.f32.mrf.mxu0  ;;  %v2864_v18 = vpop.f32.mrf.mxu1  ;;  %v3483_v61 = vsel %vm3391_vm2, 0.0, %v3395_v20  ;;  %v3399_v24 = vrot.slane %v2752_v54, 7  ;;  %v1697_v46 = vadd.f32 %v10183_v17, %v10155_v16 }
 0x1bb   : > { %v3398_v43 = vrot.slane %v2751_v52, 7  ;;  %v2754_v1 = vadd.f32 %v8564_v63, %v9957_v51  ;;  %v3035_v7 = vadd.f32 %v2864_v18, %v1687_v37  ;;  %v10504_v14 = vadd.f32 %v3397_v12, %v3036_v29  ;;  %v12888_v29 = vld [vmem:[#allocation35_spill] sm:$0xff] }
 0x1bc   : > { %v2598_v25 = vpop.f32.mrf.mxu0  ;;  %v8617_v13 = vpop.f32.mrf.mxu1 }
 0x1bd   : > { %v10508_v48 = vadd.f32 %v3483_v61, %v3035_v7  ;;  %v2753_v10 = vadd.f32 %v2598_v25, %v9963_v21  ;;  %v3038_v59 = vadd.f32 %v8617_v13, %v10179_v23  ;;  %v3400_v53 = vsel %vm3391_vm2, %v3398_v43, %v3399_v24  ;;  %v12887_v23 = vld [vmem:[#allocation6_spill] sm:$0xff] }
 0x1be   : > { %v8567_v51 = vpop.f32.mrf.mxu0  ;;  %v2874_v27 = vpop.f32.mrf.mxu1  ;;  %v3484_v34 = vsel %vm3391_vm2, 0.0, %v3398_v43  ;;  %v3402_v9 = vrot.slane %v2754_v1, 7  ;;  %v1707_v21 = vadd.f32 %v10199_v36, %v10173_v45  ;;  %v12889_v43 = vld [vmem:[#allocation7_spill] sm:$0xff] }
 0x1bf   : > { %v3401_v2 = vrot.slane %v2753_v10, 7  ;;  %v2756_v20 = vadd.f32 %v8567_v51, %v9969_v11  ;;  %v3037_v54 = vadd.f32 %v2874_v27, %v1697_v46  ;;  %v10515_v8 = vadd.f32 %v3400_v53, %v3038_v59  ;;  %v12890_v46 = vld [vmem:[#allocation34_spill] sm:$0xff]  ;;  %v12892_v51 = vld [vmem:[#allocation8_spill] sm:$0xff] }
 0x1c0   : > { %v2608_v17 = vpop.f32.mrf.mxu0  ;;  %v8620_v16 = vpop.f32.mrf.mxu1  ;;  %v12891_v10 = vld [vmem:[#allocation38_spill] sm:$0xff] }
 0x1c1   : > { %v10519_v37 = vadd.f32 %v3484_v34, %v3037_v54  ;;  %v2755_v52 = vadd.f32 %v2608_v17, %v12887_v23  ;;  %v3040_v12 = vadd.f32 %v8620_v16, %v12888_v29  ;;  %v3403_v63 = vsel %vm3391_vm2, %v3401_v2, %v3402_v9  ;;  %v12893_v54 = vld [vmem:[#allocation37_spill] sm:$0xff] }
 0x1c2   : > { %v8570_v11 = vpop.f32.mrf.mxu0  ;;  %v2884_v18 = vpop.f32.mrf.mxu1  ;;  %v3485_v24 = vsel %vm3391_vm2, 0.0, %v3401_v2  ;;  %v3405_v25 = vrot.slane %v2756_v20, 7  ;;  %v1717_v59 = vadd.f32 %v12891_v10, %v12890_v46  ;;  %v12894_v2 = vld [vmem:[#allocation9_spill] sm:$0xff] }
 0x1c3   : > { %v3404_v7 = vrot.slane %v2755_v52, 7  ;;  %v2758_v1 = vadd.f32 %v8570_v11, %v12889_v43  ;;  %v3039_v61 = vadd.f32 %v2884_v18, %v1707_v21  ;;  %v10526_v13 = vadd.f32 %v3403_v63, %v3040_v12  ;;  %v12895_v18 = vld [vmem:[#allocation36_spill] sm:$0xff] }
 0x1c4   : > { %v2618_v36 = vpop.f32.mrf.mxu0  ;;  %v8623_v45 = vpop.f32.mrf.mxu1  ;;  %v1727_v43 = vadd.f32 %v10225_v39, %v12895_v18 }
 0x1c5   : > { %v10530_v53 = vadd.f32 %v3485_v24, %v3039_v61  ;;  %v2757_v27 = vadd.f32 %v2618_v36, %v12892_v51  ;;  %v3042_v34 = vadd.f32 %v8623_v45, %v12893_v54  ;;  %v3406_v9 = vsel %vm3391_vm2, %v3404_v7, %v3405_v25  ;;  %v12896_v24 = vld [vmem:[#allocation10_spill] sm:$0xff]  ;;  %v12897_v36 = vld [vmem:[#allocation40_spill] sm:$0xff] }
 0x1c6   : > { %v8573_v17 = vpop.f32.mrf.mxu0  ;;  %v2894_v16 = vpop.f32.mrf.mxu1  ;;  %v3486_v52 = vsel %vm3391_vm2, 0.0, %v3404_v7  ;;  %v3408_v29 = vrot.slane %v2758_v1, 7  ;;  %v12898_v7 = vld [vmem:[#allocation11_spill] sm:$0xff] }
 0x1c7   : > { %v3407_v21 = vrot.slane %v2757_v27, 7  ;;  %v2760_v20 = vadd.f32 %v8573_v17, %v12894_v2  ;;  %v3041_v23 = vadd.f32 %v2894_v16, %v1717_v59  ;;  %v10537_v12 = vadd.f32 %v3406_v9, %v3042_v34  ;;  %v12899_v16 = vld [vmem:[#allocation39_spill] sm:$0xff] }
 0x1c8   : > { %v2628_v63 = vpop.f32.mrf.mxu0  ;;  %v8626_v11 = vpop.f32.mrf.mxu1  ;;  %v1737_v2 = vadd.f32 %v10235_v15, %v12899_v16 }
 0x1c9   : > { %v10541_v61 = vadd.f32 %v3486_v52, %v3041_v23  ;;  %v2759_v25 = vadd.f32 %v2628_v63, %v12896_v24  ;;  %v3044_v45 = vadd.f32 %v8626_v11, %v12897_v36  ;;  %v3409_v46 = vsel %vm3391_vm2, %v3407_v21, %v3408_v29  ;;  %v12900_v52 = vld [vmem:[#allocation12_spill] sm:$0xff]  ;;  %v12901_v24 = vld [vmem:[#allocation13_spill] sm:$0xff] }
 0x1ca   : > { %v8576_v10 = vpop.f32.mrf.mxu0  ;;  %v2904_v59 = vpop.f32.mrf.mxu1  ;;  %v3487_v54 = vsel %vm3391_vm2, 0.0, %v3407_v21  ;;  %v3411_v34 = vrot.slane %v2760_v20, 7  ;;  %v10560_v21 = vld [vmem:[%s12760_s5 + $0x28] sm:$0xff] }
 0x1cb   : > { %v3410_v51 = vrot.slane %v2759_v25, 7  ;;  %v2762_v1 = vadd.f32 %v8576_v10, %v12898_v7  ;;  %v3043_v27 = vadd.f32 %v2904_v59, %v1727_v43  ;;  %v10548_v9 = vadd.f32 %v3409_v46, %v3044_v45  ;;  %8919 = vmatprep.subr.mxu0 %v10560_v21  ;;  %v12902_v59 = vld [vmem:[#allocation41_spill] sm:$0xff] }
 0x1cc   : > { %v2638_v39 = vpop.f32.mrf.mxu0  ;;  %v8629_v17 = vpop.f32.mrf.mxu1  ;;  %v1747_v7 = vadd.f32 %v10245_v47, %v12902_v59 }
 0x1cd   : > { %v10552_v23 = vadd.f32 %v3487_v54, %v3043_v27  ;;  %v2761_v29 = vadd.f32 %v2638_v39, %v12900_v52  ;;  %v3046_v63 = vadd.f32 %v8629_v17, %v10233_v22  ;;  %v3412_v11 = vsel %vm3391_vm2, %v3410_v51, %v3411_v34  ;;  %v12903_v54 = vld [vmem:[#allocation14_spill] sm:$0xff] }
 0x1ce   : > { %v8579_v18 = vpop.f32.mrf.mxu0  ;;  %v2914_v43 = vpop.f32.mrf.mxu1  ;;  %v3488_v15 = vsel %vm3391_vm2, 0.0, %v3410_v51  ;;  %v3414_v45 = vrot.slane %v2762_v1, 7  ;;  %v12904_v51 = vld [vmem:[#allocation15_spill] sm:$0xff] }
 0x1cf   : > { %v3413_v20 = vrot.slane %v2761_v29, 7  ;;  %v2764_v25 = vadd.f32 %v8579_v18, %v12901_v24  ;;  %v3045_v36 = vadd.f32 %v2914_v43, %v1737_v2  ;;  %v10565_v46 = vadd.f32 %v3412_v11, %v3046_v63  ;;  %v12905_v24 = vld [vmem:[#allocation42_spill] sm:$0xff] }
 0x1d0   : > { %v2648_v22 = vpop.f32.mrf.mxu0  ;;  %v8632_v10 = vpop.f32.mrf.mxu1 }
 0x1d1   : > { %v10569_v27 = vadd.f32 %v3488_v15, %v3045_v36  ;;  %v2763_v34 = vadd.f32 %v2648_v22, %v12903_v54  ;;  %v3048_v39 = vadd.f32 %v8632_v10, %v10243_v35  ;;  %v3415_v17 = vsel %vm3391_vm2, %v3413_v20, %v3414_v45  ;;  %v12906_v35 = vld [vmem:[#allocation16_spill] sm:$0xff] }
 0x1d2   : > { %v8582_v16 = vpop.f32.mrf.mxu0  ;;  %v2924_v2 = vpop.f32.mrf.mxu1  ;;  %v3489_v63 = vsel %vm3391_vm2, 0.0, %v3413_v20  ;;  %v3417_v11 = vrot.slane %v2764_v25, 7  ;;  %v1757_v36 = vadd.f32 %v10255_v31, %v12905_v24  ;;  %v12907_v20 = vld [vmem:[#allocation17_spill] sm:$0xff] }
 0x1d3   : > { %v3416_v52 = vrot.slane %v2763_v34, 7  ;;  %v2766_v1 = vadd.f32 %v8582_v16, %v12904_v51  ;;  %v3047_v29 = vadd.f32 %v2924_v2, %v1747_v7  ;;  %v10576_v18 = vadd.f32 %v3415_v17, %v3048_v39 }
 0x1d4   : > { %v2658_v47 = vpop.f32.mrf.mxu0  ;;  %v8635_v43 = vpop.f32.mrf.mxu1  ;;  %v1767_v51 = vadd.f32 %v10265_v28, %v10251_v38 }
 0x1d5   : > { %v10580_v15 = vadd.f32 %v3489_v63, %v3047_v29  ;;  %v2765_v45 = vadd.f32 %v2658_v47, %v12906_v35  ;;  %v3050_v22 = vadd.f32 %v8635_v43, %v10253_v32  ;;  %v3418_v10 = vsel %vm3391_vm2, %v3416_v52, %v3417_v11  ;;  %v12908_v32 = vld [vmem:[#allocation18_spill] sm:$0xff] }
 0x1d6   : > { %v8585_v59 = vpop.f32.mrf.mxu0  ;;  %v2934_v7 = vpop.f32.mrf.mxu1  ;;  %v3490_v39 = vsel %vm3391_vm2, 0.0, %v3416_v52  ;;  %v3420_v17 = vrot.slane %v2766_v1, 7  ;;  %v12909_v52 = vld [vmem:[#allocation19_spill] sm:$0xff] }
 0x1d7   : > { %v3419_v54 = vrot.slane %v2765_v45, 7  ;;  %v2768_v25 = vadd.f32 %v8585_v59, %v12907_v20  ;;  %v3049_v34 = vadd.f32 %v2934_v7, %v1757_v36  ;;  %v10587_v16 = vadd.f32 %v3418_v10, %v3050_v22  ;;  %v12910_v59 = vld [vmem:[#allocation45_spill] sm:$0xff] }
 0x1d8   : > { %v2668_v31 = vpop.f32.mrf.mxu0  ;;  %v8638_v2 = vpop.f32.mrf.mxu1  ;;  %v1777_v7 = vadd.f32 %v12910_v59, %v10261_v26 }
 0x1d9   : > { %v10591_v29 = vadd.f32 %v3490_v39, %v3049_v34  ;;  %v2767_v63 = vadd.f32 %v2668_v31, %v12908_v32  ;;  %v3052_v11 = vadd.f32 %v8638_v2, %v10263_v33  ;;  %v3421_v47 = vsel %vm3391_vm2, %v3419_v54, %v3420_v17  ;;  %v12911_v33 = vld [vmem:[#allocation20_spill] sm:$0xff] }
 0x1da   : > { %v8588_v43 = vpop.f32.mrf.mxu0  ;;  %v2944_v24 = vpop.f32.mrf.mxu1  ;;  %v3491_v45 = vsel %vm3391_vm2, 0.0, %v3419_v54  ;;  %v3423_v22 = vrot.slane %v2768_v25, 7  ;;  %v12912_v39 = vld [vmem:[#allocation44_spill] sm:$0xff]  ;;  %v12913_v54 = vld [vmem:[#allocation21_spill] sm:$0xff] }
 0x1db   : > { %v3422_v36 = vrot.slane %v2767_v63, 7  ;;  %v2770_v1 = vadd.f32 %v8588_v43, %v12909_v52  ;;  %v3051_v35 = vadd.f32 %v2944_v24, %v1767_v51  ;;  %v10598_v10 = vadd.f32 %v3421_v47, %v3052_v11  ;;  %v12914_v52 = vld [vmem:[#allocation43_spill] sm:$0xff] }
 0x1dc   : > { %v2678_v28 = vpop.f32.mrf.mxu0  ;;  %v8641_v38 = vpop.f32.mrf.mxu1 }
 0x1dd   : > { %v10602_v20 = vadd.f32 %v3491_v45, %v3051_v35  ;;  %v2769_v34 = vadd.f32 %v2678_v28, %v12911_v33  ;;  %v3054_v17 = vadd.f32 %v8641_v38, %v12912_v39  ;;  %v3424_v31 = vsel %vm3391_vm2, %v3422_v36, %v3423_v22  ;;  %v12915_v28 = vld [vmem:[#allocation22_spill] sm:$0xff] }
 0x1de   : > { %v8591_v2 = vpop.f32.mrf.mxu0  ;;  %v2954_v51 = vpop.f32.mrf.mxu1  ;;  %v3492_v11 = vsel %vm3391_vm2, 0.0, %v3422_v36  ;;  %v3426_v47 = vrot.slane %v2770_v1, 7  ;;  %v1787_v35 = vadd.f32 %v10288_v30, %v12914_v52  ;;  %v12916_v36 = vld [vmem:[#allocation23_spill] sm:$0xff] }
 0x1df   : > { %v3425_v32 = vrot.slane %v2769_v34, 7  ;;  %v2772_v25 = vadd.f32 %v8591_v2, %v12913_v54  ;;  %v3053_v63 = vadd.f32 %v2954_v51, %v1777_v7  ;;  %v10609_v43 = vadd.f32 %v3424_v31, %v3054_v17  ;;  %v12917_v54 = vld [vmem:[#allocation46_spill] sm:$0xff] }
 0x1e0   : > { %v2688_v26 = vpop.f32.mrf.mxu0  ;;  %v8644_v24 = vpop.f32.mrf.mxu1 }
 0x1e1   : > { %v10613_v45 = vadd.f32 %v3492_v11, %v3053_v63  ;;  %v2771_v22 = vadd.f32 %v2688_v26, %v12915_v28  ;;  %v3056_v38 = vadd.f32 %v8644_v24, %v10286_v42  ;;  %v3427_v59 = vsel %vm3391_vm2, %v3425_v32, %v3426_v47  ;;  %v12918_v42 = vld [vmem:[#allocation24_spill] sm:$0xff] }
 0x1e2   : > { %v8594_v33 = vpop.f32.mrf.mxu0  ;;  %v2964_v7 = vpop.f32.mrf.mxu1  ;;  %v3493_v17 = vsel %vm3391_vm2, 0.0, %v3425_v32  ;;  %v3429_v31 = vrot.slane %v2772_v25, 7  ;;  %v1797_v63 = vadd.f32 %v10298_v55, %v12917_v54  ;;  %v12919_v32 = vld [vmem:[#allocation25_spill] sm:$0xff] }
 0x1e3   : > { %v3428_v34 = vrot.slane %v2771_v22, 7  ;;  %v2774_v1 = vadd.f32 %v8594_v33, %v12916_v36  ;;  %v3055_v39 = vadd.f32 %v2964_v7, %v1787_v35  ;;  %v10620_v2 = vadd.f32 %v3427_v59, %v3056_v38  ;;  %v12920_v36 = vld [vmem:[#allocation47_spill] sm:$0xff] }
 0x1e4   : > { %v2698_v30 = vpop.f32.mrf.mxu0  ;;  %v8647_v51 = vpop.f32.mrf.mxu1 }
 0x1e5   : > { %v10624_v11 = vadd.f32 %v3493_v17, %v3055_v39  ;;  %v2773_v47 = vadd.f32 %v2698_v30, %v12918_v42  ;;  %v3058_v26 = vadd.f32 %v8647_v51, %v10296_v49  ;;  %v3430_v24 = vsel %vm3391_vm2, %v3428_v34, %v3429_v31  ;;  %v12921_v49 = vld [vmem:[#allocation26_spill] sm:$0xff] }
 0x1e6   : > { %v8597_v52 = vpop.f32.mrf.mxu0  ;;  %v2974_v35 = vpop.f32.mrf.mxu1  ;;  %v3494_v38 = vsel %vm3391_vm2, 0.0, %v3428_v34  ;;  %v3432_v59 = vrot.slane %v2774_v1, 7  ;;  %v1807_v39 = vadd.f32 %v10308_v56, %v12920_v36  ;;  %v12922_v34 = vld [vmem:[#allocation27_spill] sm:$0xff] }
 0x1e7   : > { %v3431_v28 = vrot.slane %v2773_v47, 7  ;;  %v2776_v25 = vadd.f32 %v8597_v52, %v12919_v32  ;;  %v3057_v22 = vadd.f32 %v2974_v35, %v1797_v63  ;;  %v10631_v33 = vadd.f32 %v3430_v24, %v3058_v26  ;;  %v12923_v32 = vld [vmem:[#allocation48_spill] sm:$0xff] }
 0x1e8   : > { %v2708_v55 = vpop.f32.mrf.mxu0  ;;  %v8650_v7 = vpop.f32.mrf.mxu1 }
 0x1e9   : > { %v10635_v17 = vadd.f32 %v3494_v38, %v3057_v22  ;;  %v2775_v31 = vadd.f32 %v2708_v55, %v12921_v49  ;;  %v3060_v30 = vadd.f32 %v8650_v7, %v10306_v57  ;;  %v3433_v51 = vsel %vm3391_vm2, %v3431_v28, %v3432_v59  ;;  %v12924_v57 = vld [vmem:[#allocation28_spill] sm:$0xff]  ;;  %v12925_v49 = vld [vmem:[#allocation29_spill] sm:$0xff] }
 0x1ea   : > { %v8600_v54 = vpop.f32.mrf.mxu0  ;;  %v2984_v63 = vpop.f32.mrf.mxu1  ;;  %v3495_v26 = vsel %vm3391_vm2, 0.0, %v3431_v28  ;;  %v3435_v24 = vrot.slane %v2776_v25, 7  ;;  %v1817_v22 = vadd.f32 %v10318_v58, %v12923_v32  ;;  %v12926_v28 = vld [vmem:[#allocation31_spill] sm:$0xff] }
 0x1eb   : > { %v3434_v42 = vrot.slane %v2775_v31, 7  ;;  %v2778_v1 = vadd.f32 %v8600_v54, %v12922_v34  ;;  %v3059_v47 = vadd.f32 %v2984_v63, %v1807_v39  ;;  %v10642_v52 = vadd.f32 %v3433_v51, %v3060_v30  ;;  %v12927_v30 = vld [vmem:[#allocation30_spill] sm:$0xff] }
 0x1ec   : > { %v2718_v56 = vpop.f32.mrf.mxu0  ;;  %v8653_v35 = vpop.f32.mrf.mxu1  ;;  %v1339_v25 = vadd.f32 %v12926_v28, %v12925_v49 }
 0x1ed   : > { %v10646_v38 = vadd.f32 %v3495_v26, %v3059_v47  ;;  %v2777_v59 = vadd.f32 %v2718_v56, %v12924_v57  ;;  %v3062_v55 = vadd.f32 %v8653_v35, %v10316_v40  ;;  %v3436_v7 = vsel %vm3391_vm2, %v3434_v42, %v3435_v24  ;;  %v12928_v56 = vld [vmem:[#allocation4_spill] sm:$0xff] }
 0x1ee   : > { %v8603_v36 = vpop.f32.mrf.mxu0  ;;  %v2994_v39 = vpop.f32.mrf.mxu1  ;;  %v3496_v63 = vsel %vm3391_vm2, 0.0, %v3434_v42  ;;  %v3438_v58 = vrot.slane %v2778_v1, 7  ;;  %v12929_v40 = vld [vmem:[#allocation32_spill] sm:$0xff]  ;;  %v1827_v24 = vadd.f32 %v10328_v50, %v10314_v41 }
 0x1ef   : > { %v3437_v31 = vrot.slane %v2777_v59, 7  ;;  %v2780_v51 = vadd.f32 %v8603_v36, %v12927_v30  ;;  %v3061_v54 = vadd.f32 %v2994_v39, %v1817_v22  ;;  %v10655_v34 = vadd.f32 %v3436_v7, %v3062_v55  ;;  %v12930_v55 = vld [vmem:[#allocation5_spill] sm:$0xff] }
 0x1f0   : > { %v2728_v47 = vpop.f32.mrf.mxu0  ;;  %v8656_v26 = vpop.f32.mrf.mxu1  ;;  %v1354_v35 = vadd.f32 %v12929_v40, %v12928_v56  ;;  %v12931_v7 = vld [vmem:[#allocation33_spill] sm:$0xff]  ;;  %v2175_v40 = vadd.f32 %v10358_v4, %v10344_v0  ;;  %v10699_v0 = vld [vmem:[%s12759_s4] ss:$0 sm:$0xff] }
 0x1f1   : > { %v10661_v32 = vadd.f32 %v3496_v63, %v3061_v54  ;;  %v10663_v57 = vadd.f32 %v2728_v47, %v1339_v25  ;;  %v3064_v59 = vadd.f32 %v8656_v26, %v10326_v60  ;;  %v3439_v22 = vsel %vm3391_vm2, %v3437_v31, %v3438_v58 }
 0x1f2   : > { %v8606_v42 = vpop.f32.mrf.mxu0  ;;  %v3004_v1 = vpop.f32.mrf.mxu1  ;;  %v1349_v36 = vadd.f32 %v12931_v7, %v12930_v55  ;;  %v3497_v30 = vsel %vm3391_vm2, 0.0, %v3437_v31  ;;  %v3441_v50 = vrot.slane %v2780_v51, 7 }
 0x1f3   : > { %v3440_v39 = vrot.slane %v10663_v57, 7  ;;  %v2782_v49 = vadd.f32 %v8606_v42, %v1354_v35  ;;  %v3063_v28 = vadd.f32 %v3004_v1, %v1827_v24  ;;  %v10671_v41 = vadd.f32 %v3439_v22, %v3064_v59 }
 0x1f4   : > { %v2738_v25 = vpop.f32.mrf.mxu0  ;;  %v8659_v54 = vpop.f32.mrf.mxu1 }
 0x1f5   : > { %v10673_v63 = vadd.f32 %v3497_v30, %v3063_v28  ;;  %v10675_v60 = vadd.f32 %v2738_v25, %v1349_v36  ;;  %v3066_v58 = vadd.f32 %v8659_v54, %v10336_v62  ;;  %v3442_v47 = vsel %vm3391_vm2, %v3440_v39, %v3441_v50  ;;  %v12932_v36 = vld [vmem:[#allocation53_spill] sm:$0xff]  ;;  %v12933_v28 = vld [vmem:[#allocation55_spill] sm:$0xff] }
 0x1f6   : > { %v10681_v26 = vpop.f32.mrf.mxu1  ;;  %v8667_v56 = vpop.f32.mrf.mxu0  ;;  %v3444_v35 = vrot.slane %v2782_v49, 7 }
 0x1f7   : > { %v3443_v31 = vrot.slane %v10675_v60, 7  ;;  %v3320_v51 = vadd.f32 %v8667_v56, %v10356_v3  ;;  %v10687_v24 = vadd.f32 %v3442_v47, %v3066_v58  ;;  %v2185_v3 = vadd.f32 %v10368_v6, %v12932_v36  ;;  %v12934_v47 = vld [vmem:[#allocation54_spill] sm:$0xff] }
 0x1f8   : > { %v8662_v59 = vpop.f32.mrf.mxu1  ;;  %v3140_v62 = vpop.f32.mrf.mxu0  ;;  %v12935_v56 = vld [vmem:[#allocation58_spill] sm:$0xff] }
 0x1f9   : > { %v3574_v22 = vrot.slane %v3320_v51, 1  ;;  %v3068_v42 = vadd.f32 %v8662_v59, %v10346_v5  ;;  %v3445_v1 = vsel %vm3391_vm2, %v3443_v31, %v3444_v35  ;;  %v3319_v55 = vadd.f32 %v3140_v62, %v2175_v40 }
 0x1fa   : > { %v8670_v7 = vpop.f32.mrf.mxu0  ;;  %v2195_v6 = vadd.f32 %v12935_v56, %v12934_v47  ;;  %v12939_v47 = vmov 0.0  }
 0x1fb   : > { %v3663_v4 = vsel %vm3572_vm3, %v3574_v22, 0.0  ;;  %v10701_v49 = vadd.f32 %v3445_v1, %v3068_v42  ;;  %v3322_v5 = vadd.f32 %v8670_v7, %v12933_v28  ;;  %v3573_v50 = vrot.slane %v3319_v55, 1  ;;  %v12936_v1 = vld [vmem:[#allocation57_spill] sm:$0xff] }
 0x1fc   : > { %v3682_v30 = vadd.f32 %v3663_v4, %v10491_v19  ;;  %v3150_v25 = vpop.f32.mrf.mxu0 }
 0x1fd   : > { %v3577_v54 = vrot.slane %v3322_v5, 1  ;;  %v3321_v58 = vadd.f32 %v3150_v25, %v2185_v3  ;;  %v3575_v40 = vsel %vm3572_vm3, %v3573_v50, %v3574_v22  ;;  %v12938_v22 = vld [vmem:[#allocation61_spill] sm:$0xff] }
 0x1fe   : > { %v3725_v51 = vadd.f32 %v10699_v0, %v3682_v30  ;;  %v8673_v35 = vpop.f32.mrf.mxu0  ;;  %v3681_v59 = vadd.f32 %v3575_v40, %v10497_v44  ;;  %v12937_v30 = vld [vmem:[#allocation56_spill] sm:$0xff] }
 0x1ff   : > { %v3664_v62 = vsel %vm3572_vm3, %v3577_v54, 0.0  ;;  %v3576_v42 = vrot.slane %v3321_v58, 1  ;;  %v3324_v19 = vadd.f32 %v8673_v35, %v12936_v1  ;;  %v2205_v50 = vadd.f32 %v12938_v22, %v12937_v30 }
 0x200   : > { %v3761_v55 = vmax.f32 %v3725_v51, 0.0  ;;  %v3684_v7 = vadd.f32 %v3664_v62, %v10504_v14  ;;  %v3160_v36 = vpop.f32.mrf.mxu0  ;;  %v3724_v3 = vadd.f32 %v10699_v0, %v3681_v59 }
 0x201   : > { %v3578_v4 = vsel %vm3572_vm3, %v3576_v42, %v3577_v54  ;;  %v3580_v28 = vrot.slane %v3324_v19, 1  ;;  %v3323_v5 = vadd.f32 %v3160_v36, %v2195_v6  ;;  %v12940_v54 = vld [vmem:[#allocation60_spill] sm:$0xff] }
 0x202   : > { %3798 = vst.msk [vmem:[#allocation3 + $0x8] sm:$0xff] %vm3796_vm4, %v3761_v55  ;;  %v3727_v44 = vadd.f32 %v10699_v0, %v3684_v7  ;;  %v3683_v25 = vadd.f32 %v3578_v4, %v10508_v48  ;;  %v8676_v58 = vpop.f32.mrf.mxu0  ;;  %v3760_v14 = vmax.f32 %v3724_v3, 0.0  ;;  %v12941_v3 = vld [vmem:[#allocation59_spill] sm:$0xff] }
 0x203   : > { %3837 = vst.msk [vmem:[#allocation3 + $0x8] sm:$0xff] %vm3796_vm4, %v12939_v47  ;;  %v3665_v56 = vsel %vm3572_vm3, %v3580_v28, 0.0  ;;  %v3579_v51 = vrot.slane %v3323_v5, 1  ;;  %v3326_v40 = vadd.f32 %v8676_v58, %v12940_v54 }
 0x204   : > { %v3763_v6 = vmax.f32 %v3727_v44, 0.0  ;;  %v3726_v35 = vadd.f32 %v10699_v0, %v3683_v25  ;;  %v3686_v59 = vadd.f32 %v3665_v56, %v10515_v8  ;;  %v3170_v62 = vpop.f32.mrf.mxu0  ;;  %3797 = vst.msk [vmem:[#allocation3] sm:$0xff] %vm3796_vm4, %v3760_v14  ;;  %v12942_v8 = vld [vmem:[#allocation64_spill] sm:$0xff] }
 0x205   : > { %v3581_v48 = vsel %vm3572_vm3, %v3579_v51, %v3580_v28  ;;  %v3583_v42 = vrot.slane %v3326_v40, 1  ;;  %v3325_v1 = vadd.f32 %v3170_v62, %v2205_v50  ;;  %3836 = vst.msk [vmem:[#allocation3] sm:$0xff] %vm3796_vm4, %v12939_v47  ;;  %v2215_v4 = vadd.f32 %v12942_v8, %v12941_v3  ;;  %v12943_v28 = vld [vmem:[#allocation63_spill] sm:$0xff] }
 0x206   : > { %3800 = vst.msk [vmem:[#allocation3 + $0x18] sm:$0xff] %vm3796_vm4, %v3763_v6  ;;  %v3762_v19 = vmax.f32 %v3726_v35, 0.0  ;;  %v3729_v55 = vadd.f32 %v10699_v0, %v3686_v59  ;;  %v3685_v7 = vadd.f32 %v3581_v48, %v10519_v37  ;;  %v8679_v36 = vpop.f32.mrf.mxu0  ;;  %v12944_v35 = vld [vmem:[#allocation62_spill] sm:$0xff]  ;;  %v12945_v59 = vld [vmem:[#allocation67_spill] sm:$0xff] }
 0x207   : > { %v3666_v5 = vsel %vm3572_vm3, %v3583_v42, 0.0  ;;  %v3582_v30 = vrot.slane %v3325_v1, 1  ;;  %v3328_v22 = vadd.f32 %v8679_v36, %v12943_v28  ;;  %v2225_v62 = vadd.f32 %v12945_v59, %v12944_v35  ;;  %v10778_v35 = vld [vmem:[%s12760_s5 + $0x30] sm:$0xff] }
 0x208   : > { %3799 = vst.msk [vmem:[#allocation3 + $0x10] sm:$0xff] %vm3796_vm4, %v3762_v19  ;;  %v3765_v50 = vmax.f32 %v3729_v55, 0.0  ;;  %v3728_v44 = vadd.f32 %v10699_v0, %v3685_v7  ;;  %v3688_v25 = vadd.f32 %v3666_v5, %v10526_v13  ;;  %v3180_v58 = vpop.f32.mrf.mxu0  ;;  %v12946_v13 = vld [vmem:[#allocation66_spill] sm:$0xff] }
 0x209   : > { %v3584_v14 = vsel %vm3572_vm3, %v3582_v30, %v3583_v42  ;;  %v3586_v37 = vrot.slane %v3328_v22, 1  ;;  %v3327_v56 = vadd.f32 %v3180_v58, %v2215_v4  ;;  %v12947_v22 = vld [vmem:[#allocation65_spill] sm:$0xff] }
 0x20a   : > { %3802 = vst.msk [vmem:[#allocation3 + $0x28] sm:$0xff] %vm3796_vm4, %v3765_v50  ;;  %v3764_v51 = vmax.f32 %v3728_v44, 0.0  ;;  %v3731_v54 = vadd.f32 %v10699_v0, %v3688_v25  ;;  %v3687_v40 = vadd.f32 %v3584_v14, %v10530_v53  ;;  %v8682_v6 = vpop.f32.mrf.mxu0  ;;  %v12948_v50 = vld [vmem:[#allocation70_spill] sm:$0xff] }
 0x20b   : > { %v3667_v48 = vsel %vm3572_vm3, %v3586_v37, 0.0  ;;  %v3585_v1 = vrot.slane %v3327_v56, 1  ;;  %v3330_v19 = vadd.f32 %v8682_v6, %v12946_v13  ;;  %v2235_v44 = vadd.f32 %v12948_v50, %v12947_v22  ;;  %v10773_v6 = vld [vmem:[%s12760_s5 + $0x8] sm:$0xff] }
 0x20c   : > { %3801 = vst.msk [vmem:[#allocation3 + $0x20] sm:$0xff] %vm3796_vm4, %v3764_v51  ;;  %v3767_v42 = vmax.f32 %v3731_v54, 0.0  ;;  %v3730_v55 = vadd.f32 %v10699_v0, %v3687_v40  ;;  %v3690_v7 = vadd.f32 %v3667_v48, %v10537_v12  ;;  %v3190_v36 = vpop.f32.mrf.mxu0  ;;  %v12949_v12 = vld [vmem:[#allocation69_spill] sm:$0xff] }
 0x20d   : > { %v3587_v3 = vsel %vm3572_vm3, %v3585_v1, %v3586_v37  ;;  %v3589_v53 = vrot.slane %v3330_v19, 1  ;;  %v3329_v8 = vadd.f32 %v3190_v36, %v2225_v62  ;;  %v12950_v19 = vld [vmem:[#allocation87_spill] sm:$0xff] }
 0x20e   : > { %3804 = vst.msk [vmem:[#allocation3 + $0x38] sm:$0xff] %vm3796_vm4, %v3767_v42  ;;  %v3766_v4 = vmax.f32 %v3730_v55, 0.0  ;;  %v3733_v5 = vadd.f32 %v10699_v0, %v3690_v7  ;;  %v3689_v30 = vadd.f32 %v3587_v3, %v10541_v61  ;;  %v8685_v28 = vpop.f32.mrf.mxu0  ;;  %v10768_v61 = vld [vmem:[#allocation3 + $0x18] sm:$0xff]  ;;  %v12951_v55 = vld [vmem:[#allocation68_spill] sm:$0xff]  ;;  %v12952_v7 = vld [vmem:[#allocation73_spill] sm:$0xff] }
 0x20f   : > { %v3668_v25 = vsel %vm3572_vm3, %v3589_v53, 0.0  ;;  %v3588_v58 = vrot.slane %v3329_v8, 1  ;;  %v3332_v14 = vadd.f32 %v8685_v28, %v12949_v12  ;;  %v10759_v56 = vld [vmem:[#allocation3 + $0x10] sm:$0xff]  ;;  %v2245_v36 = vadd.f32 %v12952_v7, %v12951_v55  ;;  %v12953_v8 = vld [vmem:[#allocation72_spill] sm:$0xff] }
 0x210   : > { %3803 = vst.msk [vmem:[#allocation3 + $0x30] sm:$0xff] %vm3796_vm4, %v3766_v4  ;;  %v3769_v37 = vmax.f32 %v3733_v5, 0.0  ;;  %v3732_v51 = vadd.f32 %v10699_v0, %v3689_v30  ;;  %v3692_v54 = vadd.f32 %v3668_v25, %v10548_v9  ;;  %v3200_v40 = vpop.f32.mrf.mxu0  ;;  %8721 = vmatprep.mubr.msk.f32.mxu1 %vm3796_vm4, %v10759_v56  ;;  %8821 = vmatprep.mubr.msk.f32.mxu0 %vm3796_vm4, %v10759_v56 }
 0x211   : > { %v3590_v9 = vsel %vm3572_vm3, %v3588_v58, %v3589_v53  ;;  %v3592_v59 = vrot.slane %v3332_v14, 1  ;;  %v3331_v62 = vadd.f32 %v3200_v40, %v2235_v44  ;;  %8722 = vmatmul.mubr.msk.f32.vlgmr.msra.gmra.mxu1 %vm3796_vm4, %v10768_v61  ;;  %8822 = vmatmul.mubr.msk.f32.vlgmr.msra.gmra.mxu0 %vm3796_vm4, %v10768_v61  ;;  %v10805_v22 = vld [vmem:[#allocation3 + $0x28] sm:$0xff] }
 0x212   : > { %3806 = vst.msk [vmem:[#allocation3 + $0x48] sm:$0xff] %vm3796_vm4, %v3769_v37  ;;  %v3768_v48 = vmax.f32 %v3732_v51, 0.0  ;;  %v3735_v1 = vadd.f32 %v10699_v0, %v3692_v54  ;;  %v3691_v13 = vadd.f32 %v3590_v9, %v10552_v23  ;;  %8770 = vmatpush3.msra.mxu1 %v12950_v19  ;;  %v8688_v42 = vpop.f32.mrf.mxu0  ;;  %8920 = vmatpush3.msra.mxu0 %v10560_v21  ;;  %v12954_v37 = vld [vmem:[#allocation71_spill] sm:$0xff]  ;;  %v12955_v51 = vld [vmem:[#allocation76_spill] sm:$0xff] }
 0x213   : > { %v3669_v3 = vsel %vm3572_vm3, %v3592_v59, 0.0  ;;  %v3591_v53 = vrot.slane %v3331_v62, 1  ;;  %v3334_v4 = vadd.f32 %v8688_v42, %v12953_v8  ;;  %v10794_v5 = vld [vmem:[#allocation3 + $0x20] sm:$0xff]  ;;  %8869 = vmatprep.subr.mxu1 %v10773_v6  ;;  %9019 = vmatprep.subr.mxu0 %v10778_v35  ;;  %v2255_v54 = vadd.f32 %v12955_v51, %v12954_v37 }
 0x214   : > { %3805 = vst.msk [vmem:[#allocation3 + $0x40] sm:$0xff] %vm3796_vm4, %v3768_v48  ;;  %v3771_v23 = vmax.f32 %v3735_v1, 0.0  ;;  %v3734_v30 = vadd.f32 %v10699_v0, %v3691_v13  ;;  %v3694_v21 = vadd.f32 %v3669_v3, %v10565_v46  ;;  %v3210_v28 = vpop.f32.mrf.mxu0  ;;  %8724 = vmatprep.mubr.msk.f32.mxu1 %vm3796_vm4, %v10794_v5  ;;  %8824 = vmatprep.mubr.msk.f32.mxu0 %vm3796_vm4, %v10794_v5 }
 0x215   : > { %v3593_v50 = vsel %vm3572_vm3, %v3591_v53, %v3592_v59  ;;  %v3595_v44 = vrot.slane %v3334_v4, 1  ;;  %v3333_v25 = vadd.f32 %v3210_v28, %v2245_v36  ;;  %8725 = vmatmul.mubr.msk.f32.gmra.mxu1 %vm3796_vm4, %v10805_v22  ;;  %8825 = vmatmul.mubr.msk.f32.gmra.mxu0 %vm3796_vm4, %v10805_v22  ;;  %v12956_v59 = vld [vmem:[#allocation75_spill] sm:$0xff]  ;;  %v12957_v4 = vld [vmem:[#allocation74_spill] sm:$0xff] }
 0x216   : > { %3808 = vst.msk [vmem:[#allocation3 + $0x58] sm:$0xff] %vm3796_vm4, %v3771_v23  ;;  %v3770_v46 = vmax.f32 %v3734_v30, 0.0  ;;  %v3737_v58 = vadd.f32 %v10699_v0, %v3694_v21  ;;  %v3693_v12 = vadd.f32 %v3593_v50, %v10569_v27  ;;  %v8691_v14 = vpop.f32.mrf.mxu0  ;;  %v10828_v27 = vld [vmem:[#allocation3 + $0x38] sm:$0xff]  ;;  %v12959_v50 = vld [vmem:[#allocation78_spill] sm:$0xff] }
 0x217   : > { %v3670_v40 = vsel %vm3572_vm3, %v3595_v44, 0.0  ;;  %v3594_v9 = vrot.slane %v3333_v25, 1  ;;  %v3336_v62 = vadd.f32 %v8691_v14, %v12956_v59  ;;  %v10819_v48 = vld [vmem:[#allocation3 + $0x30] sm:$0xff]  ;;  %v12958_v23 = vld [vmem:[#allocation79_spill] sm:$0xff] }
 0x218   : > { %3807 = vst.msk [vmem:[#allocation3 + $0x50] sm:$0xff] %vm3796_vm4, %v3770_v46  ;;  %v3773_v1 = vmax.f32 %v3737_v58, 0.0  ;;  %v3736_v13 = vadd.f32 %v10699_v0, %v3693_v12  ;;  %v3696_v19 = vadd.f32 %v3670_v40, %v10576_v18  ;;  %v3220_v42 = vpop.f32.mrf.mxu0  ;;  %8727 = vmatprep.mubr.msk.f32.mxu1 %vm3796_vm4, %v10819_v48  ;;  %8827 = vmatprep.mubr.msk.f32.mxu0 %vm3796_vm4, %v10819_v48 }
 0x219   : > { %v3596_v55 = vsel %vm3572_vm3, %v3594_v9, %v3595_v44  ;;  %v3598_v7 = vrot.slane %v3336_v62, 1  ;;  %v3335_v36 = vadd.f32 %v3220_v42, %v2255_v54  ;;  %8728 = vmatmul.mubr.msk.f32.gmra.mxu1 %vm3796_vm4, %v10828_v27  ;;  %8828 = vmatmul.mubr.msk.f32.gmra.mxu0 %vm3796_vm4, %v10828_v27  ;;  %v2265_v30 = vadd.f32 %v12958_v23, %v12957_v4  ;;  %v12960_v62 = vld [vmem:[#allocation77_spill] sm:$0xff] }
 0x21a   : > { %3810 = vst.msk [vmem:[#allocation3 + $0x68] sm:$0xff] %vm3796_vm4, %v3773_v1  ;;  %v3772_v18 = vmax.f32 %v3736_v13, 0.0  ;;  %v3739_v3 = vadd.f32 %v10699_v0, %v3696_v19  ;;  %v3695_v53 = vadd.f32 %v3596_v55, %v10580_v15  ;;  %v8694_v8 = vpop.f32.mrf.mxu0  ;;  %v10851_v15 = vld [vmem:[#allocation3 + $0x48] sm:$0xff]  ;;  %v12961_v1 = vld [vmem:[#allocation82_spill] sm:$0xff] }
 0x21b   : > { %v3671_v21 = vsel %vm3572_vm3, %v3598_v7, 0.0  ;;  %v3597_v28 = vrot.slane %v3335_v36, 1  ;;  %v3338_v44 = vadd.f32 %v8694_v8, %v12959_v50  ;;  %v10842_v25 = vld [vmem:[#allocation3 + $0x40] sm:$0xff]  ;;  %v2275_v13 = vadd.f32 %v12961_v1, %v12960_v62  ;;  %v12962_v55 = vld [vmem:[#allocation81_spill] sm:$0xff] }
 0x21c   : > { %3809 = vst.msk [vmem:[#allocation3 + $0x60] sm:$0xff] %vm3796_vm4, %v3772_v18  ;;  %v3775_v46 = vmax.f32 %v3739_v3, 0.0  ;;  %v3738_v58 = vadd.f32 %v10699_v0, %v3695_v53  ;;  %v3698_v12 = vadd.f32 %v3671_v21, %v10587_v16  ;;  %v3230_v14 = vpop.f32.mrf.mxu0  ;;  %8730 = vmatprep.mubr.msk.f32.mxu1 %vm3796_vm4, %v10842_v25  ;;  %8830 = vmatprep.mubr.msk.f32.mxu0 %vm3796_vm4, %v10842_v25 }
 0x21d   : > { %v3599_v37 = vsel %vm3572_vm3, %v3597_v28, %v3598_v7  ;;  %v3601_v51 = vrot.slane %v3338_v44, 1  ;;  %v3337_v54 = vadd.f32 %v3230_v14, %v2265_v30  ;;  %8731 = vmatmul.mubr.msk.f32.gmra.mxu1 %vm3796_vm4, %v10851_v15  ;;  %8831 = vmatmul.mubr.msk.f32.gmra.mxu0 %vm3796_vm4, %v10851_v15  ;;  %v12963_v44 = vld [vmem:[#allocation80_spill] sm:$0xff] }
 0x21e   : > { %3812 = vst.msk [vmem:[#allocation3 + $0x78] sm:$0xff] %vm3796_vm4, %v3775_v46  ;;  %v3774_v16 = vmax.f32 %v3738_v58, 0.0  ;;  %v3741_v40 = vadd.f32 %v10699_v0, %v3698_v12  ;;  %v3697_v9 = vadd.f32 %v3599_v37, %v10591_v29  ;;  %v8697_v59 = vpop.f32.mrf.mxu0  ;;  %v10874_v29 = vld [vmem:[#allocation3 + $0x58] sm:$0xff]  ;;  %v12964_v46 = vld [vmem:[#allocation85_spill] sm:$0xff]  ;;  %v12965_v37 = vld [vmem:[#allocation84_spill] sm:$0xff] }
 0x21f   : > { %v3672_v19 = vsel %vm3572_vm3, %v3601_v51, 0.0  ;;  %v3600_v42 = vrot.slane %v3337_v54, 1  ;;  %v3340_v7 = vadd.f32 %v8697_v59, %v12962_v55  ;;  %v10865_v36 = vld [vmem:[#allocation3 + $0x50] sm:$0xff]  ;;  %v2285_v58 = vadd.f32 %v12964_v46, %v12963_v44 }
 0x220   : > { %3811 = vst.msk [vmem:[#allocation3 + $0x70] sm:$0xff] %vm3796_vm4, %v3774_v16  ;;  %v3777_v18 = vmax.f32 %v3741_v40, 0.0  ;;  %v3740_v3 = vadd.f32 %v10699_v0, %v3697_v9  ;;  %v3700_v53 = vadd.f32 %v3672_v19, %v10598_v10  ;;  %v3240_v8 = vpop.f32.mrf.mxu0  ;;  %8733 = vmatprep.mubr.msk.f32.mxu1 %vm3796_vm4, %v10865_v36  ;;  %8833 = vmatprep.mubr.msk.f32.mxu0 %vm3796_vm4, %v10865_v36 }
 0x221   : > { %v3602_v4 = vsel %vm3572_vm3, %v3600_v42, %v3601_v51  ;;  %v3604_v23 = vrot.slane %v3340_v7, 1  ;;  %v3339_v30 = vadd.f32 %v3240_v8, %v2275_v13  ;;  %8734 = vmatmul.mubr.msk.f32.gmra.mxu1 %vm3796_vm4, %v10874_v29  ;;  %8834 = vmatmul.mubr.msk.f32.gmra.mxu0 %vm3796_vm4, %v10874_v29  ;;  %v12966_v7 = vld [vmem:[#allocation83_spill] sm:$0xff] }
 0x222   : > { %3814 = vst.msk [vmem:[#allocation3 + $0x88] sm:$0xff] %vm3796_vm4, %v3777_v18  ;;  %v3776_v10 = vmax.f32 %v3740_v3, 0.0  ;;  %v3743_v21 = vadd.f32 %v10699_v0, %v3700_v53  ;;  %v3699_v28 = vadd.f32 %v3602_v4, %v10602_v20  ;;  %v8700_v50 = vpop.f32.mrf.mxu0  ;;  %v10897_v20 = vld [vmem:[#allocation3 + $0x68] sm:$0xff]  ;;  %v12968_v4 = vld [vmem:[#allocation88_spill] sm:$0xff] }
 0x223   : > { %v3673_v12 = vsel %vm3572_vm3, %v3604_v23, 0.0  ;;  %v3603_v14 = vrot.slane %v3339_v30, 1  ;;  %v3342_v51 = vadd.f32 %v8700_v50, %v12965_v37  ;;  %v10888_v54 = vld [vmem:[#allocation3 + $0x60] sm:$0xff]  ;;  %v12967_v18 = vld [vmem:[#allocation89_spill] sm:$0xff] }
 0x224   : > { %3813 = vst.msk [vmem:[#allocation3 + $0x80] sm:$0xff] %vm3796_vm4, %v3776_v10  ;;  %v3779_v16 = vmax.f32 %v3743_v21, 0.0  ;;  %v3742_v40 = vadd.f32 %v10699_v0, %v3699_v28  ;;  %v3702_v9 = vadd.f32 %v3673_v12, %v10609_v43  ;;  %v3250_v59 = vpop.f32.mrf.mxu0  ;;  %8736 = vmatprep.mubr.msk.f32.mxu1 %vm3796_vm4, %v10888_v54  ;;  %8836 = vmatprep.mubr.msk.f32.mxu0 %vm3796_vm4, %v10888_v54 }
 0x225   : > { %v3605_v62 = vsel %vm3572_vm3, %v3603_v14, %v3604_v23  ;;  %v3607_v1 = vrot.slane %v3342_v51, 1  ;;  %v3341_v13 = vadd.f32 %v3250_v59, %v2285_v58  ;;  %8737 = vmatmul.mubr.msk.f32.gmra.mxu1 %vm3796_vm4, %v10897_v20  ;;  %8837 = vmatmul.mubr.msk.f32.gmra.mxu0 %vm3796_vm4, %v10897_v20  ;;  %v2295_v3 = vadd.f32 %v12967_v18, %v12966_v7  ;;  %v12969_v51 = vld [vmem:[#allocation86_spill] sm:$0xff] }
 0x226   : > { %3816 = vst.msk [vmem:[#allocation3 + $0x98] sm:$0xff] %vm3796_vm4, %v3779_v16  ;;  %v3778_v43 = vmax.f32 %v3742_v40, 0.0  ;;  %v3745_v19 = vadd.f32 %v10699_v0, %v3702_v9  ;;  %v3701_v42 = vadd.f32 %v3605_v62, %v10613_v45  ;;  %v8703_v55 = vpop.f32.mrf.mxu0  ;;  %v10920_v45 = vld [vmem:[#allocation3 + $0x78] sm:$0xff]  ;;  %v12970_v16 = vld [vmem:[#allocation92_spill] sm:$0xff] }
 0x227   : > { %v3674_v53 = vsel %vm3572_vm3, %v3607_v1, 0.0  ;;  %v3606_v8 = vrot.slane %v3341_v13, 1  ;;  %v3344_v23 = vadd.f32 %v8703_v55, %v12968_v4  ;;  %v10911_v30 = vld [vmem:[#allocation3 + $0x70] sm:$0xff]  ;;  %v2305_v40 = vadd.f32 %v12970_v16, %v12969_v51  ;;  %v12971_v62 = vld [vmem:[#allocation91_spill] sm:$0xff] }
 0x228   : > { %3815 = vst.msk [vmem:[#allocation3 + $0x90] sm:$0xff] %vm3796_vm4, %v3778_v43  ;;  %v3781_v10 = vmax.f32 %v3745_v19, 0.0  ;;  %v3744_v21 = vadd.f32 %v10699_v0, %v3701_v42  ;;  %v3704_v28 = vadd.f32 %v3674_v53, %v10620_v2  ;;  %v3260_v50 = vpop.f32.mrf.mxu0  ;;  %8739 = vmatprep.mubr.msk.f32.mxu1 %vm3796_vm4, %v10911_v30  ;;  %8839 = vmatprep.mubr.msk.f32.mxu0 %vm3796_vm4, %v10911_v30 }
 0x229   : > { %v3608_v44 = vsel %vm3572_vm3, %v3606_v8, %v3607_v1  ;;  %v3610_v46 = vrot.slane %v3344_v23, 1  ;;  %v3343_v58 = vadd.f32 %v3260_v50, %v2295_v3  ;;  %8740 = vmatmul.mubr.msk.f32.gmra.mxu1 %vm3796_vm4, %v10920_v45  ;;  %8840 = vmatmul.mubr.msk.f32.gmra.mxu0 %vm3796_vm4, %v10920_v45  ;;  %v12972_v23 = vld [vmem:[#allocation90_spill] sm:$0xff] }
 0x22a   : > { %3818 = vst.msk [vmem:[#allocation3 + $0xa8] sm:$0xff] %vm3796_vm4, %v3781_v10  ;;  %v3780_v2 = vmax.f32 %v3744_v21, 0.0  ;;  %v3747_v12 = vadd.f32 %v10699_v0, %v3704_v28  ;;  %v3703_v14 = vadd.f32 %v3608_v44, %v10624_v11  ;;  %v8706_v37 = vpop.f32.mrf.mxu0  ;;  %v10943_v11 = vld [vmem:[#allocation3 + $0x88] sm:$0xff]  ;;  %v12973_v10 = vld [vmem:[#allocation95_spill] sm:$0xff]  ;;  %v12974_v44 = vld [vmem:[#allocation94_spill] sm:$0xff] }
 0x22b   : > { %v3675_v9 = vsel %vm3572_vm3, %v3610_v46, 0.0  ;;  %v3609_v59 = vrot.slane %v3343_v58, 1  ;;  %v3346_v1 = vadd.f32 %v8706_v37, %v12971_v62  ;;  %v10934_v13 = vld [vmem:[#allocation3 + $0x80] sm:$0xff]  ;;  %v2315_v21 = vadd.f32 %v12973_v10, %v12972_v23  ;;  %v12978_v23 = vld [vmem:[#allocation49_spill] sm:$0xff]  ;;  %v12979_v10 = vld [vmem:[#allocation51_spill] sm:$0xff] }
 0x22c   : > { %3817 = vst.msk [vmem:[#allocation3 + $0xa0] sm:$0xff] %vm3796_vm4, %v3780_v2  ;;  %v3783_v43 = vmax.f32 %v3747_v12, 0.0  ;;  %v3746_v19 = vadd.f32 %v10699_v0, %v3703_v14  ;;  %v3706_v42 = vadd.f32 %v3675_v9, %v10631_v33  ;;  %v3270_v55 = vpop.f32.mrf.mxu0  ;;  %8742 = vmatprep.mubr.msk.f32.mxu1 %vm3796_vm4, %v10934_v13  ;;  %8842 = vmatprep.mubr.msk.f32.mxu0 %vm3796_vm4, %v10934_v13 }
 0x22d   : > { %v3611_v7 = vsel %vm3572_vm3, %v3609_v59, %v3610_v46  ;;  %v3613_v18 = vrot.slane %v3346_v1, 1  ;;  %v3345_v3 = vadd.f32 %v3270_v55, %v2305_v40  ;;  %8743 = vmatmul.mubr.msk.f32.gmra.mxu1 %vm3796_vm4, %v10943_v11  ;;  %8843 = vmatmul.mubr.msk.f32.gmra.mxu0 %vm3796_vm4, %v10943_v11  ;;  %v12975_v1 = vld [vmem:[#allocation93_spill] sm:$0xff] }
 0x22e   : > { %3820 = vst.msk [vmem:[#allocation3 + $0xb8] sm:$0xff] %vm3796_vm4, %v3783_v43  ;;  %v3782_v33 = vmax.f32 %v3746_v19, 0.0  ;;  %v3749_v53 = vadd.f32 %v10699_v0, %v3706_v42  ;;  %v3705_v8 = vadd.f32 %v3611_v7, %v10635_v17  ;;  %v8709_v4 = vpop.f32.mrf.mxu0  ;;  %v10966_v17 = vld [vmem:[#allocation3 + $0x98] sm:$0xff]  ;;  %v12976_v43 = vld [vmem:[#allocation98_spill] sm:$0xff]  ;;  %v12977_v7 = vld [vmem:[#allocation97_spill] sm:$0xff] }
 0x22f   : > { %v3676_v28 = vsel %vm3572_vm3, %v3613_v18, 0.0  ;;  %v3612_v50 = vrot.slane %v3345_v3, 1  ;;  %v3348_v46 = vadd.f32 %v8709_v4, %v12974_v44  ;;  %v10957_v58 = vld [vmem:[#allocation3 + $0x90] sm:$0xff]  ;;  %v2325_v19 = vadd.f32 %v12976_v43, %v12975_v1  ;;  %v12984_v43 = vld [vmem:[#allocation52_spill] sm:$0xff] }
 0x230   : > { %3819 = vst.msk [vmem:[#allocation3 + $0xb0] sm:$0xff] %vm3796_vm4, %v3782_v33  ;;  %v3785_v2 = vmax.f32 %v3749_v53, 0.0  ;;  %v3748_v12 = vadd.f32 %v10699_v0, %v3705_v8  ;;  %v3708_v14 = vadd.f32 %v3676_v28, %v10642_v52  ;;  %v3280_v37 = vpop.f32.mrf.mxu0  ;;  %8745 = vmatprep.mubr.msk.f32.mxu1 %vm3796_vm4, %v10957_v58  ;;  %8845 = vmatprep.mubr.msk.f32.mxu0 %vm3796_vm4, %v10957_v58  ;;  %v12983_v1 = vld [vmem:[#allocation50_spill] sm:$0xff] }
 0x231   : > { %v3614_v51 = vsel %vm3572_vm3, %v3612_v50, %v3613_v18  ;;  %v3616_v16 = vrot.slane %v3348_v46, 1  ;;  %v3347_v40 = vadd.f32 %v3280_v37, %v2315_v21  ;;  %8746 = vmatmul.mubr.msk.f32.gmra.mxu1 %vm3796_vm4, %v10966_v17  ;;  %8846 = vmatmul.mubr.msk.f32.gmra.mxu0 %vm3796_vm4, %v10966_v17  ;;  %v1837_v21 = vadd.f32 %v12979_v10, %v12978_v23  ;;  %v12981_v46 = vld [vmem:[#allocation101_spill] sm:$0xff] }
 0x232   : > { %3822 = vst.msk [vmem:[#allocation3 + $0xc8] sm:$0xff] %vm3796_vm4, %v3785_v2  ;;  %v3784_v52 = vmax.f32 %v3748_v12, 0.0  ;;  %v3751_v9 = vadd.f32 %v10699_v0, %v3708_v14  ;;  %v3707_v59 = vadd.f32 %v3614_v51, %v10646_v38  ;;  %v8712_v62 = vpop.f32.mrf.mxu0  ;;  %v10989_v38 = vld [vmem:[#allocation3 + $0xa8] sm:$0xff] }
 0x233   : > { %v3677_v42 = vsel %vm3572_vm3, %v3616_v16, 0.0  ;;  %v3615_v55 = vrot.slane %v3347_v40, 1  ;;  %v3350_v18 = vadd.f32 %v8712_v62, %v12977_v7  ;;  %v10980_v3 = vld [vmem:[#allocation3 + $0xa0] sm:$0xff] }
 0x234   : > { %3821 = vst.msk [vmem:[#allocation3 + $0xc0] sm:$0xff] %vm3796_vm4, %v3784_v52  ;;  %v3787_v33 = vmax.f32 %v3751_v9, 0.0  ;;  %v3750_v53 = vadd.f32 %v10699_v0, %v3707_v59  ;;  %v3710_v8 = vadd.f32 %v3677_v42, %v10655_v34  ;;  %v3290_v4 = vpop.f32.mrf.mxu0  ;;  %8748 = vmatprep.mubr.msk.f32.mxu1 %vm3796_vm4, %v10980_v3  ;;  %8848 = vmatprep.mubr.msk.f32.mxu0 %vm3796_vm4, %v10980_v3  ;;  %v12980_v34 = vld [vmem:[#allocation96_spill] sm:$0xff] }
 0x235   : > { %v3617_v28 = vsel %vm3572_vm3, %v3615_v55, %v3616_v16  ;;  %v3619_v50 = vrot.slane %v3350_v18, 1  ;;  %v3349_v44 = vadd.f32 %v3290_v4, %v2325_v19  ;;  %8749 = vmatmul.mubr.msk.f32.gmra.mxu1 %vm3796_vm4, %v10989_v38  ;;  %8849 = vmatmul.mubr.msk.f32.gmra.mxu0 %vm3796_vm4, %v10989_v38  ;;  %v2335_v2 = vadd.f32 %v12981_v46, %v12980_v34  ;;  %v12982_v9 = vld [vmem:[#allocation100_spill] sm:$0xff]  ;;  %v12985_v18 = vld [vmem:[#allocation99_spill] sm:$0xff] }
 0x236   : > { %3824 = vst.msk [vmem:[#allocation3 + $0xd8] sm:$0xff] %vm3796_vm4, %v3787_v33  ;;  %v3786_v12 = vmax.f32 %v3750_v53, 0.0  ;;  %v3753_v14 = vadd.f32 %v10699_v0, %v3710_v8  ;;  %v3709_v37 = vadd.f32 %v3617_v28, %v10661_v32  ;;  %v8715_v51 = vpop.f32.mrf.mxu0  ;;  %v3065_v16 = vadd.f32 %v10681_v26, %v1837_v21  ;;  %v11017_v26 = vld [vmem:[#allocation3 + $0xb8] sm:$0xff]  ;;  %v3024_v8 = vpop.f32.mrf.mxu1 }
 0x237   : > { %v3678_v40 = vsel %vm3572_vm3, %v3619_v50, 0.0  ;;  %v3618_v52 = vrot.slane %v3349_v44, 1  ;;  %v3352_v59 = vadd.f32 %v8715_v51, %v12982_v9  ;;  %v11006_v62 = vld [vmem:[#allocation3 + $0xb0] sm:$0xff]  ;;  %v1847_v19 = vadd.f32 %v12984_v43, %v12983_v1  ;;  %v12986_v33 = vld [vmem:[#allocation103_spill] sm:$0xff] }
 0x238   : > { %3823 = vst.msk [vmem:[#allocation3 + $0xd0] sm:$0xff] %vm3796_vm4, %v3786_v12  ;;  %v3789_v42 = vmax.f32 %v3753_v14, 0.0  ;;  %v3752_v55 = vadd.f32 %v10699_v0, %v3709_v37  ;;  %v3712_v32 = vadd.f32 %v3678_v40, %v10671_v41  ;;  %v3300_v7 = vpop.f32.mrf.mxu0  ;;  %8751 = vmatprep.mubr.msk.f32.mxu1 %vm3796_vm4, %v11006_v62  ;;  %8851 = vmatprep.mubr.msk.f32.mxu0 %vm3796_vm4, %v11006_v62  ;;  %v3498_v41 = vsel %vm3391_vm2, 0.0, %v3440_v39  ;;  %v12987_v12 = vld [vmem:[#allocation102_spill] sm:$0xff] }
 0x239   : > { %v2345_v53 = vadd.f32 %v12986_v33, %v12985_v18  ;;  %v3620_v4 = vsel %vm3572_vm3, %v3618_v52, %v3619_v50  ;;  %v3622_v23 = vrot.slane %v3352_v59, 1  ;;  %v3351_v10 = vadd.f32 %v3300_v7, %v2335_v2  ;;  %8752 = vmatmul.mubr.msk.f32.gmra.mxu1 %vm3796_vm4, %v11017_v26  ;;  %8852 = vmatmul.mubr.msk.f32.gmra.mxu0 %vm3796_vm4, %v11017_v26 }
 0x23a   : > { %3826 = vst.msk [vmem:[#allocation3 + $0xe8] sm:$0xff] %vm3796_vm4, %v3789_v42  ;;  %v3788_v21 = vmax.f32 %v3752_v55, 0.0  ;;  %v3755_v28 = vadd.f32 %v10699_v0, %v3712_v32  ;;  %v3711_v44 = vadd.f32 %v3620_v4, %v10673_v63  ;;  %v8718_v50 = vpop.f32.mrf.mxu0  ;;  %v3532_v34 = vadd.f32 %v3498_v41, %v3065_v16  ;;  %v11043_v63 = vld [vmem:[#allocation3 + $0xc8] sm:$0xff] }
 0x23b   : > { %v3679_v46 = vsel %vm3572_vm3, %v3622_v23, 0.0  ;;  %v3621_v2 = vrot.slane %v3351_v10, 1  ;;  %v3354_v14 = vadd.f32 %v8718_v50, %v12987_v12  ;;  %v11034_v37 = vld [vmem:[#allocation3 + $0xc0] sm:$0xff]  ;;  %v3067_v51 = vadd.f32 %v3024_v8, %v1847_v19 }
 0x23c   : > { %3825 = vst.msk [vmem:[#allocation3 + $0xe0] sm:$0xff] %vm3796_vm4, %v3788_v21  ;;  %v3791_v57 = vmax.f32 %v3755_v28, 0.0  ;;  %v3754_v39 = vadd.f32 %v10699_v0, %v3711_v44  ;;  %v3714_v40 = vadd.f32 %v3679_v46, %v10687_v24  ;;  %v3310_v52 = vpop.f32.mrf.mxu0  ;;  %8754 = vmatprep.mubr.msk.f32.mxu1 %vm3796_vm4, %v11034_v37  ;;  %8854 = vmatprep.mubr.msk.f32.mxu0 %vm3796_vm4, %v11034_v37  ;;  %v3499_v19 = vsel %vm3391_vm2, 0.0, %v3443_v31  ;;  %v11145_v12 = vld [vmem:[%s12760_s5 + $0x40] sm:$0xff] }
 0x23d   : > { %v3623_v16 = vsel %vm3572_vm3, %v3621_v2, %v3622_v23  ;;  %v3625_v9 = vrot.slane %v3354_v14, 1  ;;  %v3353_v59 = vadd.f32 %v3310_v52, %v2345_v53  ;;  %8755 = vmatmul.mubr.msk.f32.gmra.mxu1 %vm3796_vm4, %v11043_v63  ;;  %8855 = vmatmul.mubr.msk.f32.gmra.mxu0 %vm3796_vm4, %v11043_v63  ;;  %v3534_v7 = vadd.f32 %v3499_v19, %v3067_v51  ;;  %v11065_v60 = vld [vmem:[#allocation3 + $0xd8] sm:$0xff]  ;;  %v11129_v2 = vld [vmem:[%s12760_s5 + $0x10] sm:$0xff] }
 0x23e   : > { %3828 = vst.msk [vmem:[#allocation3 + $0xf8] sm:$0xff] %vm3796_vm4, %v3791_v57  ;;  %v3790_v24 = vmax.f32 %v3754_v39, 0.0  ;;  %v3757_v1 = vadd.f32 %v10699_v0, %v3714_v40  ;;  %v3713_v43 = vadd.f32 %v3623_v16, %v3532_v34  ;;  %v11108_v34 = vld [vmem:[#allocation3] sm:$0xff] }
 0x23f   : > { %v3680_v42 = vsel %vm3572_vm3, %v3625_v9, 0.0  ;;  %v3624_v55 = vrot.slane %v3353_v59, 1  ;;  %v11056_v32 = vld [vmem:[#allocation3 + $0xd0] sm:$0xff] }
 0x240   : > { %3827 = vst.msk [vmem:[#allocation3 + $0xf0] sm:$0xff] %vm3796_vm4, %v3790_v24  ;;  %v3793_v18 = vmax.f32 %v3757_v1, 0.0  ;;  %v3756_v33 = vadd.f32 %v10699_v0, %v3713_v43  ;;  %v3716_v53 = vadd.f32 %v3680_v42, %v10701_v49  ;;  %8757 = vmatprep.mubr.msk.f32.mxu1 %vm3796_vm4, %v11056_v32  ;;  %8857 = vmatprep.mubr.msk.f32.mxu0 %vm3796_vm4, %v11056_v32 }
 0x241   : > { %v3626_v31 = vsel %vm3572_vm3, %v3624_v55, %v3625_v9  ;;  %8758 = vmatmul.mubr.msk.f32.gmra.mxu1 %vm3796_vm4, %v11065_v60  ;;  %8858 = vmatmul.mubr.msk.f32.gmra.mxu0 %vm3796_vm4, %v11065_v60  ;;  %v11082_v21 = vld [vmem:[#allocation3 + $0xe8] sm:$0xff] }
 0x242   : > { %3830 = vst.msk [vmem:[#allocation3 + $0x108] sm:$0xff] %vm3796_vm4, %v3793_v18  ;;  %v3792_v8 = vmax.f32 %v3756_v33, 0.0  ;;  %v3759_v49 = vadd.f32 %v10699_v0, %v3716_v53  ;;  %v3715_v4 = vadd.f32 %v3626_v31, %v3534_v7 }
 0x243   : > { %v11074_v23 = vld [vmem:[#allocation3 + $0xe0] sm:$0xff] }
 0x244   : > { %3829 = vst.msk [vmem:[#allocation3 + $0x100] sm:$0xff] %vm3796_vm4, %v3792_v8  ;;  %v3795_v10 = vmax.f32 %v3759_v49, 0.0  ;;  %v3758_v41 = vadd.f32 %v10699_v0, %v3715_v4  ;;  %8760 = vmatprep.mubr.msk.f32.mxu1 %vm3796_vm4, %v11074_v23  ;;  %8860 = vmatprep.mubr.msk.f32.mxu0 %vm3796_vm4, %v11074_v23 }
 0x245   : > { %8761 = vmatmul.mubr.msk.f32.gmra.mxu1 %vm3796_vm4, %v11082_v21  ;;  %8861 = vmatmul.mubr.msk.f32.gmra.mxu0 %vm3796_vm4, %v11082_v21  ;;  %v11098_v44 = vld [vmem:[#allocation3 + $0xf8] sm:$0xff] }
 0x246   : > { %3832 = vst.msk [vmem:[#allocation3 + $0x118] sm:$0xff] %vm3796_vm4, %v3795_v10  ;;  %v3794_v28 = vmax.f32 %v3758_v41, 0.0 }
 0x247   : > { %3840 = vst.msk [vmem:[#allocation3 + $0x118] sm:$0xff] %vm3796_vm4, %v12939_v47  ;;  %v11091_v0 = vld [vmem:[#allocation3 + $0xf0] sm:$0xff] }
 0x248   : > { %3831 = vst.msk [vmem:[#allocation3 + $0x110] sm:$0xff] %vm3796_vm4, %v3794_v28  ;;  %8763 = vmatprep.mubr.msk.f32.mxu1 %vm3796_vm4, %v11091_v0  ;;  %8863 = vmatprep.mubr.msk.f32.mxu0 %vm3796_vm4, %v11091_v0 }
 0x249   : > { %3839 = vst.msk [vmem:[#allocation3 + $0x110] sm:$0xff] %vm3796_vm4, %v12939_v47  ;;  %8764 = vmatmul.mubr.msk.f32.gmra.mxu1 %vm3796_vm4, %v11098_v44  ;;  %8864 = vmatmul.mubr.msk.f32.gmra.mxu0 %vm3796_vm4, %v11098_v44  ;;  %v11114_v46 = vld [vmem:[#allocation3 + $0x108] sm:$0xff] }
 0x24a   : > { %v11124_v47 = vld [vmem:[#allocation3 + $0x8] sm:$0xff] }
 0x24b   : > { %v11106_v50 = vld [vmem:[#allocation3 + $0x100] sm:$0xff] }
 0x24c   : > { %8766 = vmatprep.mubr.msk.f32.mxu1 %vm3796_vm4, %v11106_v50  ;;  %8866 = vmatprep.mubr.msk.f32.mxu0 %vm3796_vm4, %v11106_v50 }
 0x24d   : > { %8767 = vmatmul.mubr.msk.f32.gmra.mxu1 %vm3796_vm4, %v11114_v46  ;;  %8867 = vmatmul.mubr.msk.f32.gmra.mxu0 %vm3796_vm4, %v11114_v46 }
 0x24e   : > { %8921 = vmatprep.mubr.msk.f32.mxu0 %vm3796_vm4, %v10759_v56  ;;  %8771 = vmatprep.mubr.msk.f32.mxu1 %vm3796_vm4, %v11108_v34  ;;  %v11398_v14 = vld [vmem:[#allocation3 + $0x118] sm:$0xff] }
 0x24f   : > { %12988 = vst [vmem:[#allocation6_spill] sm:$0xff] %v11398_v14 }
 0x251   : > { %8772 = vmatmul.mubr.msk.f32.vlgmr.msra.gmra.mxu1 %vm3796_vm4, %v11124_v47  ;;  %8922 = vmatmul.mubr.msk.f32.vlgmr.msra.gmra.mxu0 %vm3796_vm4, %v10768_v61 }
 0x252   : > { %8870 = vmatpush3.msra.mxu1 %v10773_v6  ;;  %8774 = vmatprep.mubr.msk.f32.mxu1 %vm3796_vm4, %v10759_v56  ;;  %v11271_v6 = vld [vmem:[%s12760_s5 + $0x38] sm:$0xff] }
 0x253   : > { %8924 = vmatprep.mubr.msk.f32.mxu0 %vm3796_vm4, %v10794_v5  ;;  %8969 = vmatprep.subr.mxu1 %v11129_v2 }
 0x254   : > { %9020 = vmatpush3.msra.mxu0 %v10778_v35  ;;  %v11388_v35 = vld [vmem:[#allocation3 + $0x110] sm:$0xff] }
 0x255   : > { %8775 = vmatmul.mubr.msk.f32.gmra.mxu1 %vm3796_vm4, %v10768_v61  ;;  %8925 = vmatmul.mubr.msk.f32.gmra.mxu0 %vm3796_vm4, %v10805_v22 }
 0x256   : > { %8777 = vmatprep.mubr.msk.f32.mxu1 %vm3796_vm4, %v10794_v5  ;;  %8927 = vmatprep.mubr.msk.f32.mxu0 %vm3796_vm4, %v10819_v48 }
 0x257   : > { %9119 = vmatprep.subr.mxu0 %v11145_v12 }
 0x259   : > { %8778 = vmatmul.mubr.msk.f32.gmra.mxu1 %vm3796_vm4, %v10805_v22  ;;  %8928 = vmatmul.mubr.msk.f32.gmra.mxu0 %vm3796_vm4, %v10828_v27 }
 0x25a   : > { %8780 = vmatprep.mubr.msk.f32.mxu1 %vm3796_vm4, %v10819_v48  ;;  %8930 = vmatprep.mubr.msk.f32.mxu0 %vm3796_vm4, %v10842_v25 }
 0x25d   : > { %8781 = vmatmul.mubr.msk.f32.gmra.mxu1 %vm3796_vm4, %v10828_v27  ;;  %8931 = vmatmul.mubr.msk.f32.gmra.mxu0 %vm3796_vm4, %v10851_v15 }
 0x25e   : > { %8783 = vmatprep.mubr.msk.f32.mxu1 %vm3796_vm4, %v10842_v25  ;;  %8933 = vmatprep.mubr.msk.f32.mxu0 %vm3796_vm4, %v10865_v36 }
 0x261   : > { %8784 = vmatmul.mubr.msk.f32.gmra.mxu1 %vm3796_vm4, %v10851_v15  ;;  %8934 = vmatmul.mubr.msk.f32.gmra.mxu0 %vm3796_vm4, %v10874_v29 }
 0x262   : > { %8786 = vmatprep.mubr.msk.f32.mxu1 %vm3796_vm4, %v10865_v36  ;;  %8936 = vmatprep.mubr.msk.f32.mxu0 %vm3796_vm4, %v10888_v54 }
 0x265   : > { %8787 = vmatmul.mubr.msk.f32.gmra.mxu1 %vm3796_vm4, %v10874_v29  ;;  %8937 = vmatmul.mubr.msk.f32.gmra.mxu0 %vm3796_vm4, %v10897_v20 }
 0x266   : > { %8789 = vmatprep.mubr.msk.f32.mxu1 %vm3796_vm4, %v10888_v54  ;;  %8939 = vmatprep.mubr.msk.f32.mxu0 %vm3796_vm4, %v10911_v30 }
 0x269   : > { %8790 = vmatmul.mubr.msk.f32.gmra.mxu1 %vm3796_vm4, %v10897_v20  ;;  %8940 = vmatmul.mubr.msk.f32.gmra.mxu0 %vm3796_vm4, %v10920_v45 }
 0x26a   : > { %8792 = vmatprep.mubr.msk.f32.mxu1 %vm3796_vm4, %v10911_v30  ;;  %8942 = vmatprep.mubr.msk.f32.mxu0 %vm3796_vm4, %v10934_v13 }
 0x26d   : > { %8793 = vmatmul.mubr.msk.f32.gmra.mxu1 %vm3796_vm4, %v10920_v45  ;;  %8943 = vmatmul.mubr.msk.f32.gmra.mxu0 %vm3796_vm4, %v10943_v11 }
 0x26e   : > { %8795 = vmatprep.mubr.msk.f32.mxu1 %vm3796_vm4, %v10934_v13  ;;  %8945 = vmatprep.mubr.msk.f32.mxu0 %vm3796_vm4, %v10957_v58 }
 0x271   : > { %8796 = vmatmul.mubr.msk.f32.gmra.mxu1 %vm3796_vm4, %v10943_v11  ;;  %8946 = vmatmul.mubr.msk.f32.gmra.mxu0 %vm3796_vm4, %v10966_v17 }
 0x272   : > { %8798 = vmatprep.mubr.msk.f32.mxu1 %vm3796_vm4, %v10957_v58  ;;  %8948 = vmatprep.mubr.msk.f32.mxu0 %vm3796_vm4, %v10980_v3 }
 0x275   : > { %8799 = vmatmul.mubr.msk.f32.gmra.mxu1 %vm3796_vm4, %v10966_v17  ;;  %8949 = vmatmul.mubr.msk.f32.gmra.mxu0 %vm3796_vm4, %v10989_v38 }
 0x276   : > { %8801 = vmatprep.mubr.msk.f32.mxu1 %vm3796_vm4, %v10980_v3  ;;  %8951 = vmatprep.mubr.msk.f32.mxu0 %vm3796_vm4, %v11006_v62 }
 0x279   : > { %8802 = vmatmul.mubr.msk.f32.gmra.mxu1 %vm3796_vm4, %v10989_v38  ;;  %8952 = vmatmul.mubr.msk.f32.gmra.mxu0 %vm3796_vm4, %v11017_v26 }
 0x27a   : > { %8804 = vmatprep.mubr.msk.f32.mxu1 %vm3796_vm4, %v11006_v62  ;;  %8954 = vmatprep.mubr.msk.f32.mxu0 %vm3796_vm4, %v11034_v37 }
 0x27d   : > { %8805 = vmatmul.mubr.msk.f32.gmra.mxu1 %vm3796_vm4, %v11017_v26  ;;  %8955 = vmatmul.mubr.msk.f32.gmra.mxu0 %vm3796_vm4, %v11043_v63 }
 0x27e   : > { %8807 = vmatprep.mubr.msk.f32.mxu1 %vm3796_vm4, %v11034_v37  ;;  %8957 = vmatprep.mubr.msk.f32.mxu0 %vm3796_vm4, %v11056_v32 }
 0x281   : > { %8808 = vmatmul.mubr.msk.f32.gmra.mxu1 %vm3796_vm4, %v11043_v63  ;;  %8958 = vmatmul.mubr.msk.f32.gmra.mxu0 %vm3796_vm4, %v11065_v60 }
 0x282   : > { %8810 = vmatprep.mubr.msk.f32.mxu1 %vm3796_vm4, %v11056_v32  ;;  %8960 = vmatprep.mubr.msk.f32.mxu0 %vm3796_vm4, %v11074_v23 }
 0x285   : > { %8811 = vmatmul.mubr.msk.f32.gmra.mxu1 %vm3796_vm4, %v11065_v60  ;;  %8961 = vmatmul.mubr.msk.f32.gmra.mxu0 %vm3796_vm4, %v11082_v21 }
 0x286   : > { %8813 = vmatprep.mubr.msk.f32.mxu1 %vm3796_vm4, %v11074_v23  ;;  %8963 = vmatprep.mubr.msk.f32.mxu0 %vm3796_vm4, %v11091_v0 }
 0x289   : > { %8814 = vmatmul.mubr.msk.f32.gmra.mxu1 %vm3796_vm4, %v11082_v21  ;;  %8964 = vmatmul.mubr.msk.f32.gmra.mxu0 %vm3796_vm4, %v11098_v44 }
 0x28a   : > { %8816 = vmatprep.mubr.msk.f32.mxu1 %vm3796_vm4, %v11091_v0  ;;  %8966 = vmatprep.mubr.msk.f32.mxu0 %vm3796_vm4, %v11106_v50 }
 0x28d   : > { %8817 = vmatmul.mubr.msk.f32.gmra.mxu1 %vm3796_vm4, %v11098_v44  ;;  %8967 = vmatmul.mubr.msk.f32.gmra.mxu0 %vm3796_vm4, %v11114_v46 }
 0x28e   : > { %9021 = vmatprep.mubr.msk.f32.mxu0 %vm3796_vm4, %v10794_v5  ;;  %8871 = vmatprep.mubr.msk.f32.mxu1 %vm3796_vm4, %v11108_v34 }
 0x291   : > { %8872 = vmatmul.mubr.msk.f32.vlgmr.msra.gmra.mxu1 %vm3796_vm4, %v11124_v47  ;;  %9022 = vmatmul.mubr.msk.f32.vlgmr.msra.gmra.mxu0 %vm3796_vm4, %v10805_v22 }
 0x292   : > { %8970 = vmatpush3.msra.mxu1 %v11129_v2  ;;  %8874 = vmatprep.mubr.msk.f32.mxu1 %vm3796_vm4, %v10759_v56 }
 0x293   : > { %9024 = vmatprep.mubr.msk.f32.mxu0 %vm3796_vm4, %v10819_v48  ;;  %9069 = vmatprep.subr.mxu1 %v11271_v6 }
 0x294   : > { %9120 = vmatpush3.msra.mxu0 %v11145_v12 }
 0x295   : > { %8875 = vmatmul.mubr.msk.f32.gmra.mxu1 %vm3796_vm4, %v10768_v61  ;;  %9025 = vmatmul.mubr.msk.f32.gmra.mxu0 %vm3796_vm4, %v10828_v27 }
 0x296   : > { %8877 = vmatprep.mubr.msk.f32.mxu1 %vm3796_vm4, %v10794_v5  ;;  %9027 = vmatprep.mubr.msk.f32.mxu0 %vm3796_vm4, %v10842_v25 }
 0x299   : > { %8878 = vmatmul.mubr.msk.f32.gmra.mxu1 %vm3796_vm4, %v10805_v22  ;;  %9028 = vmatmul.mubr.msk.f32.gmra.mxu0 %vm3796_vm4, %v10851_v15 }
 0x29a   : > { %8880 = vmatprep.mubr.msk.f32.mxu1 %vm3796_vm4, %v10819_v48  ;;  %9030 = vmatprep.mubr.msk.f32.mxu0 %vm3796_vm4, %v10865_v36 }
 0x29d   : > { %8881 = vmatmul.mubr.msk.f32.gmra.mxu1 %vm3796_vm4, %v10828_v27  ;;  %9031 = vmatmul.mubr.msk.f32.gmra.mxu0 %vm3796_vm4, %v10874_v29 }
 0x29e   : > { %8883 = vmatprep.mubr.msk.f32.mxu1 %vm3796_vm4, %v10842_v25  ;;  %9033 = vmatprep.mubr.msk.f32.mxu0 %vm3796_vm4, %v10888_v54 }
 0x2a1   : > { %8884 = vmatmul.mubr.msk.f32.gmra.mxu1 %vm3796_vm4, %v10851_v15  ;;  %9034 = vmatmul.mubr.msk.f32.gmra.mxu0 %vm3796_vm4, %v10897_v20 }
 0x2a2   : > { %8886 = vmatprep.mubr.msk.f32.mxu1 %vm3796_vm4, %v10865_v36  ;;  %9036 = vmatprep.mubr.msk.f32.mxu0 %vm3796_vm4, %v10911_v30 }
 0x2a5   : > { %8887 = vmatmul.mubr.msk.f32.gmra.mxu1 %vm3796_vm4, %v10874_v29  ;;  %9037 = vmatmul.mubr.msk.f32.gmra.mxu0 %vm3796_vm4, %v10920_v45 }
 0x2a6   : > { %8889 = vmatprep.mubr.msk.f32.mxu1 %vm3796_vm4, %v10888_v54  ;;  %9039 = vmatprep.mubr.msk.f32.mxu0 %vm3796_vm4, %v10934_v13 }
 0x2a9   : > { %8890 = vmatmul.mubr.msk.f32.gmra.mxu1 %vm3796_vm4, %v10897_v20  ;;  %9040 = vmatmul.mubr.msk.f32.gmra.mxu0 %vm3796_vm4, %v10943_v11 }
 0x2aa   : > { %8892 = vmatprep.mubr.msk.f32.mxu1 %vm3796_vm4, %v10911_v30  ;;  %9042 = vmatprep.mubr.msk.f32.mxu0 %vm3796_vm4, %v10957_v58 }
 0x2ad   : > { %8893 = vmatmul.mubr.msk.f32.gmra.mxu1 %vm3796_vm4, %v10920_v45  ;;  %9043 = vmatmul.mubr.msk.f32.gmra.mxu0 %vm3796_vm4, %v10966_v17 }
 0x2ae   : > { %8895 = vmatprep.mubr.msk.f32.mxu1 %vm3796_vm4, %v10934_v13  ;;  %9045 = vmatprep.mubr.msk.f32.mxu0 %vm3796_vm4, %v10980_v3 }
 0x2b1   : > { %8896 = vmatmul.mubr.msk.f32.gmra.mxu1 %vm3796_vm4, %v10943_v11  ;;  %9046 = vmatmul.mubr.msk.f32.gmra.mxu0 %vm3796_vm4, %v10989_v38 }
 0x2b2   : > { %8898 = vmatprep.mubr.msk.f32.mxu1 %vm3796_vm4, %v10957_v58  ;;  %9048 = vmatprep.mubr.msk.f32.mxu0 %vm3796_vm4, %v11006_v62 }
 0x2b5   : > { %8899 = vmatmul.mubr.msk.f32.gmra.mxu1 %vm3796_vm4, %v10966_v17  ;;  %9049 = vmatmul.mubr.msk.f32.gmra.mxu0 %vm3796_vm4, %v11017_v26 }
 0x2b6   : > { %8901 = vmatprep.mubr.msk.f32.mxu1 %vm3796_vm4, %v10980_v3  ;;  %9051 = vmatprep.mubr.msk.f32.mxu0 %vm3796_vm4, %v11034_v37 }
 0x2b9   : > { %8902 = vmatmul.mubr.msk.f32.gmra.mxu1 %vm3796_vm4, %v10989_v38  ;;  %9052 = vmatmul.mubr.msk.f32.gmra.mxu0 %vm3796_vm4, %v11043_v63 }
 0x2ba   : > { %8904 = vmatprep.mubr.msk.f32.mxu1 %vm3796_vm4, %v11006_v62  ;;  %9054 = vmatprep.mubr.msk.f32.mxu0 %vm3796_vm4, %v11056_v32 }
 0x2bd   : > { %8905 = vmatmul.mubr.msk.f32.gmra.mxu1 %vm3796_vm4, %v11017_v26  ;;  %9055 = vmatmul.mubr.msk.f32.gmra.mxu0 %vm3796_vm4, %v11065_v60 }
 0x2be   : > { %8907 = vmatprep.mubr.msk.f32.mxu1 %vm3796_vm4, %v11034_v37  ;;  %9057 = vmatprep.mubr.msk.f32.mxu0 %vm3796_vm4, %v11074_v23 }
 0x2c1   : > { %8908 = vmatmul.mubr.msk.f32.gmra.mxu1 %vm3796_vm4, %v11043_v63  ;;  %9058 = vmatmul.mubr.msk.f32.gmra.mxu0 %vm3796_vm4, %v11082_v21 }
 0x2c2   : > { %8910 = vmatprep.mubr.msk.f32.mxu1 %vm3796_vm4, %v11056_v32  ;;  %9060 = vmatprep.mubr.msk.f32.mxu0 %vm3796_vm4, %v11091_v0 }
 0x2c5   : > { %8911 = vmatmul.mubr.msk.f32.gmra.mxu1 %vm3796_vm4, %v11065_v60  ;;  %9061 = vmatmul.mubr.msk.f32.gmra.mxu0 %vm3796_vm4, %v11098_v44 }
 0x2c6   : > { %8913 = vmatprep.mubr.msk.f32.mxu1 %vm3796_vm4, %v11074_v23  ;;  %9063 = vmatprep.mubr.msk.f32.mxu0 %vm3796_vm4, %v11106_v50 }
 0x2c9   : > { %8914 = vmatmul.mubr.msk.f32.gmra.mxu1 %vm3796_vm4, %v11082_v21  ;;  %9064 = vmatmul.mubr.msk.f32.gmra.mxu0 %vm3796_vm4, %v11114_v46 }
 0x2ca   : > { %8916 = vmatprep.mubr.msk.f32.mxu1 %vm3796_vm4, %v11091_v0  ;;  %9066 = vmatprep.mubr.msk.f32.mxu0 %vm3796_vm4, %v11388_v35 }
 0x2cd   : > { %8917 = vmatmul.mubr.msk.f32.gmra.mxu1 %vm3796_vm4, %v11098_v44  ;;  %9067 = vmatmul.mubr.msk.f32.gmra.mxu0 %vm3796_vm4, %v11398_v14 }
 0x2ce   : > { %9121 = vmatprep.mubr.msk.f32.mxu0 %vm3796_vm4, %v10794_v5  ;;  %8971 = vmatprep.mubr.msk.f32.mxu1 %vm3796_vm4, %v11108_v34 }
 0x2d1   : > { %v11408_v51 = vpop.f32.mrf.mxu1  ;;  %v11410_v57 = vpop.f32.mrf.mxu0  ;;  %8972 = vmatmul.mubr.msk.f32.vlgmr.msra.gmra.mxu1 %vm3796_vm4, %v11124_v47  ;;  %9122 = vmatmul.mubr.msk.f32.vlgmr.msra.gmra.mxu0 %vm3796_vm4, %v10805_v22 }
 0x2d2   : > { %12989 = vst [vmem:[#allocation35_spill] sm:$0xff] %v11410_v57  ;;  %9070 = vmatpush3.msra.mxu1 %v11271_v6  ;;  %8974 = vmatprep.mubr.msk.f32.mxu1 %vm3796_vm4, %v10759_v56 }
 0x2d3   : > { %9124 = vmatprep.mubr.msk.f32.mxu0 %vm3796_vm4, %v10819_v48  ;;  %v11421_v39 = vpop.f32.mrf.mxu1  ;;  %v11423_v40 = vpop.f32.mrf.mxu0 }
 0x2d4   : > { %12990 = vst [vmem:[#allocation7_spill] sm:$0xff] %v11423_v40  ;;  %v9198_v40 = vld [vmem:[#allocation3 + $0x30] sm:$0xff] }
 0x2d5   : > { %v11425_v52 = vpop.f32.mrf.mxu1  ;;  %v11427_v16 = vpop.f32.mrf.mxu0  ;;  %8975 = vmatmul.mubr.msk.f32.gmra.mxu1 %vm3796_vm4, %v10768_v61  ;;  %9125 = vmatmul.mubr.msk.f32.gmra.mxu0 %vm3796_vm4, %v10828_v27 }
 0x2d6   : > { %12991 = vst [vmem:[#allocation34_spill] sm:$0xff] %v11427_v16  ;;  %8977 = vmatprep.mubr.msk.f32.mxu1 %vm3796_vm4, %v10794_v5  ;;  %9127 = vmatprep.mubr.msk.f32.mxu0 %vm3796_vm4, %v10842_v25 }
 0x2d7   : > { %v11437_v56 = vpop.f32.mrf.mxu1  ;;  %v11439_v9 = vpop.f32.mrf.mxu0 }
 0x2d8   : > { %12992 = vst [vmem:[#allocation38_spill] sm:$0xff] %v11439_v9 }
 0x2d9   : > { %v11441_v59 = vpop.f32.mrf.mxu1  ;;  %v11443_v24 = vpop.f32.mrf.mxu0  ;;  %8978 = vmatmul.mubr.msk.f32.gmra.mxu1 %vm3796_vm4, %v10805_v22  ;;  %9128 = vmatmul.mubr.msk.f32.gmra.mxu0 %vm3796_vm4, %v10851_v15 }
 0x2da   : > { %12993 = vst [vmem:[#allocation8_spill] sm:$0xff] %v11443_v24  ;;  %8980 = vmatprep.mubr.msk.f32.mxu1 %vm3796_vm4, %v10819_v48  ;;  %9130 = vmatprep.mubr.msk.f32.mxu0 %vm3796_vm4, %v10865_v36 }
 0x2db   : > { %v11453_v61 = vpop.f32.mrf.mxu1  ;;  %v11455_v5 = vpop.f32.mrf.mxu0 }
 0x2dc   : > { %12994 = vst [vmem:[#allocation37_spill] sm:$0xff] %v11455_v5 }
 0x2dd   : > { %v11457_v1 = vpop.f32.mrf.mxu1  ;;  %v11459_v43 = vpop.f32.mrf.mxu0  ;;  %8981 = vmatmul.mubr.msk.f32.gmra.mxu1 %vm3796_vm4, %v10828_v27  ;;  %9131 = vmatmul.mubr.msk.f32.gmra.mxu0 %vm3796_vm4, %v10874_v29 }
 0x2de   : > { %12995 = vst [vmem:[#allocation9_spill] sm:$0xff] %v11459_v43  ;;  %8983 = vmatprep.mubr.msk.f32.mxu1 %vm3796_vm4, %v10842_v25  ;;  %9133 = vmatprep.mubr.msk.f32.mxu0 %vm3796_vm4, %v10888_v54 }
 0x2df   : > { %v11469_v22 = vpop.f32.mrf.mxu1  ;;  %v11471_v48 = vpop.f32.mrf.mxu0 }
 0x2e0   : > { %12996 = vst [vmem:[#allocation36_spill] sm:$0xff] %v11471_v48 }
 0x2e1   : > { %v11473_v19 = vpop.f32.mrf.mxu1  ;;  %v11475_v42 = vpop.f32.mrf.mxu0  ;;  %8984 = vmatmul.mubr.msk.f32.gmra.mxu1 %vm3796_vm4, %v10851_v15  ;;  %9134 = vmatmul.mubr.msk.f32.gmra.mxu0 %vm3796_vm4, %v10897_v20 }
 0x2e2   : > { %12997 = vst [vmem:[#allocation10_spill] sm:$0xff] %v11475_v42  ;;  %8986 = vmatprep.mubr.msk.f32.mxu1 %vm3796_vm4, %v10865_v36  ;;  %9136 = vmatprep.mubr.msk.f32.mxu0 %vm3796_vm4, %v10911_v30 }
 0x2e3   : > { %v11485_v27 = vpop.f32.mrf.mxu1  ;;  %v11487_v25 = vpop.f32.mrf.mxu0 }
 0x2e4   : > { %12998 = vst [vmem:[#allocation40_spill] sm:$0xff] %v11487_v25 }
 0x2e5   : > { %v11489_v55 = vpop.f32.mrf.mxu1  ;;  %v11491_v7 = vpop.f32.mrf.mxu0  ;;  %8987 = vmatmul.mubr.msk.f32.gmra.mxu1 %vm3796_vm4, %v10874_v29  ;;  %9137 = vmatmul.mubr.msk.f32.gmra.mxu0 %vm3796_vm4, %v10920_v45 }
 0x2e6   : > { %12999 = vst [vmem:[#allocation11_spill] sm:$0xff] %v11491_v7  ;;  %8989 = vmatprep.mubr.msk.f32.mxu1 %vm3796_vm4, %v10888_v54  ;;  %9139 = vmatprep.mubr.msk.f32.mxu0 %vm3796_vm4, %v10934_v13 }
 0x2e7   : > { %v11501_v15 = vpop.f32.mrf.mxu1  ;;  %v11503_v36 = vpop.f32.mrf.mxu0 }
 0x2e8   : > { %13000 = vst [vmem:[#allocation39_spill] sm:$0xff] %v11503_v36 }
 0x2e9   : > { %v11505_v18 = vpop.f32.mrf.mxu1  ;;  %v11507_v33 = vpop.f32.mrf.mxu0  ;;  %8990 = vmatmul.mubr.msk.f32.gmra.mxu1 %vm3796_vm4, %v10897_v20  ;;  %9140 = vmatmul.mubr.msk.f32.gmra.mxu0 %vm3796_vm4, %v10943_v11 }
 0x2ea   : > { %13001 = vst [vmem:[#allocation12_spill] sm:$0xff] %v11507_v33  ;;  %8992 = vmatprep.mubr.msk.f32.mxu1 %vm3796_vm4, %v10911_v30  ;;  %9142 = vmatprep.mubr.msk.f32.mxu0 %vm3796_vm4, %v10957_v58 }
 0x2eb   : > { %v11517_v29 = vpop.f32.mrf.mxu1  ;;  %v11519_v53 = vpop.f32.mrf.mxu0 }
 0x2ec   : > { %13002 = vst [vmem:[#allocation13_spill] sm:$0xff] %v11519_v53 }
 0x2ed   : > { %v11521_v31 = vpop.f32.mrf.mxu1  ;;  %v11523_v8 = vpop.f32.mrf.mxu0  ;;  %8993 = vmatmul.mubr.msk.f32.gmra.mxu1 %vm3796_vm4, %v10920_v45  ;;  %9143 = vmatmul.mubr.msk.f32.gmra.mxu0 %vm3796_vm4, %v10966_v17 }
 0x2ee   : > { %13003 = vst [vmem:[#allocation41_spill] sm:$0xff] %v11523_v8  ;;  %8995 = vmatprep.mubr.msk.f32.mxu1 %vm3796_vm4, %v10934_v13  ;;  %9145 = vmatprep.mubr.msk.f32.mxu0 %vm3796_vm4, %v10980_v3 }
 0x2ef   : > { %v11533_v49 = vpop.f32.mrf.mxu1  ;;  %v11535_v4 = vpop.f32.mrf.mxu0 }
 0x2f0   : > { %13004 = vst [vmem:[#allocation14_spill] sm:$0xff] %v11535_v4 }
 0x2f1   : > { %v11537_v10 = vpop.f32.mrf.mxu1  ;;  %v11539_v41 = vpop.f32.mrf.mxu0  ;;  %8996 = vmatmul.mubr.msk.f32.gmra.mxu1 %vm3796_vm4, %v10943_v11  ;;  %9146 = vmatmul.mubr.msk.f32.gmra.mxu0 %vm3796_vm4, %v10989_v38 }
 0x2f2   : > { %13005 = vst [vmem:[#allocation15_spill] sm:$0xff] %v11539_v41  ;;  %8998 = vmatprep.mubr.msk.f32.mxu1 %vm3796_vm4, %v10957_v58  ;;  %9148 = vmatprep.mubr.msk.f32.mxu0 %vm3796_vm4, %v11006_v62 }
 0x2f3   : > { %v11549_v28 = vpop.f32.mrf.mxu1  ;;  %v11551_v34 = vpop.f32.mrf.mxu0 }
 0x2f4   : > { %13006 = vst [vmem:[#allocation42_spill] sm:$0xff] %v11551_v34 }
 0x2f5   : > { %v11553_v47 = vpop.f32.mrf.mxu1  ;;  %v11555_v2 = vpop.f32.mrf.mxu0  ;;  %8999 = vmatmul.mubr.msk.f32.gmra.mxu1 %vm3796_vm4, %v10966_v17  ;;  %9149 = vmatmul.mubr.msk.f32.gmra.mxu0 %vm3796_vm4, %v11017_v26 }
 0x2f6   : > { %13007 = vst [vmem:[#allocation16_spill] sm:$0xff] %v11555_v2  ;;  %9001 = vmatprep.mubr.msk.f32.mxu1 %vm3796_vm4, %v10980_v3  ;;  %9151 = vmatprep.mubr.msk.f32.mxu0 %vm3796_vm4, %v11034_v37 }
 0x2f7   : > { %v11565_v12 = vpop.f32.mrf.mxu1  ;;  %v11567_v6 = vpop.f32.mrf.mxu0 }
 0x2f8   : > { %13008 = vst [vmem:[#allocation17_spill] sm:$0xff] %v11567_v6 }
 0x2f9   : > { %v11569_v34 = vpop.f32.mrf.mxu1  ;;  %v11571_v41 = vpop.f32.mrf.mxu0  ;;  %9002 = vmatmul.mubr.msk.f32.gmra.mxu1 %vm3796_vm4, %v10989_v38  ;;  %9152 = vmatmul.mubr.msk.f32.gmra.mxu0 %vm3796_vm4, %v11043_v63 }
 0x2fa   : > { %13009 = vst [vmem:[#allocation18_spill] sm:$0xff] %v11571_v41  ;;  %9004 = vmatprep.mubr.msk.f32.mxu1 %vm3796_vm4, %v11006_v62  ;;  %9154 = vmatprep.mubr.msk.f32.mxu0 %vm3796_vm4, %v11056_v32 }
 0x2fb   : > { %v11581_v2 = vpop.f32.mrf.mxu1  ;;  %v11583_v4 = vpop.f32.mrf.mxu0 }
 0x2fc   : > { %13010 = vst [vmem:[#allocation19_spill] sm:$0xff] %v11583_v4 }
 0x2fd   : > { %v11585_v6 = vpop.f32.mrf.mxu1  ;;  %v11587_v8 = vpop.f32.mrf.mxu0  ;;  %9005 = vmatmul.mubr.msk.f32.gmra.mxu1 %vm3796_vm4, %v11017_v26  ;;  %9155 = vmatmul.mubr.msk.f32.gmra.mxu0 %vm3796_vm4, %v11065_v60 }
 0x2fe   : > { %13011 = vst [vmem:[#allocation45_spill] sm:$0xff] %v11587_v8  ;;  %9007 = vmatprep.mubr.msk.f32.mxu1 %vm3796_vm4, %v11034_v37  ;;  %9157 = vmatprep.mubr.msk.f32.mxu0 %vm3796_vm4, %v11074_v23 }
 0x2ff   : > { %v11597_v41 = vpop.f32.mrf.mxu1  ;;  %v11599_v53 = vpop.f32.mrf.mxu0 }
 0x300   : > { %13012 = vst [vmem:[#allocation20_spill] sm:$0xff] %v11599_v53 }
 0x301   : > { %v11601_v4 = vpop.f32.mrf.mxu1  ;;  %v11603_v33 = vpop.f32.mrf.mxu0  ;;  %9008 = vmatmul.mubr.msk.f32.gmra.mxu1 %vm3796_vm4, %v11043_v63  ;;  %9158 = vmatmul.mubr.msk.f32.gmra.mxu0 %vm3796_vm4, %v11082_v21 }
 0x302   : > { %13013 = vst [vmem:[#allocation44_spill] sm:$0xff] %v11603_v33  ;;  %9010 = vmatprep.mubr.msk.f32.mxu1 %vm3796_vm4, %v11056_v32  ;;  %9160 = vmatprep.mubr.msk.f32.mxu0 %vm3796_vm4, %v11091_v0 }
 0x303   : > { %v11613_v8 = vpop.f32.mrf.mxu1  ;;  %v11615_v36 = vpop.f32.mrf.mxu0 }
 0x304   : > { %13014 = vst [vmem:[#allocation21_spill] sm:$0xff] %v11615_v36 }
 0x305   : > { %v11617_v53 = vpop.f32.mrf.mxu1  ;;  %v11619_v7 = vpop.f32.mrf.mxu0  ;;  %9011 = vmatmul.mubr.msk.f32.gmra.mxu1 %vm3796_vm4, %v11065_v60  ;;  %9161 = vmatmul.mubr.msk.f32.gmra.mxu0 %vm3796_vm4, %v11098_v44 }
 0x306   : > { %13015 = vst [vmem:[#allocation43_spill] sm:$0xff] %v11619_v7  ;;  %9013 = vmatprep.mubr.msk.f32.mxu1 %vm3796_vm4, %v11074_v23  ;;  %9163 = vmatprep.mubr.msk.f32.mxu0 %vm3796_vm4, %v11106_v50 }
 0x307   : > { %v11629_v33 = vpop.f32.mrf.mxu1  ;;  %v11631_v25 = vpop.f32.mrf.mxu0 }
 0x308   : > { %13016 = vst [vmem:[#allocation22_spill] sm:$0xff] %v11631_v25 }
 0x309   : > { %v11633_v36 = vpop.f32.mrf.mxu1  ;;  %v11635_v42 = vpop.f32.mrf.mxu0  ;;  %9014 = vmatmul.mubr.msk.f32.gmra.mxu1 %vm3796_vm4, %v11082_v21  ;;  %9164 = vmatmul.mubr.msk.f32.gmra.mxu0 %vm3796_vm4, %v11114_v46 }
 0x30a   : > { %13017 = vst [vmem:[#allocation23_spill] sm:$0xff] %v11635_v42  ;;  %9016 = vmatprep.mubr.msk.f32.mxu1 %vm3796_vm4, %v11091_v0  ;;  %9166 = vmatprep.mubr.msk.f32.mxu0 %vm3796_vm4, %v11388_v35  ;;  %v9196_v42 = vld [vmem:[#allocation3 + $0x20] sm:$0xff] }
 0x30b   : > { %v11645_v7 = vpop.f32.mrf.mxu1  ;;  %v11647_v48 = vpop.f32.mrf.mxu0 }
 0x30c   : > { %13018 = vst [vmem:[#allocation46_spill] sm:$0xff] %v11647_v48  ;;  %v9197_v48 = vld [vmem:[#allocation3 + $0x28] sm:$0xff] }
 0x30d   : > { %v11649_v25 = vpop.f32.mrf.mxu1  ;;  %v11651_v43 = vpop.f32.mrf.mxu0  ;;  %9017 = vmatmul.mubr.msk.f32.gmra.mxu1 %vm3796_vm4, %v11098_v44  ;;  %9167 = vmatmul.mubr.msk.f32.gmra.mxu0 %vm3796_vm4, %v11398_v14  ;;  %v9199_v14 = vld [vmem:[#allocation3 + $0x38] sm:$0xff] }
 0x30e   : > { %13019 = vst [vmem:[#allocation24_spill] sm:$0xff] %v11649_v25  ;;  %13020 = vst [vmem:[#allocation25_spill] sm:$0xff] %v11651_v43  ;;  %9071 = vmatprep.mubr.msk.f32.mxu1 %vm3796_vm4, %v9196_v42 }
 0x30f   : > { %v11658_v5 = vpop.f32.mrf.mxu1  ;;  %v11660_v24 = vpop.f32.mrf.mxu0 }
 0x310   : > { %13021 = vst [vmem:[#allocation47_spill] sm:$0xff] %v11658_v5  ;;  %13022 = vst [vmem:[#allocation26_spill] sm:$0xff] %v11660_v24 }
 0x311   : > { %v8773_v9 = vpop.f32.mrf.mxu1  ;;  %v11662_v16 = vpop.f32.mrf.mxu0  ;;  %9072 = vmatmul.mubr.msk.f32.vlgmr.msra.gmra.mxu1 %vm3796_vm4, %v9197_v48 }
 0x312   : > { %13023 = vst [vmem:[#allocation27_spill] sm:$0xff] %v11662_v16  ;;  %v11666_v43 = vadd.f32 %v8773_v9, %v11408_v51  ;;  %9074 = vmatprep.mubr.msk.f32.mxu1 %vm3796_vm4, %v9198_v40  ;;  %v9200_v51 = vld [vmem:[#allocation3 + $0x40] sm:$0xff]  ;;  %v9201_v16 = vld [vmem:[#allocation3 + $0x48] sm:$0xff] }
 0x313   : > { %v4396_v57 = vpop.f32.mrf.mxu1  ;;  %v11669_v25 = vpop.f32.mrf.mxu0 }
 0x314   : > { %13024 = vst [vmem:[#allocation48_spill] sm:$0xff] %v11669_v25  ;;  %v11672_v42 = vadd.f32 %v4396_v57, %v11421_v39 }
 0x315   : > { %v8776_v5 = vpop.f32.mrf.mxu1  ;;  %v11674_v24 = vpop.f32.mrf.mxu0  ;;  %9075 = vmatmul.mubr.msk.f32.gmra.mxu1 %vm3796_vm4, %v9199_v14 }
 0x316   : > { %13025 = vst [vmem:[#allocation28_spill] sm:$0xff] %v11674_v24  ;;  %v11678_v48 = vadd.f32 %v8776_v5, %v11425_v52  ;;  %9077 = vmatprep.mubr.msk.f32.mxu1 %vm3796_vm4, %v9200_v51  ;;  %v9202_v52 = vld [vmem:[#allocation3 + $0x50] sm:$0xff]  ;;  %v9203_v24 = vld [vmem:[#allocation3 + $0x58] sm:$0xff] }
 0x317   : > { %v4406_v9 = vpop.f32.mrf.mxu1  ;;  %v11681_v40 = vpop.f32.mrf.mxu0 }
 0x318   : > { %13026 = vst [vmem:[#allocation29_spill] sm:$0xff] %v11681_v40  ;;  %v11684_v25 = vadd.f32 %v4406_v9, %v11437_v56 }
 0x319   : > { %v8779_v57 = vpop.f32.mrf.mxu1  ;;  %v11686_v39 = vpop.f32.mrf.mxu0  ;;  %9078 = vmatmul.mubr.msk.f32.gmra.mxu1 %vm3796_vm4, %v9201_v16 }
 0x31a   : > { %v11690_v14 = vadd.f32 %v8779_v57, %v11441_v59  ;;  %9080 = vmatprep.mubr.msk.f32.mxu1 %vm3796_vm4, %v9202_v52 }
 0x31b   : > { %v4416_v5 = vpop.f32.mrf.mxu1  ;;  %v11693_v51 = vpop.f32.mrf.mxu0 }
 0x31c   : > { %v11696_v40 = vadd.f32 %v4416_v5, %v11453_v61 }
 0x31d   : > { %v8782_v56 = vpop.f32.mrf.mxu1  ;;  %v11698_v9 = vpop.f32.mrf.mxu0  ;;  %9081 = vmatmul.mubr.msk.f32.gmra.mxu1 %vm3796_vm4, %v9203_v24 }
 0x31e   : > { %v11702_v16 = vadd.f32 %v8782_v56, %v11457_v1  ;;  %9083 = vmatprep.mubr.msk.f32.mxu1 %vm3796_vm4, %v10888_v54 }
 0x31f   : > { %v4426_v59 = vpop.f32.mrf.mxu1  ;;  %v11706_v57 = vpop.f32.mrf.mxu0 }
 0x320   : > { %v11709_v52 = vadd.f32 %v4426_v59, %v11469_v22 }
 0x321   : > { %v8785_v61 = vpop.f32.mrf.mxu1  ;;  %v11711_v5 = vpop.f32.mrf.mxu0  ;;  %9084 = vmatmul.mubr.msk.f32.gmra.mxu1 %vm3796_vm4, %v10897_v20 }
 0x322   : > { %13027 = vst [vmem:[#allocation31_spill] sm:$0xff] %v11711_v5  ;;  %v11716_v24 = vadd.f32 %v8785_v61, %v11473_v19  ;;  %9086 = vmatprep.mubr.msk.f32.mxu1 %vm3796_vm4, %v10911_v30 }
 0x323   : > { %v4436_v1 = vpop.f32.mrf.mxu1  ;;  %v11720_v54 = vpop.f32.mrf.mxu0 }
 0x324   : > { %13028 = vst [vmem:[#allocation30_spill] sm:$0xff] %v11720_v54  ;;  %v11723_v56 = vadd.f32 %v4436_v1, %v11485_v27 }
 0x325   : > { %v8788_v22 = vpop.f32.mrf.mxu1  ;;  %v11725_v59 = vpop.f32.mrf.mxu0  ;;  %9087 = vmatmul.mubr.msk.f32.gmra.mxu1 %vm3796_vm4, %v10920_v45 }
 0x326   : > { %13029 = vst [vmem:[#allocation4_spill] sm:$0xff] %v11725_v59  ;;  %v11730_v20 = vadd.f32 %v8788_v22, %v11489_v55  ;;  %9089 = vmatprep.mubr.msk.f32.mxu1 %vm3796_vm4, %v10934_v13 }
 0x327   : > { %v4446_v19 = vpop.f32.mrf.mxu1  ;;  %v11734_v30 = vpop.f32.mrf.mxu0 }
 0x328   : > { %13030 = vst [vmem:[#allocation32_spill] sm:$0xff] %v11734_v30  ;;  %v11737_v61 = vadd.f32 %v4446_v19, %v11501_v15 }
 0x329   : > { %v8791_v27 = vpop.f32.mrf.mxu1  ;;  %v11739_v1 = vpop.f32.mrf.mxu0  ;;  %9090 = vmatmul.mubr.msk.f32.gmra.mxu1 %vm3796_vm4, %v10943_v11 }
 0x32a   : > { %13031 = vst [vmem:[#allocation5_spill] sm:$0xff] %v11739_v1  ;;  %v11744_v45 = vadd.f32 %v8791_v27, %v11505_v18  ;;  %9092 = vmatprep.mubr.msk.f32.mxu1 %vm3796_vm4, %v10957_v58 }
 0x32b   : > { %v4456_v55 = vpop.f32.mrf.mxu1  ;;  %v11748_v13 = vpop.f32.mrf.mxu0 }
 0x32c   : > { %13032 = vst [vmem:[#allocation33_spill] sm:$0xff] %v11748_v13  ;;  %v11751_v22 = vadd.f32 %v4456_v55, %v11517_v29 }
 0x32d   : > { %v8794_v15 = vpop.f32.mrf.mxu1  ;;  %v11753_v19 = vpop.f32.mrf.mxu0  ;;  %9093 = vmatmul.mubr.msk.f32.gmra.mxu1 %vm3796_vm4, %v10966_v17 }
 0x32e   : > { %13033 = vst [vmem:[#allocation53_spill] sm:$0xff] %v11753_v19  ;;  %v11758_v11 = vadd.f32 %v8794_v15, %v11521_v31  ;;  %9095 = vmatprep.mubr.msk.f32.mxu1 %vm3796_vm4, %v10980_v3 }
 0x32f   : > { %v4466_v18 = vpop.f32.mrf.mxu1  ;;  %v11762_v58 = vpop.f32.mrf.mxu0 }
 0x330   : > { %13034 = vst [vmem:[#allocation55_spill] sm:$0xff] %v11762_v58  ;;  %v11765_v27 = vadd.f32 %v4466_v18, %v11533_v49 }
 0x331   : > { %v8797_v29 = vpop.f32.mrf.mxu1  ;;  %v11767_v55 = vpop.f32.mrf.mxu0  ;;  %9096 = vmatmul.mubr.msk.f32.gmra.mxu1 %vm3796_vm4, %v10989_v38 }
 0x332   : > { %13035 = vst [vmem:[#allocation54_spill] sm:$0xff] %v11767_v55  ;;  %v11772_v17 = vadd.f32 %v8797_v29, %v11537_v10  ;;  %9098 = vmatprep.mubr.msk.f32.mxu1 %vm3796_vm4, %v11006_v62 }
 0x333   : > { %v4476_v31 = vpop.f32.mrf.mxu1  ;;  %v11776_v3 = vpop.f32.mrf.mxu0 }
 0x334   : > { %13036 = vst [vmem:[#allocation58_spill] sm:$0xff] %v11776_v3  ;;  %v11779_v15 = vadd.f32 %v4476_v31, %v11549_v28 }
 0x335   : > { %v8800_v49 = vpop.f32.mrf.mxu1  ;;  %v11781_v18 = vpop.f32.mrf.mxu0  ;;  %9099 = vmatmul.mubr.msk.f32.gmra.mxu1 %vm3796_vm4, %v11017_v26 }
 0x336   : > { %13037 = vst [vmem:[#allocation57_spill] sm:$0xff] %v11781_v18  ;;  %v11786_v38 = vadd.f32 %v8800_v49, %v11553_v47  ;;  %9101 = vmatprep.mubr.msk.f32.mxu1 %vm3796_vm4, %v11034_v37 }
 0x337   : > { %v4486_v10 = vpop.f32.mrf.mxu1  ;;  %v11790_v62 = vpop.f32.mrf.mxu0 }
 0x338   : > { %13038 = vst [vmem:[#allocation56_spill] sm:$0xff] %v11790_v62  ;;  %v11793_v29 = vadd.f32 %v4486_v10, %v11565_v12 }
 0x339   : > { %v8803_v28 = vpop.f32.mrf.mxu1  ;;  %v11795_v31 = vpop.f32.mrf.mxu0  ;;  %9102 = vmatmul.mubr.msk.f32.gmra.mxu1 %vm3796_vm4, %v11043_v63 }
 0x33a   : > { %13039 = vst [vmem:[#allocation61_spill] sm:$0xff] %v11795_v31  ;;  %v11800_v26 = vadd.f32 %v8803_v28, %v11569_v34  ;;  %9104 = vmatprep.mubr.msk.f32.mxu1 %vm3796_vm4, %v11056_v32 }
 0x33b   : > { %v4496_v47 = vpop.f32.mrf.mxu1  ;;  %v11804_v37 = vpop.f32.mrf.mxu0 }
 0x33c   : > { %13040 = vst [vmem:[#allocation60_spill] sm:$0xff] %v11804_v37  ;;  %v11807_v49 = vadd.f32 %v4496_v47, %v11581_v2 }
 0x33d   : > { %v8806_v12 = vpop.f32.mrf.mxu1  ;;  %v11809_v10 = vpop.f32.mrf.mxu0  ;;  %9105 = vmatmul.mubr.msk.f32.gmra.mxu1 %vm3796_vm4, %v11065_v60 }
 0x33e   : > { %13041 = vst [vmem:[#allocation59_spill] sm:$0xff] %v11809_v10  ;;  %v11814_v63 = vadd.f32 %v8806_v12, %v11585_v6  ;;  %9107 = vmatprep.mubr.msk.f32.mxu1 %vm3796_vm4, %v11074_v23 }
 0x33f   : > { %v4506_v34 = vpop.f32.mrf.mxu1  ;;  %v11818_v32 = vpop.f32.mrf.mxu0 }
 0x340   : > { %13042 = vst [vmem:[#allocation64_spill] sm:$0xff] %v11818_v32  ;;  %v11821_v28 = vadd.f32 %v4506_v34, %v11597_v41 }
 0x341   : > { %v8809_v2 = vpop.f32.mrf.mxu1  ;;  %v11823_v47 = vpop.f32.mrf.mxu0  ;;  %9108 = vmatmul.mubr.msk.f32.gmra.mxu1 %vm3796_vm4, %v11082_v21 }
 0x342   : > { %13043 = vst [vmem:[#allocation63_spill] sm:$0xff] %v11823_v47  ;;  %v11828_v60 = vadd.f32 %v8809_v2, %v11601_v4  ;;  %9110 = vmatprep.mubr.msk.f32.mxu1 %vm3796_vm4, %v11091_v0 }
 0x343   : > { %v4516_v6 = vpop.f32.mrf.mxu1  ;;  %v11832_v23 = vpop.f32.mrf.mxu0 }
 0x344   : > { %13044 = vst [vmem:[#allocation62_spill] sm:$0xff] %v11832_v23  ;;  %v11835_v12 = vadd.f32 %v4516_v6, %v11613_v8 }
 0x345   : > { %v8812_v41 = vpop.f32.mrf.mxu1  ;;  %v11837_v34 = vpop.f32.mrf.mxu0  ;;  %9111 = vmatmul.mubr.msk.f32.gmra.mxu1 %vm3796_vm4, %v11098_v44 }
 0x346   : > { %13045 = vst [vmem:[#allocation67_spill] sm:$0xff] %v11837_v34  ;;  %v11842_v21 = vadd.f32 %v8812_v41, %v11617_v53  ;;  %9113 = vmatprep.mubr.msk.f32.mxu1 %vm3796_vm4, %v11106_v50  ;;  %v13053_v34 = vld [vmem:[#allocation47_spill] sm:$0xff] }
 0x347   : > { %v4526_v4 = vpop.f32.mrf.mxu1  ;;  %v11846_v0 = vpop.f32.mrf.mxu0 }
 0x348   : > { %13046 = vst [vmem:[#allocation66_spill] sm:$0xff] %v11846_v0  ;;  %v11849_v2 = vadd.f32 %v4526_v4, %v11629_v33  ;;  %v13050_v0 = vld [vmem:[#allocation6_spill] sm:$0xff] }
 0x349   : > { %v8815_v8 = vpop.f32.mrf.mxu1  ;;  %v11851_v6 = vpop.f32.mrf.mxu0  ;;  %9114 = vmatmul.mubr.msk.f32.gmra.mxu1 %vm3796_vm4, %v11114_v46 }
 0x34a   : > { %13047 = vst [vmem:[#allocation65_spill] sm:$0xff] %v11851_v6  ;;  %v11856_v44 = vadd.f32 %v8815_v8, %v11633_v36  ;;  %9116 = vmatprep.mubr.msk.f32.mxu1 %vm3796_vm4, %v11388_v35  ;;  %v13051_v6 = vld [vmem:[#allocation24_spill] sm:$0xff] }
 0x34b   : > { %v4536_v53 = vpop.f32.mrf.mxu1  ;;  %v11860_v50 = vpop.f32.mrf.mxu0 }
 0x34c   : > { %13048 = vst [vmem:[#allocation70_spill] sm:$0xff] %v11860_v50  ;;  %v11863_v41 = vadd.f32 %v4536_v53, %v11645_v7 }
 0x34d   : > { %v8818_v33 = vpop.f32.mrf.mxu1  ;;  %v11865_v4 = vpop.f32.mrf.mxu0  ;;  %9117 = vmatmul.mubr.msk.f32.gmra.mxu1 %vm3796_vm4, %v13050_v0 }
 0x34e   : > { %13049 = vst [vmem:[#allocation69_spill] sm:$0xff] %v11865_v4  ;;  %v11870_v46 = vadd.f32 %v8818_v33, %v13051_v6 }
 0x34f   : > { %v4546_v36 = vpop.f32.mrf.mxu1  ;;  %v11872_v8 = vpop.f32.mrf.mxu0 }
 0x350   : > { %13052 = vst [vmem:[#allocation87_spill] sm:$0xff] %v11872_v8  ;;  %v11875_v35 = vadd.f32 %v4546_v36, %v13053_v34 }
 0x351   : > { %v11877_v23 = vpop.f32.mrf.mxu1  ;;  %v9023_v50 = vpop.f32.mrf.mxu0 }
 0x352   : > { %v5816_v7 = vadd.f32 %v9023_v50, %v11666_v43 }
 0x353   : > { %v11880_v53 = vpop.f32.mrf.mxu1  ;;  %v5656_v4 = vpop.f32.mrf.mxu0 }
 0x354   : > { %v11883_v47 = vadd.f32 %v5656_v4, %v11672_v42  ;;  %v6398_v8 = vrot.slane %v5816_v7, 7 }
 0x355   : > { %v11885_v0 = vpop.f32.mrf.mxu1  ;;  %v9026_v6 = vpop.f32.mrf.mxu0 }
 0x356   : > { %v12767_v33 = vrot.slane %v11883_v47, 7  ;;  %v5818_v34 = vadd.f32 %v9026_v6, %v11678_v48 }
 0x357   : > { %v11889_v36 = vpop.f32.mrf.mxu1  ;;  %v5666_v32 = vpop.f32.mrf.mxu0 }
 0x358   : > { %v11892_v10 = vadd.f32 %v5666_v32, %v11684_v25  ;;  %v11899_v42 = vsel %vm3391_vm2, %v12767_v33, %v6398_v8  ;;  %v6401_v37 = vrot.slane %v5818_v34, 7 }
 0x359   : > { %v11894_v43 = vpop.f32.mrf.mxu1  ;;  %v9029_v50 = vpop.f32.mrf.mxu0  ;;  %13054 = vst [vmem:[#allocation68_spill] sm:$0xff] %v11899_v42 }
 0x35a   : > { %v12768_v4 = vrot.slane %v11892_v10, 7  ;;  %v5820_v7 = vadd.f32 %v9029_v50, %v11690_v14 }
 0x35b   : > { %v11903_v48 = vpop.f32.mrf.mxu1  ;;  %v5676_v6 = vpop.f32.mrf.mxu0 }
 0x35c   : > { %v11906_v31 = vadd.f32 %v5676_v6, %v11696_v40  ;;  %v11913_v62 = vsel %vm3391_vm2, %v12768_v4, %v6401_v37  ;;  %v6404_v33 = vrot.slane %v5820_v7, 7 }
 0x35d   : > { %v11908_v25 = vpop.f32.mrf.mxu1  ;;  %v9032_v32 = vpop.f32.mrf.mxu0  ;;  %13055 = vst [vmem:[#allocation73_spill] sm:$0xff] %v11913_v62 }
 0x35e   : > { %v12769_v8 = vrot.slane %v11906_v31, 7  ;;  %v5822_v34 = vadd.f32 %v9032_v32, %v11702_v16 }
 0x35f   : > { %v11917_v14 = vpop.f32.mrf.mxu1  ;;  %v5686_v50 = vpop.f32.mrf.mxu0 }
 0x360   : > { %v11920_v18 = vadd.f32 %v5686_v50, %v11709_v52  ;;  %v11927_v3 = vsel %vm3391_vm2, %v12769_v8, %v6404_v33  ;;  %v6407_v4 = vrot.slane %v5822_v34, 7 }
 0x361   : > { %v11922_v40 = vpop.f32.mrf.mxu1  ;;  %v9035_v6 = vpop.f32.mrf.mxu0  ;;  %13056 = vst [vmem:[#allocation72_spill] sm:$0xff] %v11927_v3 }
 0x362   : > { %v12770_v37 = vrot.slane %v11920_v18, 7  ;;  %v5824_v7 = vadd.f32 %v9035_v6, %v11716_v24 }
 0x363   : > { %v11931_v16 = vpop.f32.mrf.mxu1  ;;  %v5696_v32 = vpop.f32.mrf.mxu0 }
 0x364   : > { %v11934_v55 = vadd.f32 %v5696_v32, %v11723_v56  ;;  %v11941_v58 = vsel %vm3391_vm2, %v12770_v37, %v6407_v4  ;;  %v6410_v8 = vrot.slane %v5824_v7, 7 }
 0x365   : > { %v11936_v52 = vpop.f32.mrf.mxu1  ;;  %v9038_v50 = vpop.f32.mrf.mxu0  ;;  %13057 = vst [vmem:[#allocation71_spill] sm:$0xff] %v11941_v58 }
 0x366   : > { %v12771_v33 = vrot.slane %v11934_v55, 7  ;;  %v5826_v34 = vadd.f32 %v9038_v50, %v11730_v20 }
 0x367   : > { %v11945_v24 = vpop.f32.mrf.mxu1  ;;  %v5706_v6 = vpop.f32.mrf.mxu0 }
 0x368   : > { %v11948_v3 = vadd.f32 %v5706_v6, %v11737_v61  ;;  %v11955_v19 = vsel %vm3391_vm2, %v12771_v33, %v6410_v8  ;;  %v6413_v37 = vrot.slane %v5826_v34, 7 }
 0x369   : > { %v11950_v56 = vpop.f32.mrf.mxu1  ;;  %v9041_v32 = vpop.f32.mrf.mxu0  ;;  %13058 = vst [vmem:[#allocation76_spill] sm:$0xff] %v11955_v19 }
 0x36a   : > { %v12772_v4 = vrot.slane %v11948_v3, 7  ;;  %v5828_v7 = vadd.f32 %v9041_v32, %v11744_v45 }
 0x36b   : > { %v11959_v20 = vpop.f32.mrf.mxu1  ;;  %v5716_v50 = vpop.f32.mrf.mxu0 }
 0x36c   : > { %v11962_v58 = vadd.f32 %v5716_v50, %v11751_v22  ;;  %v11969_v13 = vsel %vm3391_vm2, %v12772_v4, %v6413_v37  ;;  %v6416_v33 = vrot.slane %v5828_v7, 7 }
 0x36d   : > { %v11964_v61 = vpop.f32.mrf.mxu1  ;;  %v9044_v6 = vpop.f32.mrf.mxu0  ;;  %13059 = vst [vmem:[#allocation75_spill] sm:$0xff] %v11969_v13 }
 0x36e   : > { %v12773_v8 = vrot.slane %v11962_v58, 7  ;;  %v5830_v34 = vadd.f32 %v9044_v6, %v11758_v11 }
 0x36f   : > { %v11973_v45 = vpop.f32.mrf.mxu1  ;;  %v5726_v32 = vpop.f32.mrf.mxu0 }
 0x370   : > { %v11976_v19 = vadd.f32 %v5726_v32, %v11765_v27  ;;  %v11983_v62 = vsel %vm3391_vm2, %v12773_v8, %v6416_v33  ;;  %v6419_v4 = vrot.slane %v5830_v34, 7 }
 0x371   : > { %v11978_v22 = vpop.f32.mrf.mxu1  ;;  %v9047_v50 = vpop.f32.mrf.mxu0  ;;  %13060 = vst [vmem:[#allocation74_spill] sm:$0xff] %v11983_v62 }
 0x372   : > { %v12774_v37 = vrot.slane %v11976_v19, 7  ;;  %v5832_v7 = vadd.f32 %v9047_v50, %v11772_v17 }
 0x373   : > { %v11987_v11 = vpop.f32.mrf.mxu1  ;;  %v5736_v6 = vpop.f32.mrf.mxu0 }
 0x374   : > { %v11990_v13 = vadd.f32 %v5736_v6, %v11779_v15  ;;  %v11997_v1 = vsel %vm3391_vm2, %v12774_v37, %v6419_v4  ;;  %v6422_v8 = vrot.slane %v5832_v7, 7 }
 0x375   : > { %v11992_v27 = vpop.f32.mrf.mxu1  ;;  %v9050_v32 = vpop.f32.mrf.mxu0  ;;  %13061 = vst [vmem:[#allocation79_spill] sm:$0xff] %v11997_v1 }
 0x376   : > { %v12775_v33 = vrot.slane %v11990_v13, 7  ;;  %v5834_v34 = vadd.f32 %v9050_v32, %v11786_v38 }
 0x377   : > { %v12001_v17 = vpop.f32.mrf.mxu1  ;;  %v5746_v50 = vpop.f32.mrf.mxu0 }
 0x378   : > { %v12004_v62 = vadd.f32 %v5746_v50, %v11793_v29  ;;  %v12011_v42 = vsel %vm3391_vm2, %v12775_v33, %v6422_v8  ;;  %v6425_v37 = vrot.slane %v5834_v34, 7 }
 0x379   : > { %v12006_v15 = vpop.f32.mrf.mxu1  ;;  %v9053_v6 = vpop.f32.mrf.mxu0  ;;  %13062 = vst [vmem:[#allocation78_spill] sm:$0xff] %v12011_v42 }
 0x37a   : > { %v12776_v4 = vrot.slane %v12004_v62, 7  ;;  %v5836_v7 = vadd.f32 %v9053_v6, %v11800_v26 }
 0x37b   : > { %v12015_v38 = vpop.f32.mrf.mxu1  ;;  %v5756_v32 = vpop.f32.mrf.mxu0 }
 0x37c   : > { %v12018_v1 = vadd.f32 %v5756_v32, %v11807_v49  ;;  %v12025_v30 = vsel %vm3391_vm2, %v12776_v4, %v6425_v37  ;;  %v6428_v33 = vrot.slane %v5836_v7, 7 }
 0x37d   : > { %v12020_v29 = vpop.f32.mrf.mxu1  ;;  %v9056_v50 = vpop.f32.mrf.mxu0  ;;  %13063 = vst [vmem:[#allocation77_spill] sm:$0xff] %v12025_v30 }
 0x37e   : > { %v12777_v8 = vrot.slane %v12018_v1, 7  ;;  %v5838_v34 = vadd.f32 %v9056_v50, %v11814_v63 }
 0x37f   : > { %v12029_v26 = vpop.f32.mrf.mxu1  ;;  %v5766_v6 = vpop.f32.mrf.mxu0 }
 0x380   : > { %v12032_v42 = vadd.f32 %v5766_v6, %v11821_v28  ;;  %v12039_v59 = vsel %vm3391_vm2, %v12777_v8, %v6428_v33  ;;  %v6431_v4 = vrot.slane %v5838_v34, 7 }
 0x381   : > { %v12034_v49 = vpop.f32.mrf.mxu1  ;;  %v9059_v32 = vpop.f32.mrf.mxu0  ;;  %13064 = vst [vmem:[#allocation82_spill] sm:$0xff] %v12039_v59 }
 0x382   : > { %v12778_v37 = vrot.slane %v12032_v42, 7  ;;  %v5840_v7 = vadd.f32 %v9059_v32, %v11828_v60 }
 0x383   : > { %v12043_v63 = vpop.f32.mrf.mxu1  ;;  %v5776_v50 = vpop.f32.mrf.mxu0 }
 0x384   : > { %v12046_v30 = vadd.f32 %v5776_v50, %v11835_v12  ;;  %v12053_v54 = vsel %vm3391_vm2, %v12778_v37, %v6431_v4  ;;  %v6434_v8 = vrot.slane %v5840_v7, 7 }
 0x385   : > { %v12048_v28 = vpop.f32.mrf.mxu1  ;;  %v9062_v6 = vpop.f32.mrf.mxu0  ;;  %13066 = vst [vmem:[#allocation80_spill] sm:$0xff] %v12053_v54 }
 0x386   : > { %13065 = vst [vmem:[#allocation81_spill] sm:$0xff] %v12046_v30  ;;  %v12779_v33 = vrot.slane %v12046_v30, 7  ;;  %v5842_v34 = vadd.f32 %v9062_v6, %v11842_v21 }
 0x387   : > { %v12057_v60 = vpop.f32.mrf.mxu1  ;;  %v5786_v32 = vpop.f32.mrf.mxu0 }
 0x388   : > { %13067 = vst [vmem:[#allocation85_spill] sm:$0xff] %v12057_v60  ;;  %v12060_v59 = vadd.f32 %v5786_v32, %v11849_v2  ;;  %v12067_v5 = vsel %vm3391_vm2, %v12779_v33, %v6434_v8  ;;  %v6437_v37 = vrot.slane %v5842_v34, 7 }
 0x389   : > { %v12062_v12 = vpop.f32.mrf.mxu1  ;;  %v9065_v50 = vpop.f32.mrf.mxu0  ;;  %13070 = vst [vmem:[#allocation89_spill] sm:$0xff] %v12067_v5 }
 0x38a   : > { %13068 = vst [vmem:[#allocation84_spill] sm:$0xff] %v12060_v59  ;;  %13069 = vst [vmem:[#allocation83_spill] sm:$0xff] %v12062_v12  ;;  %v12780_v4 = vrot.slane %v12060_v59, 7  ;;  %v5844_v7 = vadd.f32 %v9065_v50, %v11856_v44 }
 0x38b   : > { %v12071_v21 = vpop.f32.mrf.mxu1  ;;  %v5796_v6 = vpop.f32.mrf.mxu0 }
 0x38c   : > { %13071 = vst [vmem:[#allocation88_spill] sm:$0xff] %v12071_v21  ;;  %v12074_v54 = vadd.f32 %v5796_v6, %v11863_v41  ;;  %v12081_v12 = vsel %vm3391_vm2, %v12780_v4, %v6437_v37  ;;  %v6440_v33 = vrot.slane %v5844_v7, 7 }
 0x38d   : > { %v12076_v2 = vpop.f32.mrf.mxu1  ;;  %v9068_v32 = vpop.f32.mrf.mxu0  ;;  %13074 = vst [vmem:[#allocation91_spill] sm:$0xff] %v12081_v12 }
 0x38e   : > { %13072 = vst [vmem:[#allocation86_spill] sm:$0xff] %v12074_v54  ;;  %13073 = vst [vmem:[#allocation92_spill] sm:$0xff] %v12076_v2  ;;  %v12781_v8 = vrot.slane %v12074_v54, 7  ;;  %v5846_v34 = vadd.f32 %v9068_v32, %v11870_v46 }
 0x38f   : > { %v12085_v44 = vpop.f32.mrf.mxu1  ;;  %v5806_v50 = vpop.f32.mrf.mxu0 }
 0x390   : > { %13075 = vst [vmem:[#allocation90_spill] sm:$0xff] %v12085_v44  ;;  %v12088_v5 = vadd.f32 %v5806_v50, %v11875_v35  ;;  %v12097_v37 = vsel %vm3391_vm2, %v12781_v8, %v6440_v33  ;;  %v6443_v4 = vrot.slane %v5846_v34, 7 }
 0x391   : > { %v12090_v41 = vpop.f32.mrf.mxu1  ;;  %v12092_v6 = vpop.f32.mrf.mxu0  ;;  %13077 = vst [vmem:[#allocation94_spill] sm:$0xff] %v12097_v37 }
 0x392   : > { %13076 = vst [vmem:[#allocation95_spill] sm:$0xff] %v12088_v5  ;;  %v12784_v12 = vrot.slane %v12088_v5, 7 }
 0x393   : > { %v12100_v46 = vpop.f32.mrf.mxu1  ;;  %v12102_v7 = vpop.f32.mrf.mxu0 }
 0x394   : > { %v12107_v35 = vsel %vm3391_vm2, %v12784_v12, %v6443_v4 }
 0x395   : > { %13078 = vst [vmem:[#allocation93_spill] sm:$0xff] %v12107_v35  ;;  %v12109_v32 = vpop.f32.mrf.mxu1  ;;  %v12111_v50 = vpop.f32.mrf.mxu0 }
 0x396   : > { %13079 = vst [vmem:[#allocation98_spill] sm:$0xff] %v12111_v50 }
 0x397   : > { %v12113_v44 = vpop.f32.mrf.mxu1  ;;  %v12117_v34 = vpop.f32.mrf.mxu0 }
 0x398   : > { %13080 = vst [vmem:[#allocation97_spill] sm:$0xff] %v12117_v34 }
 0x399   : > { %v12115_v33 = vpop.f32.mrf.mxu1  ;;  %v12123_v54 = vpop.f32.mrf.mxu0 }
 0x39a   : > { %13081 = vst [vmem:[#allocation49_spill] sm:$0xff] %v12123_v54 }
 0x39b   : > { %v12119_v8 = vpop.f32.mrf.mxu1  ;;  %v12129_v12 = vpop.f32.mrf.mxu0 }
 0x39c   : > { %13083 = vst [vmem:[#allocation96_spill] sm:$0xff] %v12129_v12 }
 0x39d   : > { %v12121_v37 = vpop.f32.mrf.mxu1  ;;  %v12135_v21 = vpop.f32.mrf.mxu0 }
 0x39e   : > { %13086 = vst [vmem:[#allocation50_spill] sm:$0xff] %v12135_v21 }
 0x39f   : > { %v12125_v5 = vpop.f32.mrf.mxu1  ;;  %v12141_v30 = vpop.f32.mrf.mxu0 }
 0x3a0   : > { %13089 = vst [vmem:[#allocation103_spill] sm:$0xff] %v12141_v30 }
 0x3a1   : > { %v12127_v4 = vpop.f32.mrf.mxu1  ;;  %v12147_v50 = vpop.f32.mrf.mxu0 }
 0x3a2   : > { %13082 = vst [vmem:[#allocation51_spill] sm:$0xff] %v12127_v4  ;;  %13092 = vst [vmem:[#allocation24_spill] sm:$0xff] %v12147_v50 }
 0x3a3   : > { %v12131_v35 = vpop.f32.mrf.mxu1 }
 0x3a4   : > { %13084 = vst [vmem:[#allocation101_spill] sm:$0xff] %v12131_v35  ;;  %v12153_v35 = vpop.f32.mrf.mxu0 }
 0x3a5   : > { %v12133_v2 = vpop.f32.mrf.mxu1  ;;  %13095 = vst [vmem:[#allocation105_spill] sm:$0xff] %v12153_v35  ;;  %v13105_v35 = vld [vmem:[#allocation35_spill] sm:$0xff] }
 0x3a6   : > { %13085 = vst [vmem:[#allocation100_spill] sm:$0xff] %v12133_v2 }
 0x3a7   : > { %v12137_v59 = vpop.f32.mrf.mxu1 }
 0x3a8   : > { %13087 = vst [vmem:[#allocation52_spill] sm:$0xff] %v12137_v59  ;;  %v12159_v59 = vpop.f32.mrf.mxu0 }
 0x3a9   : > { %v12139_v60 = vpop.f32.mrf.mxu1  ;;  %13098 = vst [vmem:[#allocation108_spill] sm:$0xff] %v12159_v59 }
 0x3aa   : > { %13088 = vst [vmem:[#allocation99_spill] sm:$0xff] %v12139_v60 }
 0x3ab   : > { %v12143_v34 = vpop.f32.mrf.mxu1 }
 0x3ac   : > { %13090 = vst [vmem:[#allocation102_spill] sm:$0xff] %v12143_v34  ;;  %v12165_v34 = vpop.f32.mrf.mxu0 }
 0x3ad   : > { %v12145_v54 = vpop.f32.mrf.mxu1 }
 0x3ae   : > { %13091 = vst [vmem:[#allocation6_spill] sm:$0xff] %v12145_v54 }
 0x3af   : > { %v12149_v4 = vpop.f32.mrf.mxu1 }
 0x3b0   : > { %13093 = vst [vmem:[#allocation47_spill] sm:$0xff] %v12149_v4  ;;  %v12171_v4 = vpop.f32.mrf.mxu0 }
 0x3b1   : > { %v12151_v12 = vpop.f32.mrf.mxu1  ;;  %13103 = vst [vmem:[#allocation113_spill] sm:$0xff] %v12171_v4  ;;  %v13109_v4 = vld [vmem:[#allocation38_spill] sm:$0xff] }
 0x3b2   : > { %13094 = vst [vmem:[#allocation104_spill] sm:$0xff] %v12151_v12 }
 0x3b3   : > { %v12155_v2 = vpop.f32.mrf.mxu1 }
 0x3b4   : > { %13096 = vst [vmem:[#allocation106_spill] sm:$0xff] %v12155_v2  ;;  %v12177_v2 = vadd.f32 %v11877_v23, %v13105_v35  ;;  %v13110_v23 = vrot.slane %v11892_v10, 7 }
 0x3b5   : > { %v12157_v21 = vpop.f32.mrf.mxu1 }
 0x3b6   : > { %13097 = vst [vmem:[#allocation107_spill] sm:$0xff] %v12157_v21  ;;  %v13106_v21 = vld [vmem:[#allocation7_spill] sm:$0xff]  ;;  %v12199_v35 = vsel %vm3391_vm2, 0.0, %v13110_v23  ;;  %v13117_v23 = vld [vmem:[#allocation36_spill] sm:$0xff] }
 0x3b7   : > { %v12161_v60 = vpop.f32.mrf.mxu1  ;;  %v12181_v59 = vadd.f32 %v11880_v53, %v13106_v21  ;;  %13111 = vst [vmem:[#allocation35_spill] sm:$0xff] %v12199_v35  ;;  %v13112_v53 = vld [vmem:[#allocation8_spill] sm:$0xff]  ;;  %v12222_v35 = vadd.f32 %v11917_v14, %v13117_v23  ;;  %v13124_v23 = vrot.slane %v11934_v55, 7  ;;  %v13129_v55 = vrot.slane %v11962_v58, 7 }
 0x3b8   : > { %13099 = vst [vmem:[#allocation109_spill] sm:$0xff] %v12161_v60  ;;  %v13107_v60 = vld [vmem:[#allocation34_spill] sm:$0xff]  ;;  %v12203_v21 = vadd.f32 %v11894_v43, %v13112_v53  ;;  %v12224_v43 = vpop.f32.mrf.mxu0  ;;  %v13118_v53 = vrot.slane %v11920_v18, 7 }
 0x3b9   : > { %v12163_v30 = vpop.f32.mrf.mxu1  ;;  %v12248_v18 = vsel %vm3391_vm2, 0.0, %v13124_v23  ;;  %v12270_v23 = vsel %vm3391_vm2, 0.0, %v13129_v55 }
 0x3ba   : > { %13100 = vst [vmem:[#allocation110_spill] sm:$0xff] %v12163_v30  ;;  %v12185_v30 = vadd.f32 %v11885_v0, %v13107_v60  ;;  %v13114_v60 = vld [vmem:[#allocation37_spill] sm:$0xff] }
 0x3bb   : > { %v12167_v54 = vpop.f32.mrf.mxu1 }
 0x3bc   : > { %13101 = vst [vmem:[#allocation111_spill] sm:$0xff] %v12167_v54  ;;  %v13108_v54 = vrot.slane %v11883_v47, 7  ;;  %v12209_v47 = vadd.f32 %v11903_v48, %v13114_v60  ;;  %v12229_v48 = vsel %vm3391_vm2, 0.0, %v13118_v53  ;;  %v13120_v60 = vld [vmem:[#allocation10_spill] sm:$0xff]  ;;  %v13125_v53 = vld [vmem:[#allocation39_spill] sm:$0xff] }
 0x3bd   : > { %v12169_v50 = vpop.f32.mrf.mxu1  ;;  %13119 = vst [vmem:[#allocation34_spill] sm:$0xff] %v12229_v48  ;;  %v12252_v48 = vadd.f32 %v11945_v24, %v13125_v53  ;;  %v13130_v24 = vld [vmem:[#allocation41_spill] sm:$0xff] }
 0x3be   : > { %13102 = vst [vmem:[#allocation112_spill] sm:$0xff] %v12169_v50  ;;  %v12190_v50 = vsel %vm3391_vm2, 0.0, %v13108_v54  ;;  %v13115_v54 = vrot.slane %v11906_v31, 7  ;;  %v12233_v31 = vadd.f32 %v11922_v40, %v13120_v60  ;;  %v13126_v40 = vrot.slane %v11948_v3, 7  ;;  %v13127_v60 = vld [vmem:[#allocation12_spill] sm:$0xff]  ;;  %v13132_v3 = vld [vmem:[#allocation14_spill] sm:$0xff] }
 0x3bf   : > { %v12173_v12 = vpop.f32.mrf.mxu1  ;;  %v12274_v53 = vadd.f32 %v11964_v61, %v13130_v24  ;;  %v13137_v61 = vld [vmem:[#allocation48_spill] sm:$0xff] }
 0x3c0   : > { %13104 = vst [vmem:[#allocation114_spill] sm:$0xff] %v12173_v12  ;;  %v12194_v12 = vadd.f32 %v11889_v36, %v13109_v4  ;;  %v12214_v36 = vsel %vm3391_vm2, 0.0, %v13115_v54  ;;  %v13116_v4 = vld [vmem:[#allocation9_spill] sm:$0xff]  ;;  %v13121_v54 = vld [vmem:[#allocation40_spill] sm:$0xff]  ;;  %v5301_v24 = vadd.f32 %v12100_v46, %v13137_v61  ;;  %v13145_v61 = vld [vmem:[#allocation18_spill] sm:$0xff] }
 0x3c1   : > { %v12205_v0 = vpop.f32.mrf.mxu1  ;;  %v12218_v10 = vadd.f32 %v11908_v25, %v13116_v4  ;;  %v13122_v25 = vld [vmem:[#allocation11_spill] sm:$0xff]  ;;  %13131 = vst [vmem:[#allocation8_spill] sm:$0xff] %v12274_v53  ;;  %v12295_v53 = vpop.f32.mrf.mxu0 }
 0x3c2   : > { %13113 = vst [vmem:[#allocation7_spill] sm:$0xff] %v12205_v0  ;;  %v12237_v0 = vadd.f32 %v11931_v16, %v13121_v54  ;;  %v12241_v4 = vadd.f32 %v11936_v52, %v13122_v25  ;;  %v12257_v16 = vsel %vm3391_vm2, 0.0, %v13126_v40  ;;  %v12261_v52 = vadd.f32 %v11950_v56, %v13127_v60  ;;  %v13128_v54 = vld [vmem:[#allocation13_spill] sm:$0xff]  ;;  %v13135_v60 = vld [vmem:[#allocation15_spill] sm:$0xff] }
 0x3c3   : > { %v12243_v14 = vpop.f32.mrf.mxu1  ;;  %v12265_v25 = vadd.f32 %v11959_v20, %v13128_v54  ;;  %v12278_v40 = vadd.f32 %v11973_v45, %v13132_v3  ;;  %v13134_v56 = vrot.slane %v11976_v19, 7  ;;  %v12289_v58 = vadd.f32 %v11978_v22, %v13135_v60  ;;  %v13136_v54 = vld [vmem:[#allocation27_spill] sm:$0xff]  ;;  %v13138_v45 = vld [vmem:[#allocation42_spill] sm:$0xff]  ;;  %v13142_v60 = vld [vmem:[#allocation17_spill] sm:$0xff] }
 0x3c4   : > { %13123 = vst [vmem:[#allocation38_spill] sm:$0xff] %v12243_v14  ;;  %v5306_v55 = vadd.f32 %v12090_v41, %v13136_v54  ;;  %v12299_v3 = vadd.f32 %v11987_v11, %v13138_v45  ;;  %v13139_v19 = vrot.slane %v11990_v13, 7  ;;  %v12312_v41 = vadd.f32 %v12001_v17, %v13142_v60  ;;  %v13146_v45 = vld [vmem:[#allocation28_spill] sm:$0xff] }
 0x3c5   : > { %v12280_v14 = vpop.f32.mrf.mxu1  ;;  %v12285_v20 = vsel %vm3391_vm2, 0.0, %v13134_v56  ;;  %v13144_v54 = vrot.slane %v12004_v62, 7  ;;  %v12323_v13 = vadd.f32 %v12006_v15, %v13145_v61  ;;  %v13149_v60 = vrot.slane %v12018_v1, 7  ;;  %v13152_v61 = vld [vmem:[#allocation20_spill] sm:$0xff] }
 0x3c6   : > { %13133 = vst [vmem:[#allocation37_spill] sm:$0xff] %v12280_v14  ;;  %v12304_v56 = vsel %vm3391_vm2, 0.0, %v13139_v19  ;;  %v13140_v14 = vld [vmem:[#allocation16_spill] sm:$0xff]  ;;  %v5316_v19 = vadd.f32 %v12109_v32, %v13146_v45  ;;  %v5326_v15 = vadd.f32 %v12115_v33, %v11686_v39  ;;  %v6333_v1 = vadd.f32 %v12102_v7, %v5301_v24  ;;  %v12354_v45 = vpop.f32.mrf.mxu0  ;;  %v13163_v24 = vld [vmem:[#allocation98_spill] sm:$0xff] }
 0x3c7   : > { %v12308_v22 = vadd.f32 %v11992_v27, %v13140_v14  ;;  %v12314_v46 = vpop.f32.mrf.mxu1  ;;  %v12319_v11 = vsel %vm3391_vm2, 0.0, %v13144_v54  ;;  %v13147_v27 = vld [vmem:[#allocation29_spill] sm:$0xff]  ;;  %v12336_v62 = vsel %vm3391_vm2, 0.0, %v13149_v60  ;;  %v13156_v39 = vld [vmem:[#allocation44_spill] sm:$0xff] }
 0x3c8   : > { %13143 = vst [vmem:[#allocation36_spill] sm:$0xff] %v12314_v46  ;;  %v5311_v14 = vadd.f32 %v12113_v44, %v13147_v27  ;;  %v13150_v54 = vld [vmem:[#allocation45_spill] sm:$0xff]  ;;  %v12348_v44 = vadd.f32 %v12029_v26, %v13152_v61  ;;  %v12363_v33 = vadd.f32 %v12034_v49, %v13156_v39  ;;  %v5336_v26 = vadd.f32 %v12121_v37, %v11698_v9 }
 0x3c9   : > { %13141 = vst [vmem:[#allocation9_spill] sm:$0xff] %v12308_v22  ;;  %v13148_v22 = vld [vmem:[#allocation19_spill] sm:$0xff]  ;;  %v12340_v46 = vadd.f32 %v12020_v29, %v13150_v54  ;;  %v12344_v32 = vpop.f32.mrf.mxu1  ;;  %v13154_v29 = vrot.slane %v12032_v42, 7  ;;  %v6336_v60 = vadd.f32 %v13163_v24, %v5316_v19  ;;  %v13164_v49 = vld [vmem:[#allocation97_spill] sm:$0xff] }
 0x3ca   : > { %v12331_v17 = vadd.f32 %v12015_v38, %v13148_v22  ;;  %13151 = vst [vmem:[#allocation10_spill] sm:$0xff] %v12344_v32  ;;  %13153 = vst [vmem:[#allocation40_spill] sm:$0xff] %v12348_v44  ;;  %v6334_v38 = vadd.f32 %v12092_v6, %v5306_v55  ;;  %v5321_v22 = vadd.f32 %v12119_v8, %v11693_v51  ;;  %v13159_v51 = vld [vmem:[#allocation21_spill] sm:$0xff]  ;;  %v13161_v42 = vld [vmem:[#allocation43_spill] sm:$0xff] }
 0x3cb   : > { %v12359_v27 = vsel %vm3391_vm2, 0.0, %v13154_v29  ;;  %13157 = vst [vmem:[#allocation39_spill] sm:$0xff] %v12363_v33  ;;  %v5331_v6 = vadd.f32 %v12125_v5, %v11706_v57  ;;  %v12369_v7 = vpop.f32.mrf.mxu1  ;;  %v12373_v8 = vadd.f32 %v12043_v63, %v13159_v51  ;;  %v12377_v55 = vadd.f32 %v12048_v28, %v13161_v42  ;;  %v13165_v61 = vld [vmem:[#allocation81_spill] sm:$0xff]  ;;  %v13168_v57 = vld [vmem:[#allocation22_spill] sm:$0xff]  ;;  %v13172_v51 = vld [vmem:[#allocation31_spill] sm:$0xff] }
 0x3cc   : > { %13155 = vst [vmem:[#allocation11_spill] sm:$0xff] %v12359_v27  ;;  %13158 = vst [vmem:[#allocation12_spill] sm:$0xff] %v12369_v7  ;;  %v6335_v54 = vadd.f32 %v13164_v49, %v5311_v14  ;;  %v13166_v29 = vrot.slane %v13165_v61, 7  ;;  %v13169_v5 = vld [vmem:[#allocation85_spill] sm:$0xff]  ;;  %v13175_v42 = vld [vmem:[#allocation23_spill] sm:$0xff]  ;;  %v6558_v14 = vrot.slane %v6334_v38, 1 }
 0x3cd   : > { %13160 = vst [vmem:[#allocation13_spill] sm:$0xff] %v12373_v8  ;;  %13162 = vst [vmem:[#allocation41_spill] sm:$0xff] %v12377_v55  ;;  %v12388_v37 = vadd.f32 %v13169_v5, %v13168_v57  ;;  %v13171_v39 = vld [vmem:[#allocation49_spill] sm:$0xff]  ;;  %v13173_v8 = vld [vmem:[#allocation51_spill] sm:$0xff]  ;;  %v12393_v28 = vpop.f32.mrf.mxu1  ;;  %v6557_v49 = vrot.slane %v6333_v1, 1  ;;  %v12400_v55 = vpop.f32.mrf.mxu0 }
 0x3ce   : > { %v12384_v9 = vsel %vm3391_vm2, 0.0, %v13166_v29  ;;  %v6338_v63 = vadd.f32 %v13171_v39, %v5326_v15  ;;  %v5346_v33 = vadd.f32 %v13173_v8, %v13172_v51  ;;  %13174 = vst [vmem:[#allocation27_spill] sm:$0xff] %v12393_v28  ;;  %v13176_v19 = vld [vmem:[#allocation83_spill] sm:$0xff]  ;;  %v13178_v61 = vld [vmem:[#allocation96_spill] sm:$0xff]  ;;  %v13182_v15 = vld [vmem:[#allocation50_spill] sm:$0xff] }
 0x3cf   : > { %13167 = vst [vmem:[#allocation14_spill] sm:$0xff] %v12384_v9  ;;  %13170 = vst [vmem:[#allocation15_spill] sm:$0xff] %v12388_v37  ;;  %v12397_v24 = vadd.f32 %v13176_v19, %v13175_v42  ;;  %v6337_v29 = vadd.f32 %v13178_v61, %v5321_v22  ;;  %v13179_v9 = vld [vmem:[#allocation84_spill] sm:$0xff]  ;;  %v6340_v39 = vadd.f32 %v13182_v15, %v5336_v26  ;;  %v13183_v8 = vld [vmem:[#allocation103_spill] sm:$0xff]  ;;  %v12411_v42 = vpop.f32.mrf.mxu1 }
 0x3d0   : > { %v13180_v57 = vrot.slane %v13179_v9, 7  ;;  %v6339_v51 = vadd.f32 %v13183_v8, %v5331_v6  ;;  %v13184_v37 = vld [vmem:[#allocation30_spill] sm:$0xff]  ;;  %v13185_v28 = vld [vmem:[#allocation101_spill] sm:$0xff]  ;;  %13186 = vst [vmem:[#allocation16_spill] sm:$0xff] %v12411_v42  ;;  %v13188_v1 = vld [vmem:[#allocation88_spill] sm:$0xff]  ;;  %v6561_v9 = vrot.slane %v6336_v60, 1 }
 0x3d1   : > { %13177 = vst [vmem:[#allocation48_spill] sm:$0xff] %v12397_v24  ;;  %v5341_v7 = vadd.f32 %v13185_v28, %v13184_v37  ;;  %v13187_v38 = vld [vmem:[#allocation46_spill] sm:$0xff]  ;;  %v13190_v22 = vld [vmem:[#allocation25_spill] sm:$0xff]  ;;  %v13191_v61 = vld [vmem:[#allocation92_spill] sm:$0xff]  ;;  %v6564_v6 = vrot.slane %v6338_v63, 1  ;;  %v9073_v32 = vpop.f32.mrf.mxu1 }
 0x3d2   : > { %v12405_v5 = vsel %vm3391_vm2, 0.0, %v13180_v57  ;;  %v12415_v19 = vadd.f32 %v13188_v1, %v13187_v38  ;;  %v12419_v24 = vadd.f32 %v13191_v61, %v13190_v22  ;;  %v6560_v57 = vrot.slane %v6335_v54, 1  ;;  %v13196_v15 = vld [vmem:[#allocation24_spill] sm:$0xff] }
 0x3d3   : > { %13181 = vst [vmem:[#allocation42_spill] sm:$0xff] %v12405_v5  ;;  %v13193_v5 = vld [vmem:[#allocation86_spill] sm:$0xff]  ;;  %v6342_v37 = vadd.f32 %v13196_v15, %v5346_v33  ;;  %v13197_v28 = vld [vmem:[#allocation4_spill] sm:$0xff]  ;;  %v6637_v38 = vsel %vm3572_vm3, %v6558_v14, 0.0  ;;  %v6563_v1 = vrot.slane %v6337_v29, 1  ;;  %v6075_v60 = vadd.f32 %v9073_v32, %v12177_v2  ;;  %v5915_v15 = vpop.f32.mrf.mxu1 }
 0x3d4   : > { %13189 = vst [vmem:[#allocation17_spill] sm:$0xff] %v12415_v19  ;;  %13192 = vst [vmem:[#allocation18_spill] sm:$0xff] %v12419_v24  ;;  %v13194_v27 = vrot.slane %v13193_v5, 7  ;;  %v13198_v8 = vld [vmem:[#allocation100_spill] sm:$0xff]  ;;  %v12430_v19 = vpop.f32.mrf.mxu0  ;;  %v6559_v54 = vsel %vm3572_vm3, %v6557_v49, %v6558_v14  ;;  %v6567_v5 = vrot.slane %v6340_v39, 1  ;;  %v6566_v22 = vrot.slane %v6339_v51, 1 }
 0x3d5   : > { %v5356_v42 = vadd.f32 %v13198_v8, %v13197_v28  ;;  %v13200_v63 = vld [vmem:[#allocation32_spill] sm:$0xff]  ;;  %v6638_v28 = vsel %vm3572_vm3, %v6561_v9, 0.0  ;;  %v6074_v29 = vadd.f32 %v5915_v15, %v12181_v59  ;;  %v6562_v44 = vsel %vm3572_vm3, %v6560_v57, %v6561_v9  ;;  %v13204_v39 = vld [vmem:[#allocation5_spill] sm:$0xff]  ;;  %v13205_v51 = vld [vmem:[#allocation99_spill] sm:$0xff] }
 0x3d6   : > { %v12424_v26 = vsel %vm3391_vm2, 0.0, %v13194_v27  ;;  %v13199_v27 = vld [vmem:[#allocation105_spill] sm:$0xff]  ;;  %v13202_v8 = vld [vmem:[#allocation68_spill] sm:$0xff]  ;;  %v6639_v2 = vsel %vm3572_vm3, %v6564_v6, 0.0  ;;  %v6570_v32 = vrot.slane %v6342_v37, 1  ;;  %v6565_v57 = vsel %vm3572_vm3, %v6563_v1, %v6564_v6 }
 0x3d7   : > { %13195 = vst [vmem:[#allocation28_spill] sm:$0xff] %v12424_v26  ;;  %v6341_v61 = vadd.f32 %v13199_v27, %v5341_v7  ;;  %v13201_v26 = vld [vmem:[#allocation52_spill] sm:$0xff]  ;;  %v6494_v24 = vadd.f32 %v13202_v8, %v6075_v60  ;;  %v5366_v7 = vadd.f32 %v13205_v51, %v13204_v39  ;;  %v9076_v27 = vpop.f32.mrf.mxu1  ;;  %v6493_v59 = vadd.f32 %v12190_v50, %v6074_v29  ;;  %v13207_v1 = vld [vmem:[#allocation113_spill] sm:$0xff] }
 0x3d8   : > { %v5351_v33 = vadd.f32 %v13201_v26, %v13200_v63  ;;  %v13203_v14 = vld [vmem:[#allocation108_spill] sm:$0xff]  ;;  %v12450_v63 = vpop.f32.mrf.mxu0  ;;  %v6077_v9 = vadd.f32 %v9076_v27, %v12185_v30  ;;  %v12464_v30 = vsel %vm3572_vm3, %v6570_v32, 0.0  ;;  %v13210_v27 = vld [vmem:[#allocation35_spill] sm:$0xff] }
 0x3d9   : > { %v6344_v49 = vadd.f32 %v13203_v14, %v5356_v42  ;;  %v12448_v26 = vld [vmem:[%s12761_s6] ss:$0 sm:$0xff]  ;;  %v6654_v60 = vadd.f32 %v6637_v38, %v6494_v24  ;;  %v6640_v42 = vsel %vm3572_vm3, %v6567_v5, 0.0  ;;  %v6569_v37 = vrot.slane %v6341_v61, 1  ;;  %v5925_v8 = vpop.f32.mrf.mxu1  ;;  %v13206_v24 = vld [vmem:[#allocation73_spill] sm:$0xff] }
 0x3da   : > { %v6343_v15 = vadd.f32 %v12165_v34, %v5351_v33  ;;  %v12458_v14 = vsel %vm3572_vm3, %v6566_v22, %v6567_v5  ;;  %v6653_v51 = vadd.f32 %v6559_v54, %v6493_v59  ;;  %v6496_v38 = vadd.f32 %v13206_v24, %v6077_v9  ;;  %v13208_v61 = vld [vmem:[#allocation33_spill] sm:$0xff]  ;;  %v13209_v34 = vld [vmem:[#allocation102_spill] sm:$0xff]  ;;  %v12478_v5 = vpop.f32.mrf.mxu0 }
 0x3db   : > { %v6693_v39 = vadd.f32 %v12448_v26, %v6654_v60  ;;  %v6076_v50 = vadd.f32 %v5925_v8, %v12194_v12  ;;  %v6573_v6 = vrot.slane %v6344_v49, 1  ;;  %v12467_v29 = vadd.f32 %v13207_v1, %v5366_v7  ;;  %v9079_v54 = vpop.f32.mrf.mxu1  ;;  %v13211_v59 = vld [vmem:[#allocation53_spill] sm:$0xff]  ;;  %v13212_v9 = vld [vmem:[#allocation6_spill] sm:$0xff] }
 0x3dc   : > { %v5361_v33 = vadd.f32 %v13209_v34, %v13208_v61  ;;  %v6692_v22 = vadd.f32 %v12448_v26, %v6653_v51  ;;  %v6656_v49 = vadd.f32 %v6638_v28, %v6496_v38  ;;  %v6572_v60 = vrot.slane %v6343_v15, 1 }
 0x3dd   : > { %v6725_v12 = vmax.f32 %v6693_v39, 0.0  ;;  %v6495_v7 = vadd.f32 %v13210_v27, %v6076_v50  ;;  %v5376_v8 = vadd.f32 %v13212_v9, %v13211_v59  ;;  %v6079_v24 = vadd.f32 %v9079_v54, %v12203_v21  ;;  %v5935_v1 = vpop.f32.mrf.mxu1  ;;  %v13213_v50 = vld [vmem:[#allocation72_spill] sm:$0xff]  ;;  %v13215_v27 = vld [vmem:[#allocation47_spill] sm:$0xff] }
 0x3de   : > { %v12486_v61 = vsel %vm3572_vm3, %v6569_v37, %v6570_v32  ;;  %v6724_v34 = vmax.f32 %v6692_v22, 0.0  ;;  %v6695_v39 = vadd.f32 %v12448_v26, %v6656_v49  ;;  %v6078_v28 = vadd.f32 %v5935_v1, %v12209_v47  ;;  %v12498_v37 = vpop.f32.mrf.mxu0  ;;  %v13216_v1 = vld [vmem:[#allocation71_spill] sm:$0xff] }
 0x3df   : > { %6757 = vst.msk [vmem:[%s12476_s8 + $0x8] sm:$0xff] %vm3796_vm4, %v6725_v12  ;;  %v6655_v51 = vadd.f32 %v6562_v44, %v6495_v7  ;;  %v12493_v15 = vsel %vm3572_vm3, %v6573_v6, 0.0  ;;  %v6576_v38 = vrot.slane %v12467_v29, 1  ;;  %v6345_v21 = vadd.f32 %v12224_v43, %v5361_v33  ;;  %v9082_v32 = vpop.f32.mrf.mxu1  ;;  %v13214_v29 = vld [vmem:[#allocation55_spill] sm:$0xff] }
 0x3e0   : > { %v6498_v54 = vadd.f32 %v13213_v50, %v6079_v24  ;;  %6756 = vst.msk [vmem:[%s12476_s8] sm:$0xff] %vm3796_vm4, %v6724_v34  ;;  %v6727_v12 = vmax.f32 %v6695_v39, 0.0  ;;  %v6497_v47 = vadd.f32 %v12214_v36, %v6078_v28  ;;  %v6081_v22 = vadd.f32 %v9082_v32, %v12218_v10  ;;  %v13217_v34 = vld [vmem:[#allocation54_spill] sm:$0xff]  ;;  %v13218_v39 = vld [vmem:[#allocation104_spill] sm:$0xff] }
 0x3e1   : > { %v6694_v44 = vadd.f32 %v12448_v26, %v6655_v51  ;;  %v12506_v49 = vadd.f32 %v12295_v53, %v5376_v8  ;;  %v5371_v43 = vadd.f32 %v13215_v27, %v13214_v29  ;;  %v5945_v7 = vpop.f32.mrf.mxu1  ;;  %v12511_v59 = vsel %vm3572_vm3, %v6572_v60, %v6573_v6  ;;  %v12523_v6 = vpop.f32.mrf.mxu0  ;;  %v13219_v50 = vld [vmem:[#allocation34_spill] sm:$0xff] }
 0x3e2   : > { %v6658_v33 = vadd.f32 %v6639_v2, %v6498_v54  ;;  %6759 = vst.msk [vmem:[%s12476_s8 + $0x18] sm:$0xff] %vm3796_vm4, %v6727_v12  ;;  %v6657_v24 = vadd.f32 %v6565_v57, %v6497_v47  ;;  %v6500_v36 = vadd.f32 %v13216_v1, %v6081_v22  ;;  %v6080_v10 = vadd.f32 %v5945_v7, %v12222_v35  ;;  %v13220_v12 = vld [vmem:[#allocation58_spill] sm:$0xff]  ;;  %v13224_v1 = vld [vmem:[#allocation107_spill] sm:$0xff] }
 0x3e3   : > { %v6726_v9 = vmax.f32 %v6694_v44, 0.0  ;;  %v12518_v53 = vsel %vm3572_vm3, %v6576_v38, 0.0  ;;  %v6575_v8 = vrot.slane %v6345_v21, 1  ;;  %v5386_v51 = vadd.f32 %v13218_v39, %v13217_v34  ;;  %v9085_v28 = vpop.f32.mrf.mxu1  ;;  %v13221_v44 = vld [vmem:[#allocation106_spill] sm:$0xff] }
 0x3e4   : > { %v6697_v2 = vadd.f32 %v12448_v26, %v6658_v33  ;;  %v6696_v57 = vadd.f32 %v12448_v26, %v6657_v24  ;;  %v6660_v60 = vadd.f32 %v6640_v42, %v6500_v36  ;;  %v6499_v35 = vadd.f32 %v13219_v50, %v6080_v10  ;;  %v13222_v42 = vld [vmem:[#allocation76_spill] sm:$0xff]  ;;  %v12544_v10 = vpop.f32.mrf.mxu0 }
 0x3e5   : > { %6758 = vst.msk [vmem:[%s12476_s8 + $0x10] sm:$0xff] %vm3796_vm4, %v6726_v9  ;;  %v6083_v54 = vadd.f32 %v9085_v28, %v12233_v31  ;;  %v6579_v21 = vrot.slane %v12506_v49, 1  ;;  %v6347_v32 = vadd.f32 %v12354_v45, %v5371_v43  ;;  %v5381_v47 = vadd.f32 %v13221_v44, %v13220_v12  ;;  %v5955_v29 = vpop.f32.mrf.mxu1  ;;  %v13223_v31 = vld [vmem:[#allocation57_spill] sm:$0xff] }
 0x3e6   : > { %v6729_v22 = vmax.f32 %v6697_v2, 0.0  ;;  %v6728_v27 = vmax.f32 %v6696_v57, 0.0  ;;  %v6699_v33 = vadd.f32 %v12448_v26, %v6660_v60  ;;  %v6659_v7 = vadd.f32 %v12458_v14, %v6499_v35  ;;  %v13225_v60 = vld [vmem:[#allocation75_spill] sm:$0xff]  ;;  %v12567_v44 = vpop.f32.mrf.mxu0 }
 0x3e7   : > { %v6502_v9 = vadd.f32 %v13222_v42, %v6083_v54  ;;  %v6350_v24 = vadd.f32 %v12400_v55, %v5386_v51  ;;  %v5396_v49 = vadd.f32 %v13224_v1, %v13223_v31  ;;  %v6082_v45 = vadd.f32 %v5955_v29, %v12237_v0  ;;  %v9088_v43 = vpop.f32.mrf.mxu1  ;;  %v13226_v54 = vld [vmem:[#allocation56_spill] sm:$0xff]  ;;  %v13230_v31 = vld [vmem:[#allocation74_spill] sm:$0xff] }
 0x3e8   : > { %6761 = vst.msk [vmem:[%s12476_s8 + $0x28] sm:$0xff] %vm3796_vm4, %v6729_v22  ;;  %v6577_v36 = vsel %vm3572_vm3, %v6575_v8, %v6576_v38  ;;  %6760 = vst.msk [vmem:[%s12476_s8 + $0x20] sm:$0xff] %vm3796_vm4, %v6728_v27  ;;  %v6731_v14 = vmax.f32 %v6699_v33, 0.0  ;;  %v6698_v34 = vadd.f32 %v12448_v26, %v6659_v7  ;;  %v6085_v39 = vadd.f32 %v9088_v43, %v12241_v4  ;;  %v13229_v33 = vld [vmem:[#allocation110_spill] sm:$0xff] }
 0x3e9   : > { %v6662_v55 = vadd.f32 %v12464_v30, %v6502_v9  ;;  %v12552_v51 = vsel %vm3572_vm3, %v6579_v21, 0.0  ;;  %v6578_v2 = vrot.slane %v6347_v32, 1  ;;  %v6349_v0 = vadd.f32 %v12430_v19, %v5381_v47  ;;  %v5965_v8 = vpop.f32.mrf.mxu1  ;;  %v13227_v32 = vld [vmem:[#allocation109_spill] sm:$0xff] }
 0x3ea   : > { %v6501_v38 = vadd.f32 %v12248_v18, %v6082_v45  ;;  %6763 = vst.msk [vmem:[%s12476_s8 + $0x38] sm:$0xff] %vm3796_vm4, %v6731_v14  ;;  %v6730_v28 = vmax.f32 %v6698_v34, 0.0  ;;  %v6504_v50 = vadd.f32 %v13225_v60, %v6085_v39  ;;  %v6084_v30 = vadd.f32 %v5965_v8, %v12252_v48  ;;  %v9159_v14 = vpop.f32.mrf.mxu0 }
 0x3eb   : > { %v6701_v57 = vadd.f32 %v12448_v26, %v6662_v55  ;;  %v6582_v4 = vrot.slane %v6350_v24, 1  ;;  %v12562_v35 = vadd.f32 %v12450_v63, %v5396_v49  ;;  %v5391_v19 = vadd.f32 %v13227_v32, %v13226_v54  ;;  %v9091_v12 = vpop.f32.mrf.mxu1  ;;  %v13228_v63 = vld [vmem:[#allocation61_spill] sm:$0xff]  ;;  %v13235_v54 = vld [vmem:[#allocation112_spill] sm:$0xff] }
 0x3ec   : > { %v6661_v18 = vadd.f32 %v12486_v61, %v6501_v38  ;;  %6762 = vst.msk [vmem:[%s12476_s8 + $0x30] sm:$0xff] %vm3796_vm4, %v6730_v28  ;;  %v6664_v22 = vadd.f32 %v12493_v15, %v6504_v50  ;;  %v6503_v48 = vadd.f32 %v12257_v16, %v6084_v30  ;;  %v6087_v29 = vadd.f32 %v9091_v12, %v12261_v52 }
 0x3ed   : > { %v6733_v47 = vmax.f32 %v6701_v57, 0.0  ;;  %v6581_v27 = vrot.slane %v6349_v0, 1  ;;  %v5406_v7 = vadd.f32 %v13229_v33, %v13228_v63  ;;  %v5975_v9 = vpop.f32.mrf.mxu1  ;;  %v6580_v61 = vsel %vm3572_vm3, %v6578_v2, %v6579_v21  ;;  %v13232_v0 = vld [vmem:[#allocation111_spill] sm:$0xff]  ;;  %v13238_v63 = vld [vmem:[#allocation114_spill] sm:$0xff] }
 0x3ee   : > { %v6700_v42 = vadd.f32 %v12448_v26, %v6661_v18  ;;  %v6703_v24 = vadd.f32 %v12448_v26, %v6664_v22  ;;  %v6663_v15 = vadd.f32 %v12511_v59, %v6503_v48  ;;  %v6506_v16 = vadd.f32 %v13230_v31, %v6087_v29 }
 0x3ef   : > { %6765 = vst.msk [vmem:[%s12476_s8 + $0x48] sm:$0xff] %vm3796_vm4, %v6733_v47  ;;  %v6086_v52 = vadd.f32 %v5975_v9, %v12265_v25  ;;  %v6645_v1 = vsel %vm3572_vm3, %v6582_v4, 0.0  ;;  %v6585_v49 = vrot.slane %v12562_v35, 1  ;;  %v6351_v45 = vadd.f32 %v12478_v5, %v5391_v19  ;;  %v9094_v21 = vpop.f32.mrf.mxu1  ;;  %v13231_v25 = vld [vmem:[#allocation60_spill] sm:$0xff]  ;;  %v13234_v35 = vld [vmem:[#allocation59_spill] sm:$0xff]  ;;  %v6294_v47 = vpop.f32.mrf.mxu0 }
 0x3f0   : > { %v6732_v43 = vmax.f32 %v6700_v42, 0.0  ;;  %v6735_v34 = vmax.f32 %v6703_v24, 0.0  ;;  %v6702_v55 = vadd.f32 %v12448_v26, %v6663_v15  ;;  %v6666_v39 = vadd.f32 %v12518_v53, %v6506_v16  ;;  %v13233_v5 = vld [vmem:[#allocation8_spill] sm:$0xff]  ;;  %v13236_v19 = vld [vmem:[#allocation79_spill] sm:$0xff]  ;;  %v13239_v15 = vld [vmem:[#allocation78_spill] sm:$0xff] }
 0x3f1   : > { %v6505_v59 = vadd.f32 %v12270_v23, %v6086_v52  ;;  %v12591_v2 = vadd.f32 %v12498_v37, %v5406_v7  ;;  %v5401_v38 = vadd.f32 %v13232_v0, %v13231_v25  ;;  %v6089_v8 = vadd.f32 %v9094_v21, %v13233_v5  ;;  %v5985_v28 = vpop.f32.mrf.mxu1  ;;  %v13240_v16 = vld [vmem:[#allocation63_spill] sm:$0xff] }
 0x3f2   : > { %6764 = vst.msk [vmem:[%s12476_s8 + $0x40] sm:$0xff] %vm3796_vm4, %v6732_v43  ;;  %v6583_v57 = vsel %vm3572_vm3, %v6581_v27, %v6582_v4  ;;  %6767 = vst.msk [vmem:[%s12476_s8 + $0x58] sm:$0xff] %vm3796_vm4, %v6735_v34  ;;  %v6734_v60 = vmax.f32 %v6702_v55, 0.0  ;;  %v6705_v53 = vadd.f32 %v12448_v26, %v6666_v39  ;;  %v6088_v37 = vadd.f32 %v5985_v28, %v12278_v40  ;;  %v13237_v27 = vld [vmem:[#allocation64_spill] sm:$0xff]  ;;  %v13241_v52 = vld [vmem:[#allocation7_spill] sm:$0xff] }
 0x3f3   : > { %v6665_v23 = vadd.f32 %v6577_v36, %v6505_v59  ;;  %v6646_v50 = vsel %vm3572_vm3, %v6585_v49, 0.0  ;;  %v6584_v30 = vrot.slane %v6351_v45, 1  ;;  %v5416_v32 = vadd.f32 %v13235_v54, %v13234_v35  ;;  %v9097_v12 = vpop.f32.mrf.mxu1 }
 0x3f4   : > { %v6508_v18 = vadd.f32 %v13236_v19, %v6089_v8  ;;  %6766 = vst.msk [vmem:[%s12476_s8 + $0x50] sm:$0xff] %vm3796_vm4, %v6734_v60  ;;  %v6737_v4 = vmax.f32 %v6705_v53, 0.0  ;;  %v6507_v36 = vadd.f32 %v12285_v20, %v6088_v37  ;;  %v6091_v40 = vadd.f32 %v9097_v12, %v12289_v58  ;;  %v13243_v8 = vld [vmem:[#allocation77_spill] sm:$0xff]  ;;  %v13245_v53 = vld [vmem:[#allocation38_spill] sm:$0xff]  ;;  %v13246_v19 = vld [vmem:[#allocation67_spill] sm:$0xff] }
 0x3f5   : > { %v6704_v22 = vadd.f32 %v12448_v26, %v6665_v23  ;;  %v6588_v48 = vrot.slane %v12591_v2, 1  ;;  %v6353_v29 = vadd.f32 %v12523_v6, %v5401_v38  ;;  %v5411_v33 = vadd.f32 %v13238_v63, %v13237_v27  ;;  %v5995_v42 = vpop.f32.mrf.mxu1 }
 0x3f6   : > { %v6668_v7 = vadd.f32 %v12552_v51, %v6508_v18  ;;  %6769 = vst.msk [vmem:[%s12476_s8 + $0x68] sm:$0xff] %vm3796_vm4, %v6737_v4  ;;  %v6667_v24 = vadd.f32 %v6580_v61, %v6507_v36  ;;  %v6510_v31 = vadd.f32 %v13239_v15, %v6091_v40  ;;  %v6090_v20 = vadd.f32 %v5995_v42, %v12299_v3  ;;  %v9162_v51 = vpop.f32.mrf.mxu0  ;;  %v13242_v3 = vld [vmem:[#allocation9_spill] sm:$0xff] }
 0x3f7   : > { %v6736_v9 = vmax.f32 %v6704_v22, 0.0  ;;  %v6356_v58 = vadd.f32 %v12544_v10, %v5416_v32  ;;  %v5426_v45 = vadd.f32 %v13241_v52, %v13240_v16  ;;  %v9100_v43 = vpop.f32.mrf.mxu1  ;;  %v6586_v21 = vsel %vm3572_vm3, %v6584_v30, %v6585_v49  ;;  %v13247_v18 = vld [vmem:[#allocation37_spill] sm:$0xff] }
 0x3f8   : > { %v6707_v6 = vadd.f32 %v12448_v26, %v6668_v7  ;;  %v6706_v34 = vadd.f32 %v12448_v26, %v6667_v24  ;;  %v6670_v61 = vadd.f32 %v6645_v1, %v6510_v31  ;;  %v6509_v55 = vadd.f32 %v12304_v56, %v6090_v20  ;;  %v13244_v56 = vld [vmem:[#allocation62_spill] sm:$0xff]  ;;  %v6304_v30 = vpop.f32.mrf.mxu0  ;;  %v13250_v20 = vld [vmem:[#allocation36_spill] sm:$0xff] }
 0x3f9   : > { %6768 = vst.msk [vmem:[%s12476_s8 + $0x60] sm:$0xff] %vm3796_vm4, %v6736_v9  ;;  %v6093_v39 = vadd.f32 %v9100_v43, %v13242_v3  ;;  %v6647_v10 = vsel %vm3572_vm3, %v6588_v48, 0.0  ;;  %v6587_v59 = vrot.slane %v6353_v29, 1  ;;  %v6355_v2 = vadd.f32 %v12567_v44, %v5411_v33  ;;  %v6005_v0 = vpop.f32.mrf.mxu1  ;;  %v13248_v29 = vld [vmem:[#allocation82_spill] sm:$0xff]  ;;  %v13251_v43 = vld [vmem:[#allocation80_spill] sm:$0xff] }
 0x3fa   : > { %v6739_v25 = vmax.f32 %v6707_v6, 0.0  ;;  %v6738_v49 = vmax.f32 %v6706_v34, 0.0  ;;  %v6709_v38 = vadd.f32 %v12448_v26, %v6670_v61  ;;  %v6669_v5 = vadd.f32 %v6583_v57, %v6509_v55  ;;  %v9165_v42 = vpop.f32.mrf.mxu0  ;;  %v13253_v61 = vld [vmem:[#allocation65_spill] sm:$0xff]  ;;  %v13254_v55 = vld [vmem:[#allocation10_spill] sm:$0xff] }
 0x3fb   : > { %v6512_v28 = vadd.f32 %v13243_v8, %v6093_v39  ;;  %v6591_v60 = vrot.slane %v6356_v58, 1  ;;  %v12635_v1 = vadd.f32 %v9159_v14, %v5426_v45  ;;  %v5421_v23 = vadd.f32 %v13245_v53, %v13244_v56  ;;  %v9103_v44 = vpop.f32.mrf.mxu1  ;;  %v13258_v56 = vld [vmem:[#allocation39_spill] sm:$0xff] }
 0x3fc   : > { %6771 = vst.msk [vmem:[%s12476_s8 + $0x78] sm:$0xff] %vm3796_vm4, %v6739_v25  ;;  %v6092_v37 = vadd.f32 %v6005_v0, %v12312_v41  ;;  %6770 = vst.msk [vmem:[%s12476_s8 + $0x70] sm:$0xff] %vm3796_vm4, %v6738_v49  ;;  %v6741_v35 = vmax.f32 %v6709_v38, 0.0  ;;  %v6708_v57 = vadd.f32 %v12448_v26, %v6669_v5  ;;  %v6095_v32 = vadd.f32 %v9103_v44, %v12323_v13  ;;  %v13255_v49 = vld [vmem:[#allocation11_spill] sm:$0xff] }
 0x3fd   : > { %v6672_v54 = vadd.f32 %v6646_v50, %v6512_v28  ;;  %v6590_v14 = vrot.slane %v6355_v2, 1  ;;  %v5436_v12 = vadd.f32 %v13247_v18, %v13246_v19  ;;  %v6015_v22 = vpop.f32.mrf.mxu1  ;;  %v6589_v41 = vsel %vm3572_vm3, %v6587_v59, %v6588_v48  ;;  %v6314_v59 = vpop.f32.mrf.mxu0  ;;  %v13256_v28 = vld [vmem:[#allocation70_spill] sm:$0xff]  ;;  %v13261_v19 = vld [vmem:[#allocation27_spill] sm:$0xff] }
 0x3fe   : > { %v6511_v4 = vadd.f32 %v12319_v11, %v6092_v37  ;;  %6773 = vst.msk [vmem:[%s12476_s8 + $0x88] sm:$0xff] %vm3796_vm4, %v6741_v35  ;;  %v6740_v36 = vmax.f32 %v6708_v57, 0.0  ;;  %v6514_v27 = vadd.f32 %v13248_v29, %v6095_v32  ;;  %v6094_v50 = vadd.f32 %v6015_v22, %v12331_v17  ;;  %v13249_v17 = vld [vmem:[#allocation66_spill] sm:$0xff] }
 0x3ff   : > { %v6711_v40 = vadd.f32 %v12448_v26, %v6672_v54  ;;  %v6648_v13 = vsel %vm3572_vm3, %v6591_v60, 0.0  ;;  %v6594_v63 = vrot.slane %v12635_v1, 1  ;;  %v6357_v33 = vadd.f32 %v6294_v47, %v5421_v23  ;;  %v9106_v11 = vpop.f32.mrf.mxu1  ;;  %v9168_v37 = vpop.f32.mrf.mxu0  ;;  %v13259_v54 = vld [vmem:[#allocation13_spill] sm:$0xff]  ;;  %v13263_v29 = vld [vmem:[#allocation14_spill] sm:$0xff] }
 0x400   : > { %v6671_v7 = vadd.f32 %v6586_v21, %v6511_v4  ;;  %6772 = vst.msk [vmem:[%s12476_s8 + $0x80] sm:$0xff] %vm3796_vm4, %v6740_v36  ;;  %v6674_v9 = vadd.f32 %v6647_v10, %v6514_v27  ;;  %v6513_v24 = vadd.f32 %v12336_v62, %v6094_v50  ;;  %v6097_v15 = vadd.f32 %v9106_v11, %v12340_v46  ;;  %v13252_v21 = vld [vmem:[#allocation40_spill] sm:$0xff]  ;;  %v13264_v50 = vld [vmem:[#allocation41_spill] sm:$0xff]  ;;  %v13265_v11 = vld [vmem:[#allocation87_spill] sm:$0xff] }
 0x401   : > { %v6743_v48 = vmax.f32 %v6711_v40, 0.0  ;;  %v12661_v31 = vadd.f32 %v9162_v51, %v5436_v12  ;;  %v5431_v58 = vadd.f32 %v13250_v20, %v13249_v17  ;;  %v6025_v52 = vpop.f32.mrf.mxu1  ;;  %v6592_v47 = vsel %vm3572_vm3, %v6590_v14, %v6591_v60  ;;  %v13257_v60 = vld [vmem:[#allocation12_spill] sm:$0xff]  ;;  %v13262_v12 = vld [vmem:[#allocation89_spill] sm:$0xff]  ;;  %v13267_v17 = vld [vmem:[#allocation91_spill] sm:$0xff] }
 0x402   : > { %v6710_v16 = vadd.f32 %v12448_v26, %v6671_v7  ;;  %v6713_v45 = vadd.f32 %v12448_v26, %v6674_v9  ;;  %v6673_v6 = vadd.f32 %v6589_v41, %v6513_v24  ;;  %v6516_v62 = vadd.f32 %v13251_v43, %v6097_v15  ;;  %v6324_v15 = vpop.f32.mrf.mxu0 }
 0x403   : > { %6775 = vst.msk [vmem:[%s12476_s8 + $0x98] sm:$0xff] %vm3796_vm4, %v6743_v48  ;;  %v6096_v46 = vadd.f32 %v6025_v52, %v13252_v21  ;;  %v6649_v51 = vsel %vm3572_vm3, %v6594_v63, 0.0  ;;  %v6593_v34 = vrot.slane %v6357_v33, 1  ;;  %v5446_v3 = vadd.f32 %v13254_v55, %v13253_v61  ;;  %v9109_v10 = vpop.f32.mrf.mxu1 }
 0x404   : > { %v6742_v39 = vmax.f32 %v6710_v16, 0.0  ;;  %v6745_v2 = vmax.f32 %v6713_v45, 0.0  ;;  %v6712_v25 = vadd.f32 %v12448_v26, %v6673_v6  ;;  %v6676_v0 = vadd.f32 %v6648_v13, %v6516_v62 }
 0x405   : > { %v6515_v38 = vadd.f32 %v13255_v49, %v6096_v46  ;;  %v6597_v5 = vrot.slane %v12661_v31, 1  ;;  %v6359_v8 = vadd.f32 %v6304_v30, %v5431_v58  ;;  %v5441_v1 = vadd.f32 %v13257_v60, %v13256_v28  ;;  %v6035_v23 = vpop.f32.mrf.mxu1  ;;  %v13260_v30 = vld [vmem:[#allocation69_spill] sm:$0xff]  ;;  %v13268_v58 = vld [vmem:[#allocation15_spill] sm:$0xff]  ;;  %v13269_v46 = vld [vmem:[#allocation42_spill] sm:$0xff] }
 0x406   : > { %6774 = vst.msk [vmem:[%s12476_s8 + $0x90] sm:$0xff] %vm3796_vm4, %v6742_v39  ;;  %v6099_v53 = vadd.f32 %v9109_v10, %v13258_v56  ;;  %6777 = vst.msk [vmem:[%s12476_s8 + $0xa8] sm:$0xff] %vm3796_vm4, %v6745_v2  ;;  %v6744_v44 = vmax.f32 %v6712_v25, 0.0  ;;  %v6715_v35 = vadd.f32 %v12448_v26, %v6676_v0  ;;  %v6098_v32 = vadd.f32 %v6035_v23, %v13259_v54  ;;  %v13271_v49 = vld [vmem:[#allocation94_spill] sm:$0xff] }
 0x407   : > { %v6675_v57 = vadd.f32 %v6592_v47, %v6515_v38  ;;  %v6362_v14 = vadd.f32 %v9165_v42, %v5446_v3  ;;  %v5456_v18 = vadd.f32 %v13261_v19, %v13260_v30  ;;  %v6595_v22 = vsel %vm3572_vm3, %v6593_v34, %v6594_v63  ;;  %v9112_v41 = vpop.f32.mrf.mxu1  ;;  %v13266_v42 = vld [vmem:[#allocation16_spill] sm:$0xff]  ;;  %v13273_v28 = vld [vmem:[#allocation90_spill] sm:$0xff] }
 0x408   : > { %v6518_v4 = vadd.f32 %v13262_v12, %v6099_v53  ;;  %6776 = vst.msk [vmem:[%s12476_s8 + $0xa0] sm:$0xff] %vm3796_vm4, %v6744_v44  ;;  %v6747_v36 = vmax.f32 %v6715_v35, 0.0  ;;  %v6517_v27 = vadd.f32 %v13263_v29, %v6098_v32  ;;  %v6101_v13 = vadd.f32 %v9112_v41, %v13264_v50  ;;  %v13270_v34 = vld [vmem:[#allocation48_spill] sm:$0xff]  ;;  %v13274_v53 = vld [vmem:[#allocation17_spill] sm:$0xff] }
 0x409   : > { %v6714_v40 = vadd.f32 %v12448_v26, %v6675_v57  ;;  %v6596_v33 = vrot.slane %v6359_v8, 1  ;;  %v6361_v7 = vadd.f32 %v6314_v59, %v5441_v1  ;;  %v5451_v48 = vadd.f32 %v13266_v42, %v13265_v11  ;;  %v6045_v24 = vpop.f32.mrf.mxu1  ;;  %v13272_v8 = vld [vmem:[#allocation26_spill] sm:$0xff] }
 0x40a   : > { %v6678_v9 = vadd.f32 %v6649_v51, %v6518_v4  ;;  %6779 = vst.msk [vmem:[%s12476_s8 + $0xb8] sm:$0xff] %vm3796_vm4, %v6747_v36  ;;  %v6677_v31 = vadd.f32 %v6595_v22, %v6517_v27  ;;  %v6520_v20 = vadd.f32 %v13267_v17, %v6101_v13  ;;  %v6100_v16 = vadd.f32 %v6045_v24, %v13268_v58  ;;  %v13275_v57 = vld [vmem:[#allocation18_spill] sm:$0xff]  ;;  %v13277_v22 = vld [vmem:[#allocation93_spill] sm:$0xff] }
 0x40b   : > { %v6746_v63 = vmax.f32 %v6714_v40, 0.0  ;;  %v6650_v52 = vsel %vm3572_vm3, %v6597_v5, 0.0  ;;  %v6600_v47 = vrot.slane %v6362_v14, 1  ;;  %v6364_v45 = vadd.f32 %v9168_v37, %v5456_v18  ;;  %v9115_v43 = vpop.f32.mrf.mxu1  ;;  %v13276_v14 = vld [vmem:[#allocation28_spill] sm:$0xff]  ;;  %v13278_v40 = vld [vmem:[#allocation95_spill] sm:$0xff] }
 0x40c   : > { %v6717_v6 = vadd.f32 %v12448_v26, %v6678_v9  ;;  %v6716_v62 = vadd.f32 %v12448_v26, %v6677_v31  ;;  %v6680_v21 = vadd.f32 %v6650_v52, %v6520_v20  ;;  %v6519_v51 = vadd.f32 %v13269_v46, %v6100_v16 }
 0x40d   : > { %6778 = vst.msk [vmem:[%s12476_s8 + $0xb0] sm:$0xff] %vm3796_vm4, %v6746_v63  ;;  %v6103_v61 = vadd.f32 %v9115_v43, %v13270_v34  ;;  %v6599_v55 = vrot.slane %v6361_v7, 1  ;;  %v6363_v3 = vadd.f32 %v6324_v15, %v5451_v48  ;;  %v6598_v10 = vsel %vm3572_vm3, %v6596_v33, %v6597_v5  ;;  %v6055_v59 = vpop.f32.mrf.mxu1 }
 0x40e   : > { %v6749_v39 = vmax.f32 %v6717_v6, 0.0  ;;  %v6748_v2 = vmax.f32 %v6716_v62, 0.0  ;;  %v6719_v25 = vadd.f32 %v12448_v26, %v6680_v21  ;;  %v6679_v0 = vadd.f32 %v6598_v10, %v6519_v51 }
 0x40f   : > { %v6522_v38 = vadd.f32 %v13271_v49, %v6103_v61  ;;  %v4999_v60 = vadd.f32 %v13273_v28, %v13272_v8  ;;  %v6651_v1 = vsel %vm3572_vm3, %v6600_v47, 0.0  ;;  %v6603_v56 = vrot.slane %v6364_v45, 1  ;;  %v9118_v37 = vpop.f32.mrf.mxu1 }
 0x410   : > { %6781 = vst.msk [vmem:[%s12476_s8 + $0xc8] sm:$0xff] %vm3796_vm4, %v6749_v39  ;;  %v6102_v23 = vadd.f32 %v6055_v59, %v13274_v53  ;;  %6780 = vst.msk [vmem:[%s12476_s8 + $0xc0] sm:$0xff] %vm3796_vm4, %v6748_v2  ;;  %v6751_v5 = vmax.f32 %v6719_v25, 0.0  ;;  %v6718_v44 = vadd.f32 %v12448_v26, %v6679_v0  ;;  %v6105_v54 = vadd.f32 %v9118_v37, %v13275_v57 }
 0x411   : > { %v6682_v35 = vadd.f32 %v6651_v1, %v6522_v38  ;;  %v6602_v32 = vrot.slane %v6363_v3, 1  ;;  %v6601_v19 = vsel %vm3572_vm3, %v6599_v55, %v6600_v47  ;;  %v6065_v18 = vpop.f32.mrf.mxu1  ;;  %v13279_v29 = vrot.slane %v13278_v40, 7 }
 0x412   : > { %v6521_v30 = vadd.f32 %v13276_v14, %v6102_v23  ;;  %6783 = vst.msk [vmem:[%s12476_s8 + $0xd8] sm:$0xff] %vm3796_vm4, %v6751_v5  ;;  %v6750_v12 = vmax.f32 %v6718_v44, 0.0  ;;  %v6524_v41 = vadd.f32 %v13277_v22, %v6105_v54  ;;  %v6104_v36 = vadd.f32 %v6065_v18, %v4999_v60 }
 0x413   : > { %v6721_v4 = vadd.f32 %v12448_v26, %v6682_v35  ;;  %v6492_v27 = vsel %vm3391_vm2, 0.0, %v13279_v29  ;;  %v6652_v50 = vsel %vm3572_vm3, %v6603_v56, 0.0  ;;  %v6604_v48 = vsel %vm3572_vm3, %v6602_v32, %v6603_v56 }
 0x414   : > { %v6681_v13 = vadd.f32 %v6601_v19, %v6521_v30  ;;  %6782 = vst.msk [vmem:[%s12476_s8 + $0xd0] sm:$0xff] %vm3796_vm4, %v6750_v12  ;;  %v6684_v7 = vadd.f32 %v6652_v50, %v6524_v41  ;;  %v6523_v11 = vadd.f32 %v6492_v27, %v6104_v36 }
 0x415   : > { %v6753_v33 = vmax.f32 %v6721_v4, 0.0 }
 0x416   : > { %v6720_v42 = vadd.f32 %v12448_v26, %v6681_v13  ;;  %v6723_v9 = vadd.f32 %v12448_v26, %v6684_v7  ;;  %v6683_v24 = vadd.f32 %v6604_v48, %v6523_v11 }
 0x417   : > { %6785 = vst.msk [vmem:[%s12476_s8 + $0xe8] sm:$0xff] %vm3796_vm4, %v6753_v33 }
 0x418   : > { %v6752_v15 = vmax.f32 %v6720_v42, 0.0  ;;  %v6755_v63 = vmax.f32 %v6723_v9, 0.0  ;;  %v6722_v31 = vadd.f32 %v12448_v26, %v6683_v24 }
 0x41a   : > { %6784 = vst.msk [vmem:[%s12476_s8 + $0xe0] sm:$0xff] %vm3796_vm4, %v6752_v15  ;;  %6787 = vst.msk [vmem:[%s12476_s8 + $0xf8] sm:$0xff] %vm3796_vm4, %v6755_v63  ;;  %v6754_v17 = vmax.f32 %v6722_v31, 0.0 }
 0x41c   : > { %6786 = vst.msk [vmem:[%s12476_s8 + $0xf0] sm:$0xff] %vm3796_vm4, %v6754_v17 }
 0x41d PF: > { %s17_s2 = sadd.s32 1, %s9226_s2   ;;  %s13280_s23 = smov %s9222_s24 }
 0x41e   : > { %p14_p5 = scmp.ge.s32.totalorder %s17_s2, 4   ;;  %s13281_s24 = smov %s13283_s25 }
 0x420   :  { %16 = sbr.rel (!%p14_p5) target bundleno = 2 (0x2), region = 127 }

</bundles_post_ra>
